<compile_context>
chip_gen: v7x
topology: tpu7x:2x2x1
jax: 0.10.0
libtpu: 0.0.40
codegen_flags: <defaults>
</compile_context>

<pallas_src>
import functools

import jax
import jax.numpy as jnp
from jax import lax
from jax.experimental import pallas as pl

# ----------------------------- model config ---------------------------------
PATCH = 4
EMBED = 32
NUM_HEADS = 4
HEAD_DIM = EMBED // NUM_HEADS
DEPTH = 2
MLP_HIDDEN = 4 * EMBED
LN_EPS = 1e-6
ATTN_SCALE = HEAD_DIM ** -0.5
NEG_INF = -1e30
LANES = 128

IMAGENET_MEAN = jnp.array([0.485, 0.456, 0.406], dtype=jnp.float32)
IMAGENET_STD = jnp.array([0.229, 0.224, 0.225], dtype=jnp.float32)

# rows of the packed per-block bias slab (DEPTH, 4, 128)
_V_QKVB, _V_PROJB, _V_FC1B, _V_FC2B = range(4)


# ----------------------------- fused Pallas kernel ---------------------------
def _layernorm(x):
    # pure normalize; affine terms are folded into the following GEMM
    mu = jnp.mean(x, axis=-1, keepdims=True)
    var = jnp.mean((x - mu) ** 2, axis=-1, keepdims=True)
    return (x - mu) * lax.rsqrt(var + LN_EPS)


def fused_vit_kernel(xin_ref, pew_ref, rowadd_ref, qid_ref, kid_ref,
                     qkvw_ref, projw_ref, fc1w_ref, fc2w_ref,
                     vec_ref, fvec_ref, o_ref):
    f32 = jnp.float32
    bf16 = jnp.bfloat16
    M = o_ref.shape[0]            # padded token-row count (multiple of 8)

    # Patch embed (Normalize folded into pew / rowadd). rowadd carries the
    # folded patch bias, cls token and positional embedding; padded rows are 0.
    x = jnp.dot(xin_ref[...], pew_ref[...],
                preferred_element_type=f32) + rowadd_ref[...]        # (M, C) f32

    for d in range(DEPTH):        # static unroll over depth (stacked weights)
        vecs = vec_ref[d]                                            # (4, 128)
        qkv_b = vecs[_V_QKVB:_V_QKVB + 1, :3 * EMBED]
        proj_b = vecs[_V_PROJB:_V_PROJB + 1, :EMBED]
        fc1_b = vecs[_V_FC1B:_V_FC1B + 1, :MLP_HIDDEN]
        fc2_b = vecs[_V_FC2B:_V_FC2B + 1, :EMBED]

        # ---------------- attention branch (dv2_sdpa) ----------------
        # LN1 affine + attention scale folded into qkvw/qkv_b at trace time.
        h = _layernorm(x)
        qkv = jnp.dot(h.astype(bf16), qkvw_ref[d],
                      preferred_element_type=f32) + qkv_b            # (M, 3C)

        # Stack heads along rows: (M, 4*8) lane slices -> (4M, 8).
        def _stack(base):
            return jnp.concatenate(
                [qkv[:, base + hd * HEAD_DIM: base + (hd + 1) * HEAD_DIM]
                 for hd in range(NUM_HEADS)], axis=0)                # (4M, 8)

        q_s = _stack(0).astype(bf16)
        k_s = _stack(EMBED).astype(bf16)
        v_s = _stack(2 * EMBED).astype(bf16)

        # One QK^T for all heads; mask blocks cross-head / cross-image / pad.
        s = lax.dot_general(q_s, k_s, (((1,), (1,)), ((), ())),
                            preferred_element_type=f32)              # (4M, 4M)
        s = jnp.where(qid_ref[...] == kid_ref[...], s, NEG_INF)
        s = s - jnp.max(s, axis=-1, keepdims=True)
        p = jnp.exp(s)
        p = p * pl.reciprocal(jnp.sum(p, axis=-1, keepdims=True), approx=True)

        hv = jnp.dot(p.astype(bf16), v_s, preferred_element_type=f32)   # (4M, 8)

        # Single GEMM against head-block-concatenated (ls1-folded) proj weight,
        # then pick each head's diagonal block and sum.
        big = jnp.dot(hv.astype(bf16), projw_ref[d],
                      preferred_element_type=f32)                    # (4M, 128)
        attn = (big[0:M, 0:EMBED]
                + big[M:2 * M, EMBED:2 * EMBED]
                + big[2 * M:3 * M, 2 * EMBED:3 * EMBED]
                + big[3 * M:4 * M, 3 * EMBED:4 * EMBED]
                + proj_b)
        x = x + attn                      # LayerScale ls1 already folded in

        # ---------------- MLP branch ----------------
        h2 = _layernorm(x)                # LN2 affine folded into fc1 weights
        h2 = jnp.dot(h2.astype(bf16), fc1w_ref[d],
                     preferred_element_type=f32) + fc1_b
        # exact (erf) GELU, matching nn.GELU()
        h2 = 0.5 * h2 * (1.0 + lax.erf(h2 * jnp.float32(0.7071067811865476)))
        h2 = jnp.dot(h2.astype(bf16), fc2w_ref[d],
                     preferred_element_type=f32) + fc2_b
        x = x + h2                        # LayerScale ls2 already folded in

    # final LayerNorm (with affine)
    fvec = fvec_ref[...]
    mu = jnp.mean(x, axis=-1, keepdims=True)
    var = jnp.mean((x - mu) ** 2, axis=-1, keepdims=True)
    o_ref[...] = ((x - mu) * lax.rsqrt(var + LN_EPS)
                  * fvec[0:1, :EMBED] + fvec[1:2, :EMBED])


# ----------------------------- parameter init --------------------------------
def init_params(key, img_size=16):
    def nrm(k, shape, scale=0.02):
        return (scale * jax.random.normal(k, shape)).astype(jnp.float32)

    keys = jax.random.split(key, 6 + DEPTH)
    P = 3 * PATCH * PATCH
    params = {
        # conv weight (EMBED, 3, p, p) flattened to (3*p*p, EMBED) for x @ W
        "patch_w": nrm(keys[0], (P, EMBED)),
        "patch_b": jnp.zeros((1, EMBED), jnp.float32),
        "cls_token": nrm(keys[1], (1, 1, EMBED)),
        "norm_w": jnp.ones((1, EMBED), jnp.float32),
        "norm_b": jnp.zeros((1, EMBED), jnp.float32),
    }
    n_tokens = 1 + (img_size // PATCH) * (img_size // PATCH)
    params["pos_embed"] = nrm(keys[2], (1, n_tokens, EMBED))

    blocks = []
    for d in range(DEPTH):
        bk = jax.random.split(keys[6 + d], 8)
        blocks.append({
            "ln1_w": jnp.ones((1, EMBED), jnp.float32),
            "ln1_b": jnp.zeros((1, EMBED), jnp.float32),
            "qkv_w": nrm(bk[0], (EMBED, 3 * EMBED)),     # (in, out) = W.T
            "qkv_b": nrm(bk[1], (1, 3 * EMBED)),
            "proj_w": nrm(bk[2], (EMBED, EMBED)),
            "proj_b": jnp.zeros((1, EMBED), jnp.float32),
            "ls1": jnp.full((1, EMBED), 1e-5, jnp.float32),
            "ln2_w": jnp.ones((1, EMBED), jnp.float32),
            "ln2_b": jnp.zeros((1, EMBED), jnp.float32),
            "fc1_w": nrm(bk[3], (EMBED, MLP_HIDDEN)),
            "fc1_b": jnp.zeros((1, MLP_HIDDEN), jnp.float32),
            "fc2_w": nrm(bk[4], (MLP_HIDDEN, EMBED)),
            "fc2_b": jnp.zeros((1, EMBED), jnp.float32),
            "ls2": jnp.full((1, EMBED), 1e-5, jnp.float32),
        })
    params["blocks"] = blocks
    return params


# ----------------------------- packing helpers -------------------------------
def _pad_row(v, lanes=LANES):
    v = v.reshape(-1)
    return jnp.pad(v, (0, lanes - v.shape[0]))


def _fold_block(blk):
    """Fold LN affines, attention scale and LayerScales into GEMM weights."""
    ln1w, ln1b = blk["ln1_w"][0], blk["ln1_b"][0]
    scale_cols = jnp.concatenate(
        [jnp.full((EMBED,), ATTN_SCALE, jnp.float32),
         jnp.ones((2 * EMBED,), jnp.float32)])
    qkv_w = (ln1w[:, None] * blk["qkv_w"]) * scale_cols[None, :]       # (C, 3C)
    qkv_b = (ln1b @ blk["qkv_w"] + blk["qkv_b"][0]) * scale_cols       # (3C,)

    ls1 = blk["ls1"][0]
    proj_w = blk["proj_w"] * ls1[None, :]                              # (C, C)
    proj_b = blk["proj_b"][0] * ls1                                    # (C,)
    # head-block-concatenated proj: (HEAD_DIM, NUM_HEADS*EMBED)
    proj_cat = (proj_w.reshape(NUM_HEADS, HEAD_DIM, EMBED)
                .transpose(1, 0, 2).reshape(HEAD_DIM, NUM_HEADS * EMBED))

    ln2w, ln2b = blk["ln2_w"][0], blk["ln2_b"][0]
    fc1_w = ln2w[:, None] * blk["fc1_w"]                               # (C, 4C)
    fc1_b = ln2b @ blk["fc1_w"] + blk["fc1_b"][0]                      # (4C,)

    ls2 = blk["ls2"][0]
    fc2_w = blk["fc2_w"] * ls2[None, :]                                # (4C, C)
    fc2_b = blk["fc2_b"][0] * ls2                                      # (C,)

    vec = jnp.stack([_pad_row(qkv_b), _pad_row(proj_b),
                     _pad_row(fc1_b), _pad_row(fc2_b)])                # (4, 128)
    return qkv_w, proj_cat, fc1_w, fc2_w, vec


# ----------------------------- forward (glue + fused kernel) -----------------
@functools.partial(jax.jit, static_argnames=("return_summary",))
def dinov2_featurizer_forward(img, params, return_summary=False):
    """img: (B, 3, H, W) float32, NCHW (PyTorch convention)."""
    B, Cin, H, W = img.shape
    h, w = H // PATCH, W // PATCH
    hw = h * w
    n_tok = 1 + hw
    n_valid = B * n_tok
    M = ((n_valid + 7) // 8) * 8            # single padding to sublane multiple
    Pdim = Cin * PATCH * PATCH

    # Patchify (layout only): (B,3,H,W) -> (B, h*w, 3*p*p), feature order (c,ph,pw)
    patches = img.reshape(B, Cin, h, PATCH, w, PATCH)
    patches = patches.transpose(0, 2, 4, 1, 3, 5).reshape(B, hw, Pdim)

    # Dense token packing: [img0: cls,patches | img1: cls,patches | ... | pad]
    x_tok = jnp.concatenate([jnp.zeros((B, 1, Pdim), jnp.float32), patches],
                            axis=1).reshape(n_valid, Pdim)
    x_in = jnp.zeros((M, Pdim), jnp.float32).at[:n_valid].set(x_tok)
    x_in = x_in.astype(jnp.bfloat16)

    # Fold input_conditioner Normalize(mean,std) into the patch-embed weights.
    mean_vec = jnp.repeat(IMAGENET_MEAN, PATCH * PATCH)      # (Pdim,)
    std_vec = jnp.repeat(IMAGENET_STD, PATCH * PATCH)
    pe_w = (params["patch_w"] / std_vec[:, None]).astype(jnp.bfloat16)
    pe_b = params["patch_b"] - (mean_vec / std_vec) @ params["patch_w"]  # (1, C)

    # Per-row additive term: folded bias + pos embed (+ cls token on cls rows).
    per_img = jnp.concatenate(
        [params["cls_token"][0] + params["pos_embed"][0, :1],   # (1, C)
         pe_b + params["pos_embed"][0, 1:]], axis=0)            # (n_tok, C)
    row_add = jnp.zeros((M, EMBED), jnp.float32).at[:n_valid].set(
        jnp.tile(per_img, (B, 1)))

    # O(M) mask-id vectors (mask itself is built in-kernel):
    # attention row/col r = head*M + token; valid iff same head, same image,
    # and key token is not padding.
    tok = jnp.arange(M, dtype=jnp.int32)
    img_of_tok = tok // n_tok
    head = jnp.arange(NUM_HEADS, dtype=jnp.int32)
    base_id = head[:, None] * B + img_of_tok[None, :]                  # (H, M)
    is_pad = (tok >= n_valid)[None, :]
    kid = jnp.where(is_pad, -1, base_id).reshape(1, NUM_HEADS * M)
    qid = jnp.where(is_pad, -2, base_id).reshape(NUM_HEADS * M, 1)

    # Stack per-depth folded weights (bf16 operands) and packed bias slab.
    folded = [_fold_block(b) for b in params["blocks"]]
    qkv_w = jnp.stack([f[0] for f in folded]).astype(jnp.bfloat16)     # (D,C,3C)
    proj_w = jnp.stack([f[1] for f in folded]).astype(jnp.bfloat16)    # (D,8,128)
    fc1_w = jnp.stack([f[2] for f in folded]).astype(jnp.bfloat16)     # (D,C,4C)
    fc2_w = jnp.stack([f[3] for f in folded]).astype(jnp.bfloat16)     # (D,4C,C)
    vec = jnp.stack([f[4] for f in folded])                            # (D,4,128)
    fvec = jnp.stack([_pad_row(params["norm_w"]),
                      _pad_row(params["norm_b"])])                     # (2, 128)

    out = pl.pallas_call(
        fused_vit_kernel,
        out_shape=jax.ShapeDtypeStruct((M, EMBED), jnp.float32),
    )(x_in, pe_w, row_add, qid, kid, qkv_w, proj_w, fc1_w, fc2_w, vec, fvec)

    valid = out[:n_valid].reshape(B, n_tok, EMBED)
    summary = valid[:, 0]                                  # x_norm_clstoken
    feats = valid[:, 1:]                                   # x_norm_patchtokens
    feats = feats.reshape(B, h, w, EMBED).transpose(0, 3, 1, 2)  # b (h w) c -> b c h w
    feats = feats.astype(jnp.float32)

    if return_summary:
        return summary, feats
    return feats


# ----------------------------- pure-JAX reference ----------------------------
def _reference_forward(img, params):
    B, Cin, H, W = img.shape
    h, w = H // PATCH, W // PATCH
    x = (img - IMAGENET_MEAN[None, :, None, None]) / IMAGENET_STD[None, :, None, None]
    patches = x.reshape(B, Cin, h, PATCH, w, PATCH).transpose(0, 2, 4, 1, 3, 5)
    patches = patches.reshape(B, h * w, Cin * PATCH * PATCH)
    tok = patches @ params["patch_w"] + params["patch_b"]
    cls = jnp.broadcast_to(params["cls_token"], (B, 1, EMBED))
    tok = jnp.concatenate([cls, tok], axis=1) + params["pos_embed"]

    def ln(t, wt, bs):
        mu = t.mean(-1, keepdims=True)
        var = ((t - mu) ** 2).mean(-1, keepdims=True)
        return (t - mu) / jnp.sqrt(var + LN_EPS) * wt + bs

    for blk in params["blocks"]:
        hN = ln(tok, blk["ln1_w"], blk["ln1_b"])
        qkv = hN @ blk["qkv_w"] + blk["qkv_b"]
        q, k, v = jnp.split(qkv, 3, axis=-1)

        def heads(t):
            return t.reshape(B, -1, NUM_HEADS, HEAD_DIM).transpose(0, 2, 1, 3)

        q, k, v = heads(q), heads(k), heads(v)
        s = jnp.einsum("bhnd,bhmd->bhnm", q, k) * ATTN_SCALE
        p = jax.nn.softmax(s, axis=-1)
        o = jnp.einsum("bhnm,bhmd->bhnd", p, v).transpose(0, 2, 1, 3)
        o = o.reshape(B, -1, EMBED) @ blk["proj_w"] + blk["proj_b"]
        tok = tok + o * blk["ls1"]

        hN = ln(tok, blk["ln2_w"], blk["ln2_b"])
        hN = hN @ blk["fc1_w"] + blk["fc1_b"]
        hN = 0.5 * hN * (1.0 + lax.erf(hN / jnp.sqrt(2.0)))
        hN = hN @ blk["fc2_w"] + blk["fc2_b"]
        tok = tok + hN * blk["ls2"]

    tok = ln(tok, params["norm_w"], params["norm_b"])
    summary = tok[:, 0]
    feats = tok[:, 1:].reshape(B, h, w, EMBED).transpose(0, 3, 1, 2)
    return summary, feats


# ----------------------------- main -------------------------------------------
if __name__ == "__main__":
    key = jax.random.PRNGKey(0)
    k_img, k_params = jax.random.split(key)

    B, Cin, H, W = 2, 3, 16, 16      # small demo shape; h = w = 4 patches
    img = jax.random.uniform(k_img, (B, Cin, H, W), dtype=jnp.float32)
    params = init_params(k_params, img_size=H)

    feats = dinov2_featurizer_forward(img, params, return_summary=False)
    feats = jax.block_until_ready(feats)
    assert feats.shape == (B, EMBED, H // PATCH, W // PATCH), feats.shape
    assert feats.dtype == jnp.float32
    assert bool(jnp.all(jnp.isfinite(feats)))

    summary, feats2 = dinov2_featurizer_forward(img, params, return_summary=True)
    jax.block_until_ready((summary, feats2))
    assert summary.shape == (B, EMBED)

    # Loose tolerance: kernel uses bf16 matmul operands / approx reciprocal.
    ref_summary, ref_feats = _reference_forward(img, params)
    max_diff_f = float(jnp.max(jnp.abs(feats - ref_feats)))
    max_diff_s = float(jnp.max(jnp.abs(summary - ref_summary)))
    assert max_diff_f < 0.2 and max_diff_s < 0.2, (max_diff_f, max_diff_s)

    print("KERNEL_OK")
</pallas_src>

<mosaic_0001>
module attributes {stable_mosaic.version = 11 : i64} {
  func.func @fused_vit_kernel(%arg0: memref<40x48xbf16, #tpu.memory_space<vmem>>, %arg1: memref<48x32xbf16, #tpu.memory_space<vmem>>, %arg2: memref<40x32xf32, #tpu.memory_space<vmem>>, %arg3: memref<160x1xi32, #tpu.memory_space<vmem>>, %arg4: memref<1x160xi32, #tpu.memory_space<vmem>>, %arg5: memref<2x32x96xbf16, #tpu.memory_space<vmem>>, %arg6: memref<2x8x128xbf16, #tpu.memory_space<vmem>>, %arg7: memref<2x32x128xbf16, #tpu.memory_space<vmem>>, %arg8: memref<2x128x32xbf16, #tpu.memory_space<vmem>>, %arg9: memref<2x4x128xf32, #tpu.memory_space<vmem>>, %arg10: memref<2x128xf32, #tpu.memory_space<vmem>>, %arg11: memref<40x32xf32, #tpu.memory_space<vmem>>) attributes {dimension_semantics = [], scalar_prefetch = 0 : i64, scratch_operands = 0 : i64, tpu.core_type = #tpu.core_type<tc>} {
    %c0 = arith.constant 0 : index
    %c0_0 = arith.constant 0 : index
    %0 = vector.load %arg0[%c0, %c0_0] : memref<40x48xbf16, #tpu.memory_space<vmem>>, vector<40x48xbf16>
    %c0_1 = arith.constant 0 : index
    %c0_2 = arith.constant 0 : index
    %1 = vector.load %arg1[%c0_1, %c0_2] : memref<48x32xbf16, #tpu.memory_space<vmem>>, vector<48x32xbf16>
    %cst = arith.constant dense<0.000000e+00> : vector<40x32xf32>
    %2 = tpu.matmul %0, %1, %cst {dimension_numbers = #tpu.dot_dimension_numbers<[1], [0], [0], [1], [0, 0, 1, 1], [], []>} : vector<40x48xbf16>, vector<48x32xbf16>, vector<40x32xf32> -> vector<40x32xf32>
    %c0_3 = arith.constant 0 : index
    %c0_4 = arith.constant 0 : index
    %3 = vector.load %arg2[%c0_3, %c0_4] : memref<40x32xf32, #tpu.memory_space<vmem>>, vector<40x32xf32>
    %4 = arith.addf %2, %3 : vector<40x32xf32>
    %c0_5 = arith.constant 0 : index
    %c0_6 = arith.constant 0 : index
    %c0_7 = arith.constant 0 : index
    %5 = vector.load %arg9[%c0_5, %c0_6, %c0_7] : memref<2x4x128xf32, #tpu.memory_space<vmem>>, vector<1x4x128xf32>
    %6 = vector.shape_cast %5 : vector<1x4x128xf32> to vector<4x128xf32>
    %7 = vector.extract_strided_slice %6 {offsets = [0, 0], sizes = [1, 96], strides = [1, 1]} : vector<4x128xf32> to vector<1x96xf32>
    %8 = vector.extract_strided_slice %6 {offsets = [1, 0], sizes = [1, 32], strides = [1, 1]} : vector<4x128xf32> to vector<1x32xf32>
    %9 = vector.extract_strided_slice %6 {offsets = [2, 0], sizes = [1, 128], strides = [1, 1]} : vector<4x128xf32> to vector<1x128xf32>
    %10 = vector.extract_strided_slice %6 {offsets = [3, 0], sizes = [1, 32], strides = [1, 1]} : vector<4x128xf32> to vector<1x32xf32>
    %cst_8 = arith.constant dense<0.000000e+00> : vector<40xf32>
    %11 = vector.multi_reduction <add>, %4, %cst_8 [1] : vector<40x32xf32> to vector<40xf32>
    %12 = vector.shape_cast %11 : vector<40xf32> to vector<40x1xf32>
    %cst_9 = arith.constant 3.200000e+01 : f32
    %13 = vector.broadcast %cst_9 : f32 to vector<40x1xf32>
    %14 = arith.divf %12, %13 : vector<40x1xf32>
    %15 = vector.broadcast %14 : vector<40x1xf32> to vector<40x32xf32>
    %16 = arith.subf %4, %15 : vector<40x32xf32>
    %17 = arith.mulf %16, %16 : vector<40x32xf32>
    %cst_10 = arith.constant dense<0.000000e+00> : vector<40xf32>
    %18 = vector.multi_reduction <add>, %17, %cst_10 [1] : vector<40x32xf32> to vector<40xf32>
    %19 = vector.shape_cast %18 : vector<40xf32> to vector<40x1xf32>
    %cst_11 = arith.constant 3.200000e+01 : f32
    %20 = vector.broadcast %cst_11 : f32 to vector<40x1xf32>
    %21 = arith.divf %19, %20 : vector<40x1xf32>
    %22 = vector.broadcast %14 : vector<40x1xf32> to vector<40x32xf32>
    %23 = arith.subf %4, %22 : vector<40x32xf32>
    %cst_12 = arith.constant 9.99999997E-7 : f32
    %24 = vector.broadcast %cst_12 : f32 to vector<40x1xf32>
    %25 = arith.addf %21, %24 : vector<40x1xf32>
    %26 = math.rsqrt %25 : vector<40x1xf32>
    %27 = vector.broadcast %26 : vector<40x1xf32> to vector<40x32xf32>
    %28 = arith.mulf %23, %27 : vector<40x32xf32>
    %29 = arith.truncf %28 : vector<40x32xf32> to vector<40x32xbf16>
    %c0_13 = arith.constant 0 : index
    %c0_14 = arith.constant 0 : index
    %c0_15 = arith.constant 0 : index
    %30 = vector.load %arg5[%c0_13, %c0_14, %c0_15] : memref<2x32x96xbf16, #tpu.memory_space<vmem>>, vector<1x32x96xbf16>
    %31 = vector.shape_cast %30 : vector<1x32x96xbf16> to vector<32x96xbf16>
    %cst_16 = arith.constant dense<0.000000e+00> : vector<40x96xf32>
    %32 = tpu.matmul %29, %31, %cst_16 {dimension_numbers = #tpu.dot_dimension_numbers<[1], [0], [0], [1], [0, 0, 1, 1], [], []>} : vector<40x32xbf16>, vector<32x96xbf16>, vector<40x96xf32> -> vector<40x96xf32>
    %33 = vector.broadcast %7 : vector<1x96xf32> to vector<40x96xf32>
    %34 = arith.addf %32, %33 : vector<40x96xf32>
    %35 = vector.extract_strided_slice %34 {offsets = [0, 0], sizes = [40, 8], strides = [1, 1]} : vector<40x96xf32> to vector<40x8xf32>
    %36 = vector.extract_strided_slice %34 {offsets = [0, 8], sizes = [40, 8], strides = [1, 1]} : vector<40x96xf32> to vector<40x8xf32>
    %37 = vector.extract_strided_slice %34 {offsets = [0, 16], sizes = [40, 8], strides = [1, 1]} : vector<40x96xf32> to vector<40x8xf32>
    %38 = vector.extract_strided_slice %34 {offsets = [0, 24], sizes = [40, 8], strides = [1, 1]} : vector<40x96xf32> to vector<40x8xf32>
    %39 = tpu.concatenate %35, %36, %37, %38 in 0 : vector<40x8xf32>, vector<40x8xf32>, vector<40x8xf32>, vector<40x8xf32> -> vector<160x8xf32>
    %40 = arith.truncf %39 : vector<160x8xf32> to vector<160x8xbf16>
    %41 = vector.extract_strided_slice %34 {offsets = [0, 32], sizes = [40, 8], strides = [1, 1]} : vector<40x96xf32> to vector<40x8xf32>
    %42 = vector.extract_strided_slice %34 {offsets = [0, 40], sizes = [40, 8], strides = [1, 1]} : vector<40x96xf32> to vector<40x8xf32>
    %43 = vector.extract_strided_slice %34 {offsets = [0, 48], sizes = [40, 8], strides = [1, 1]} : vector<40x96xf32> to vector<40x8xf32>
    %44 = vector.extract_strided_slice %34 {offsets = [0, 56], sizes = [40, 8], strides = [1, 1]} : vector<40x96xf32> to vector<40x8xf32>
    %45 = tpu.concatenate %41, %42, %43, %44 in 0 : vector<40x8xf32>, vector<40x8xf32>, vector<40x8xf32>, vector<40x8xf32> -> vector<160x8xf32>
    %46 = arith.truncf %45 : vector<160x8xf32> to vector<160x8xbf16>
    %47 = vector.extract_strided_slice %34 {offsets = [0, 64], sizes = [40, 8], strides = [1, 1]} : vector<40x96xf32> to vector<40x8xf32>
    %48 = vector.extract_strided_slice %34 {offsets = [0, 72], sizes = [40, 8], strides = [1, 1]} : vector<40x96xf32> to vector<40x8xf32>
    %49 = vector.extract_strided_slice %34 {offsets = [0, 80], sizes = [40, 8], strides = [1, 1]} : vector<40x96xf32> to vector<40x8xf32>
    %50 = vector.extract_strided_slice %34 {offsets = [0, 88], sizes = [40, 8], strides = [1, 1]} : vector<40x96xf32> to vector<40x8xf32>
    %51 = tpu.concatenate %47, %48, %49, %50 in 0 : vector<40x8xf32>, vector<40x8xf32>, vector<40x8xf32>, vector<40x8xf32> -> vector<160x8xf32>
    %52 = arith.truncf %51 : vector<160x8xf32> to vector<160x8xbf16>
    %cst_17 = arith.constant dense<0.000000e+00> : vector<160x160xf32>
    %53 = tpu.matmul %40, %46, %cst_17 {dimension_numbers = #tpu.dot_dimension_numbers<[1], [1], [0], [0], [0, 0, 1, 0], [], []>} : vector<160x8xbf16>, vector<160x8xbf16>, vector<160x160xf32> -> vector<160x160xf32>
    %c0_18 = arith.constant 0 : index
    %c0_19 = arith.constant 0 : index
    %54 = vector.load %arg3[%c0_18, %c0_19] : memref<160x1xi32, #tpu.memory_space<vmem>>, vector<160x1xi32>
    %c0_20 = arith.constant 0 : index
    %c0_21 = arith.constant 0 : index
    %55 = vector.load %arg4[%c0_20, %c0_21] : memref<1x160xi32, #tpu.memory_space<vmem>>, vector<1x160xi32>
    %56 = vector.broadcast %54 : vector<160x1xi32> to vector<160x160xi32>
    %57 = vector.broadcast %55 : vector<1x160xi32> to vector<160x160xi32>
    %58 = arith.cmpi eq, %56, %57 : vector<160x160xi32>
    %cst_22 = arith.constant -1.000000e+30 : f32
    %59 = vector.broadcast %cst_22 : f32 to vector<160x160xf32>
    %60 = arith.select %58, %53, %59 : vector<160x160xi1>, vector<160x160xf32>
    %cst_23 = arith.constant dense<0xFF800000> : vector<160xf32>
    %61 = vector.multi_reduction <maximumf>, %60, %cst_23 [1] : vector<160x160xf32> to vector<160xf32>
    %62 = vector.shape_cast %61 : vector<160xf32> to vector<160x1xf32>
    %63 = vector.broadcast %62 : vector<160x1xf32> to vector<160x160xf32>
    %64 = arith.subf %60, %63 : vector<160x160xf32>
    %65 = math.exp %64 : vector<160x160xf32>
    %cst_24 = arith.constant dense<0.000000e+00> : vector<160xf32>
    %66 = vector.multi_reduction <add>, %65, %cst_24 [1] : vector<160x160xf32> to vector<160xf32>
    %67 = vector.shape_cast %66 : vector<160xf32> to vector<160x1xf32>
    %68 = tpu.reciprocal %67 {approx = true} : vector<160x1xf32> -> vector<160x1xf32>
    %69 = vector.broadcast %68 : vector<160x1xf32> to vector<160x160xf32>
    %70 = arith.mulf %65, %69 : vector<160x160xf32>
    %71 = arith.truncf %70 : vector<160x160xf32> to vector<160x160xbf16>
    %cst_25 = arith.constant dense<0.000000e+00> : vector<160x8xf32>
    %72 = tpu.matmul %71, %52, %cst_25 {dimension_numbers = #tpu.dot_dimension_numbers<[1], [0], [0], [1], [0, 0, 1, 1], [], []>} : vector<160x160xbf16>, vector<160x8xbf16>, vector<160x8xf32> -> vector<160x8xf32>
    %73 = arith.truncf %72 : vector<160x8xf32> to vector<160x8xbf16>
    %c0_26 = arith.constant 0 : index
    %c0_27 = arith.constant 0 : index
    %c0_28 = arith.constant 0 : index
    %74 = vector.load %arg6[%c0_26, %c0_27, %c0_28] : memref<2x8x128xbf16, #tpu.memory_space<vmem>>, vector<1x8x128xbf16>
    %75 = vector.shape_cast %74 : vector<1x8x128xbf16> to vector<8x128xbf16>
    %cst_29 = arith.constant dense<0.000000e+00> : vector<160x128xf32>
    %76 = tpu.matmul %73, %75, %cst_29 {dimension_numbers = #tpu.dot_dimension_numbers<[1], [0], [0], [1], [0, 0, 1, 1], [], []>} : vector<160x8xbf16>, vector<8x128xbf16>, vector<160x128xf32> -> vector<160x128xf32>
    %77 = vector.extract_strided_slice %76 {offsets = [0, 0], sizes = [40, 32], strides = [1, 1]} : vector<160x128xf32> to vector<40x32xf32>
    %78 = vector.extract_strided_slice %76 {offsets = [40, 32], sizes = [40, 32], strides = [1, 1]} : vector<160x128xf32> to vector<40x32xf32>
    %79 = arith.addf %77, %78 : vector<40x32xf32>
    %80 = vector.extract_strided_slice %76 {offsets = [80, 64], sizes = [40, 32], strides = [1, 1]} : vector<160x128xf32> to vector<40x32xf32>
    %81 = arith.addf %79, %80 : vector<40x32xf32>
    %82 = vector.extract_strided_slice %76 {offsets = [120, 96], sizes = [40, 32], strides = [1, 1]} : vector<160x128xf32> to vector<40x32xf32>
    %83 = arith.addf %81, %82 : vector<40x32xf32>
    %84 = vector.broadcast %8 : vector<1x32xf32> to vector<40x32xf32>
    %85 = arith.addf %83, %84 : vector<40x32xf32>
    %86 = arith.addf %4, %85 : vector<40x32xf32>
    %cst_30 = arith.constant dense<0.000000e+00> : vector<40xf32>
    %87 = vector.multi_reduction <add>, %86, %cst_30 [1] : vector<40x32xf32> to vector<40xf32>
    %88 = vector.shape_cast %87 : vector<40xf32> to vector<40x1xf32>
    %cst_31 = arith.constant 3.200000e+01 : f32
    %89 = vector.broadcast %cst_31 : f32 to vector<40x1xf32>
    %90 = arith.divf %88, %89 : vector<40x1xf32>
    %91 = vector.broadcast %90 : vector<40x1xf32> to vector<40x32xf32>
    %92 = arith.subf %86, %91 : vector<40x32xf32>
    %93 = arith.mulf %92, %92 : vector<40x32xf32>
    %cst_32 = arith.constant dense<0.000000e+00> : vector<40xf32>
    %94 = vector.multi_reduction <add>, %93, %cst_32 [1] : vector<40x32xf32> to vector<40xf32>
    %95 = vector.shape_cast %94 : vector<40xf32> to vector<40x1xf32>
    %cst_33 = arith.constant 3.200000e+01 : f32
    %96 = vector.broadcast %cst_33 : f32 to vector<40x1xf32>
    %97 = arith.divf %95, %96 : vector<40x1xf32>
    %98 = vector.broadcast %90 : vector<40x1xf32> to vector<40x32xf32>
    %99 = arith.subf %86, %98 : vector<40x32xf32>
    %cst_34 = arith.constant 9.99999997E-7 : f32
    %100 = vector.broadcast %cst_34 : f32 to vector<40x1xf32>
    %101 = arith.addf %97, %100 : vector<40x1xf32>
    %102 = math.rsqrt %101 : vector<40x1xf32>
    %103 = vector.broadcast %102 : vector<40x1xf32> to vector<40x32xf32>
    %104 = arith.mulf %99, %103 : vector<40x32xf32>
    %105 = arith.truncf %104 : vector<40x32xf32> to vector<40x32xbf16>
    %c0_35 = arith.constant 0 : index
    %c0_36 = arith.constant 0 : index
    %c0_37 = arith.constant 0 : index
    %106 = vector.load %arg7[%c0_35, %c0_36, %c0_37] : memref<2x32x128xbf16, #tpu.memory_space<vmem>>, vector<1x32x128xbf16>
    %107 = vector.shape_cast %106 : vector<1x32x128xbf16> to vector<32x128xbf16>
    %cst_38 = arith.constant dense<0.000000e+00> : vector<40x128xf32>
    %108 = tpu.matmul %105, %107, %cst_38 {dimension_numbers = #tpu.dot_dimension_numbers<[1], [0], [0], [1], [0, 0, 1, 1], [], []>} : vector<40x32xbf16>, vector<32x128xbf16>, vector<40x128xf32> -> vector<40x128xf32>
    %109 = vector.broadcast %9 : vector<1x128xf32> to vector<40x128xf32>
    %110 = arith.addf %108, %109 : vector<40x128xf32>
    %cst_39 = arith.constant 5.000000e-01 : f32
    %111 = vector.broadcast %cst_39 : f32 to vector<40x128xf32>
    %112 = arith.mulf %111, %110 : vector<40x128xf32>
    %cst_40 = arith.constant 0.707106769 : f32
    %113 = vector.broadcast %cst_40 : f32 to vector<40x128xf32>
    %114 = arith.mulf %110, %113 : vector<40x128xf32>
    %115 = math.erf %114 : vector<40x128xf32>
    %cst_41 = arith.constant 1.000000e+00 : f32
    %116 = vector.broadcast %cst_41 : f32 to vector<40x128xf32>
    %117 = arith.addf %116, %115 : vector<40x128xf32>
    %118 = arith.mulf %112, %117 : vector<40x128xf32>
    %119 = arith.truncf %118 : vector<40x128xf32> to vector<40x128xbf16>
    %c0_42 = arith.constant 0 : index
    %c0_43 = arith.constant 0 : index
    %c0_44 = arith.constant 0 : index
    %120 = vector.load %arg8[%c0_42, %c0_43, %c0_44] : memref<2x128x32xbf16, #tpu.memory_space<vmem>>, vector<1x128x32xbf16>
    %121 = vector.shape_cast %120 : vector<1x128x32xbf16> to vector<128x32xbf16>
    %cst_45 = arith.constant dense<0.000000e+00> : vector<40x32xf32>
    %122 = tpu.matmul %119, %121, %cst_45 {dimension_numbers = #tpu.dot_dimension_numbers<[1], [0], [0], [1], [0, 0, 1, 1], [], []>} : vector<40x128xbf16>, vector<128x32xbf16>, vector<40x32xf32> -> vector<40x32xf32>
    %123 = vector.broadcast %10 : vector<1x32xf32> to vector<40x32xf32>
    %124 = arith.addf %122, %123 : vector<40x32xf32>
    %125 = arith.addf %86, %124 : vector<40x32xf32>
    %c1 = arith.constant 1 : index
    %c0_46 = arith.constant 0 : index
    %c0_47 = arith.constant 0 : index
    %126 = vector.load %arg9[%c1, %c0_46, %c0_47] : memref<2x4x128xf32, #tpu.memory_space<vmem>>, vector<1x4x128xf32>
    %127 = vector.shape_cast %126 : vector<1x4x128xf32> to vector<4x128xf32>
    %128 = vector.extract_strided_slice %127 {offsets = [0, 0], sizes = [1, 96], strides = [1, 1]} : vector<4x128xf32> to vector<1x96xf32>
    %129 = vector.extract_strided_slice %127 {offsets = [1, 0], sizes = [1, 32], strides = [1, 1]} : vector<4x128xf32> to vector<1x32xf32>
    %130 = vector.extract_strided_slice %127 {offsets = [2, 0], sizes = [1, 128], strides = [1, 1]} : vector<4x128xf32> to vector<1x128xf32>
    %131 = vector.extract_strided_slice %127 {offsets = [3, 0], sizes = [1, 32], strides = [1, 1]} : vector<4x128xf32> to vector<1x32xf32>
    %cst_48 = arith.constant dense<0.000000e+00> : vector<40xf32>
    %132 = vector.multi_reduction <add>, %125, %cst_48 [1] : vector<40x32xf32> to vector<40xf32>
    %133 = vector.shape_cast %132 : vector<40xf32> to vector<40x1xf32>
    %cst_49 = arith.constant 3.200000e+01 : f32
    %134 = vector.broadcast %cst_49 : f32 to vector<40x1xf32>
    %135 = arith.divf %133, %134 : vector<40x1xf32>
    %136 = vector.broadcast %135 : vector<40x1xf32> to vector<40x32xf32>
    %137 = arith.subf %125, %136 : vector<40x32xf32>
    %138 = arith.mulf %137, %137 : vector<40x32xf32>
    %cst_50 = arith.constant dense<0.000000e+00> : vector<40xf32>
    %139 = vector.multi_reduction <add>, %138, %cst_50 [1] : vector<40x32xf32> to vector<40xf32>
    %140 = vector.shape_cast %139 : vector<40xf32> to vector<40x1xf32>
    %cst_51 = arith.constant 3.200000e+01 : f32
    %141 = vector.broadcast %cst_51 : f32 to vector<40x1xf32>
    %142 = arith.divf %140, %141 : vector<40x1xf32>
    %143 = vector.broadcast %135 : vector<40x1xf32> to vector<40x32xf32>
    %144 = arith.subf %125, %143 : vector<40x32xf32>
    %cst_52 = arith.constant 9.99999997E-7 : f32
    %145 = vector.broadcast %cst_52 : f32 to vector<40x1xf32>
    %146 = arith.addf %142, %145 : vector<40x1xf32>
    %147 = math.rsqrt %146 : vector<40x1xf32>
    %148 = vector.broadcast %147 : vector<40x1xf32> to vector<40x32xf32>
    %149 = arith.mulf %144, %148 : vector<40x32xf32>
    %150 = arith.truncf %149 : vector<40x32xf32> to vector<40x32xbf16>
    %c1_53 = arith.constant 1 : index
    %c0_54 = arith.constant 0 : index
    %c0_55 = arith.constant 0 : index
    %151 = vector.load %arg5[%c1_53, %c0_54, %c0_55] : memref<2x32x96xbf16, #tpu.memory_space<vmem>>, vector<1x32x96xbf16>
    %152 = vector.shape_cast %151 : vector<1x32x96xbf16> to vector<32x96xbf16>
    %cst_56 = arith.constant dense<0.000000e+00> : vector<40x96xf32>
    %153 = tpu.matmul %150, %152, %cst_56 {dimension_numbers = #tpu.dot_dimension_numbers<[1], [0], [0], [1], [0, 0, 1, 1], [], []>} : vector<40x32xbf16>, vector<32x96xbf16>, vector<40x96xf32> -> vector<40x96xf32>
    %154 = vector.broadcast %128 : vector<1x96xf32> to vector<40x96xf32>
    %155 = arith.addf %153, %154 : vector<40x96xf32>
    %156 = vector.extract_strided_slice %155 {offsets = [0, 0], sizes = [40, 8], strides = [1, 1]} : vector<40x96xf32> to vector<40x8xf32>
    %157 = vector.extract_strided_slice %155 {offsets = [0, 8], sizes = [40, 8], strides = [1, 1]} : vector<40x96xf32> to vector<40x8xf32>
    %158 = vector.extract_strided_slice %155 {offsets = [0, 16], sizes = [40, 8], strides = [1, 1]} : vector<40x96xf32> to vector<40x8xf32>
    %159 = vector.extract_strided_slice %155 {offsets = [0, 24], sizes = [40, 8], strides = [1, 1]} : vector<40x96xf32> to vector<40x8xf32>
    %160 = tpu.concatenate %156, %157, %158, %159 in 0 : vector<40x8xf32>, vector<40x8xf32>, vector<40x8xf32>, vector<40x8xf32> -> vector<160x8xf32>
    %161 = arith.truncf %160 : vector<160x8xf32> to vector<160x8xbf16>
    %162 = vector.extract_strided_slice %155 {offsets = [0, 32], sizes = [40, 8], strides = [1, 1]} : vector<40x96xf32> to vector<40x8xf32>
    %163 = vector.extract_strided_slice %155 {offsets = [0, 40], sizes = [40, 8], strides = [1, 1]} : vector<40x96xf32> to vector<40x8xf32>
    %164 = vector.extract_strided_slice %155 {offsets = [0, 48], sizes = [40, 8], strides = [1, 1]} : vector<40x96xf32> to vector<40x8xf32>
    %165 = vector.extract_strided_slice %155 {offsets = [0, 56], sizes = [40, 8], strides = [1, 1]} : vector<40x96xf32> to vector<40x8xf32>
    %166 = tpu.concatenate %162, %163, %164, %165 in 0 : vector<40x8xf32>, vector<40x8xf32>, vector<40x8xf32>, vector<40x8xf32> -> vector<160x8xf32>
    %167 = arith.truncf %166 : vector<160x8xf32> to vector<160x8xbf16>
    %168 = vector.extract_strided_slice %155 {offsets = [0, 64], sizes = [40, 8], strides = [1, 1]} : vector<40x96xf32> to vector<40x8xf32>
    %169 = vector.extract_strided_slice %155 {offsets = [0, 72], sizes = [40, 8], strides = [1, 1]} : vector<40x96xf32> to vector<40x8xf32>
    %170 = vector.extract_strided_slice %155 {offsets = [0, 80], sizes = [40, 8], strides = [1, 1]} : vector<40x96xf32> to vector<40x8xf32>
    %171 = vector.extract_strided_slice %155 {offsets = [0, 88], sizes = [40, 8], strides = [1, 1]} : vector<40x96xf32> to vector<40x8xf32>
    %172 = tpu.concatenate %168, %169, %170, %171 in 0 : vector<40x8xf32>, vector<40x8xf32>, vector<40x8xf32>, vector<40x8xf32> -> vector<160x8xf32>
    %173 = arith.truncf %172 : vector<160x8xf32> to vector<160x8xbf16>
    %cst_57 = arith.constant dense<0.000000e+00> : vector<160x160xf32>
    %174 = tpu.matmul %161, %167, %cst_57 {dimension_numbers = #tpu.dot_dimension_numbers<[1], [1], [0], [0], [0, 0, 1, 0], [], []>} : vector<160x8xbf16>, vector<160x8xbf16>, vector<160x160xf32> -> vector<160x160xf32>
    %c0_58 = arith.constant 0 : index
    %c0_59 = arith.constant 0 : index
    %175 = vector.load %arg3[%c0_58, %c0_59] : memref<160x1xi32, #tpu.memory_space<vmem>>, vector<160x1xi32>
    %c0_60 = arith.constant 0 : index
    %c0_61 = arith.constant 0 : index
    %176 = vector.load %arg4[%c0_60, %c0_61] : memref<1x160xi32, #tpu.memory_space<vmem>>, vector<1x160xi32>
    %177 = vector.broadcast %175 : vector<160x1xi32> to vector<160x160xi32>
    %178 = vector.broadcast %176 : vector<1x160xi32> to vector<160x160xi32>
    %179 = arith.cmpi eq, %177, %178 : vector<160x160xi32>
    %cst_62 = arith.constant -1.000000e+30 : f32
    %180 = vector.broadcast %cst_62 : f32 to vector<160x160xf32>
    %181 = arith.select %179, %174, %180 : vector<160x160xi1>, vector<160x160xf32>
    %cst_63 = arith.constant dense<0xFF800000> : vector<160xf32>
    %182 = vector.multi_reduction <maximumf>, %181, %cst_63 [1] : vector<160x160xf32> to vector<160xf32>
    %183 = vector.shape_cast %182 : vector<160xf32> to vector<160x1xf32>
    %184 = vector.broadcast %183 : vector<160x1xf32> to vector<160x160xf32>
    %185 = arith.subf %181, %184 : vector<160x160xf32>
    %186 = math.exp %185 : vector<160x160xf32>
    %cst_64 = arith.constant dense<0.000000e+00> : vector<160xf32>
    %187 = vector.multi_reduction <add>, %186, %cst_64 [1] : vector<160x160xf32> to vector<160xf32>
    %188 = vector.shape_cast %187 : vector<160xf32> to vector<160x1xf32>
    %189 = tpu.reciprocal %188 {approx = true} : vector<160x1xf32> -> vector<160x1xf32>
    %190 = vector.broadcast %189 : vector<160x1xf32> to vector<160x160xf32>
    %191 = arith.mulf %186, %190 : vector<160x160xf32>
    %192 = arith.truncf %191 : vector<160x160xf32> to vector<160x160xbf16>
    %cst_65 = arith.constant dense<0.000000e+00> : vector<160x8xf32>
    %193 = tpu.matmul %192, %173, %cst_65 {dimension_numbers = #tpu.dot_dimension_numbers<[1], [0], [0], [1], [0, 0, 1, 1], [], []>} : vector<160x160xbf16>, vector<160x8xbf16>, vector<160x8xf32> -> vector<160x8xf32>
    %194 = arith.truncf %193 : vector<160x8xf32> to vector<160x8xbf16>
    %c1_66 = arith.constant 1 : index
    %c0_67 = arith.constant 0 : index
    %c0_68 = arith.constant 0 : index
    %195 = vector.load %arg6[%c1_66, %c0_67, %c0_68] : memref<2x8x128xbf16, #tpu.memory_space<vmem>>, vector<1x8x128xbf16>
    %196 = vector.shape_cast %195 : vector<1x8x128xbf16> to vector<8x128xbf16>
    %cst_69 = arith.constant dense<0.000000e+00> : vector<160x128xf32>
    %197 = tpu.matmul %194, %196, %cst_69 {dimension_numbers = #tpu.dot_dimension_numbers<[1], [0], [0], [1], [0, 0, 1, 1], [], []>} : vector<160x8xbf16>, vector<8x128xbf16>, vector<160x128xf32> -> vector<160x128xf32>
    %198 = vector.extract_strided_slice %197 {offsets = [0, 0], sizes = [40, 32], strides = [1, 1]} : vector<160x128xf32> to vector<40x32xf32>
    %199 = vector.extract_strided_slice %197 {offsets = [40, 32], sizes = [40, 32], strides = [1, 1]} : vector<160x128xf32> to vector<40x32xf32>
    %200 = arith.addf %198, %199 : vector<40x32xf32>
    %201 = vector.extract_strided_slice %197 {offsets = [80, 64], sizes = [40, 32], strides = [1, 1]} : vector<160x128xf32> to vector<40x32xf32>
    %202 = arith.addf %200, %201 : vector<40x32xf32>
    %203 = vector.extract_strided_slice %197 {offsets = [120, 96], sizes = [40, 32], strides = [1, 1]} : vector<160x128xf32> to vector<40x32xf32>
    %204 = arith.addf %202, %203 : vector<40x32xf32>
    %205 = vector.broadcast %129 : vector<1x32xf32> to vector<40x32xf32>
    %206 = arith.addf %204, %205 : vector<40x32xf32>
    %207 = arith.addf %125, %206 : vector<40x32xf32>
    %cst_70 = arith.constant dense<0.000000e+00> : vector<40xf32>
    %208 = vector.multi_reduction <add>, %207, %cst_70 [1] : vector<40x32xf32> to vector<40xf32>
    %209 = vector.shape_cast %208 : vector<40xf32> to vector<40x1xf32>
    %cst_71 = arith.constant 3.200000e+01 : f32
    %210 = vector.broadcast %cst_71 : f32 to vector<40x1xf32>
    %211 = arith.divf %209, %210 : vector<40x1xf32>
    %212 = vector.broadcast %211 : vector<40x1xf32> to vector<40x32xf32>
    %213 = arith.subf %207, %212 : vector<40x32xf32>
    %214 = arith.mulf %213, %213 : vector<40x32xf32>
    %cst_72 = arith.constant dense<0.000000e+00> : vector<40xf32>
    %215 = vector.multi_reduction <add>, %214, %cst_72 [1] : vector<40x32xf32> to vector<40xf32>
    %216 = vector.shape_cast %215 : vector<40xf32> to vector<40x1xf32>
    %cst_73 = arith.constant 3.200000e+01 : f32
    %217 = vector.broadcast %cst_73 : f32 to vector<40x1xf32>
    %218 = arith.divf %216, %217 : vector<40x1xf32>
    %219 = vector.broadcast %211 : vector<40x1xf32> to vector<40x32xf32>
    %220 = arith.subf %207, %219 : vector<40x32xf32>
    %cst_74 = arith.constant 9.99999997E-7 : f32
    %221 = vector.broadcast %cst_74 : f32 to vector<40x1xf32>
    %222 = arith.addf %218, %221 : vector<40x1xf32>
    %223 = math.rsqrt %222 : vector<40x1xf32>
    %224 = vector.broadcast %223 : vector<40x1xf32> to vector<40x32xf32>
    %225 = arith.mulf %220, %224 : vector<40x32xf32>
    %226 = arith.truncf %225 : vector<40x32xf32> to vector<40x32xbf16>
    %c1_75 = arith.constant 1 : index
    %c0_76 = arith.constant 0 : index
    %c0_77 = arith.constant 0 : index
    %227 = vector.load %arg7[%c1_75, %c0_76, %c0_77] : memref<2x32x128xbf16, #tpu.memory_space<vmem>>, vector<1x32x128xbf16>
    %228 = vector.shape_cast %227 : vector<1x32x128xbf16> to vector<32x128xbf16>
    %cst_78 = arith.constant dense<0.000000e+00> : vector<40x128xf32>
    %229 = tpu.matmul %226, %228, %cst_78 {dimension_numbers = #tpu.dot_dimension_numbers<[1], [0], [0], [1], [0, 0, 1, 1], [], []>} : vector<40x32xbf16>, vector<32x128xbf16>, vector<40x128xf32> -> vector<40x128xf32>
    %230 = vector.broadcast %130 : vector<1x128xf32> to vector<40x128xf32>
    %231 = arith.addf %229, %230 : vector<40x128xf32>
    %cst_79 = arith.constant 5.000000e-01 : f32
    %232 = vector.broadcast %cst_79 : f32 to vector<40x128xf32>
    %233 = arith.mulf %232, %231 : vector<40x128xf32>
    %cst_80 = arith.constant 0.707106769 : f32
    %234 = vector.broadcast %cst_80 : f32 to vector<40x128xf32>
    %235 = arith.mulf %231, %234 : vector<40x128xf32>
    %236 = math.erf %235 : vector<40x128xf32>
    %cst_81 = arith.constant 1.000000e+00 : f32
    %237 = vector.broadcast %cst_81 : f32 to vector<40x128xf32>
    %238 = arith.addf %237, %236 : vector<40x128xf32>
    %239 = arith.mulf %233, %238 : vector<40x128xf32>
    %240 = arith.truncf %239 : vector<40x128xf32> to vector<40x128xbf16>
    %c1_82 = arith.constant 1 : index
    %c0_83 = arith.constant 0 : index
    %c0_84 = arith.constant 0 : index
    %241 = vector.load %arg8[%c1_82, %c0_83, %c0_84] : memref<2x128x32xbf16, #tpu.memory_space<vmem>>, vector<1x128x32xbf16>
    %242 = vector.shape_cast %241 : vector<1x128x32xbf16> to vector<128x32xbf16>
    %cst_85 = arith.constant dense<0.000000e+00> : vector<40x32xf32>
    %243 = tpu.matmul %240, %242, %cst_85 {dimension_numbers = #tpu.dot_dimension_numbers<[1], [0], [0], [1], [0, 0, 1, 1], [], []>} : vector<40x128xbf16>, vector<128x32xbf16>, vector<40x32xf32> -> vector<40x32xf32>
    %244 = vector.broadcast %131 : vector<1x32xf32> to vector<40x32xf32>
    %245 = arith.addf %243, %244 : vector<40x32xf32>
    %246 = arith.addf %207, %245 : vector<40x32xf32>
    %c0_86 = arith.constant 0 : index
    %c0_87 = arith.constant 0 : index
    %247 = vector.load %arg10[%c0_86, %c0_87] : memref<2x128xf32, #tpu.memory_space<vmem>>, vector<2x128xf32>
    %cst_88 = arith.constant dense<0.000000e+00> : vector<40xf32>
    %248 = vector.multi_reduction <add>, %246, %cst_88 [1] : vector<40x32xf32> to vector<40xf32>
    %249 = vector.shape_cast %248 : vector<40xf32> to vector<40x1xf32>
    %cst_89 = arith.constant 3.200000e+01 : f32
    %250 = vector.broadcast %cst_89 : f32 to vector<40x1xf32>
    %251 = arith.divf %249, %250 : vector<40x1xf32>
    %252 = vector.broadcast %251 : vector<40x1xf32> to vector<40x32xf32>
    %253 = arith.subf %246, %252 : vector<40x32xf32>
    %254 = arith.mulf %253, %253 : vector<40x32xf32>
    %cst_90 = arith.constant dense<0.000000e+00> : vector<40xf32>
    %255 = vector.multi_reduction <add>, %254, %cst_90 [1] : vector<40x32xf32> to vector<40xf32>
    %256 = vector.shape_cast %255 : vector<40xf32> to vector<40x1xf32>
    %cst_91 = arith.constant 3.200000e+01 : f32
    %257 = vector.broadcast %cst_91 : f32 to vector<40x1xf32>
    %258 = arith.divf %256, %257 : vector<40x1xf32>
    %259 = vector.broadcast %251 : vector<40x1xf32> to vector<40x32xf32>
    %260 = arith.subf %246, %259 : vector<40x32xf32>
    %cst_92 = arith.constant 9.99999997E-7 : f32
    %261 = vector.broadcast %cst_92 : f32 to vector<40x1xf32>
    %262 = arith.addf %258, %261 : vector<40x1xf32>
    %263 = math.rsqrt %262 : vector<40x1xf32>
    %264 = vector.broadcast %263 : vector<40x1xf32> to vector<40x32xf32>
    %265 = arith.mulf %260, %264 : vector<40x32xf32>
    %266 = vector.extract_strided_slice %247 {offsets = [0, 0], sizes = [1, 32], strides = [1, 1]} : vector<2x128xf32> to vector<1x32xf32>
    %267 = vector.broadcast %266 : vector<1x32xf32> to vector<40x32xf32>
    %268 = arith.mulf %265, %267 : vector<40x32xf32>
    %269 = vector.extract_strided_slice %247 {offsets = [1, 0], sizes = [1, 32], strides = [1, 1]} : vector<2x128xf32> to vector<1x32xf32>
    %270 = vector.broadcast %269 : vector<1x32xf32> to vector<40x32xf32>
    %271 = arith.addf %268, %270 : vector<40x32xf32>
    %c0_93 = arith.constant 0 : index
    %c0_94 = arith.constant 0 : index
    %272 = vector.load %arg11[%c0_93, %c0_94] : memref<40x32xf32, #tpu.memory_space<vmem>>, vector<40x32xf32>
    tpu.vector_store %arg11[%c0_93, %c0_94], %271 {strides = array<i32>} : memref<40x32xf32, #tpu.memory_space<vmem>>, vector<40x32xf32>,
    return
  }
}

</mosaic_0001>

<bundles_post_ra>
// kernel: div.10
= control target key start
LH: loop header
LB: loop body
LE: loop exit
PB: predicated region body
PF: predicated region fallthrough
CT: control target
= control target key end

     0   :  { %vm7_vm0 = vcmask 130048   ;;  %s30_s8 = smov 16   ;;  %vm13_vm1 = vcmask 392448   ;;  %vm19_vm2 = vcmask 261248   ;;  %s47_s0 = inlined_call_operand.vmem [shape: f32[3,16], index: 0, kind: input, shape index: {}]   ;;  %s48_s1 = inlined_call_operand.vmem [shape: f32[48], index: 1, kind: output, shape index: {}]  }
   0x1   :  { %v4_v0 = vld [vmem:[%s47_s0] sm:$0xf]  ;;  %s29_s0 = smov 32  }
   0x2   :  { %5 = vst [vmem:[#allocation1] sm:$0xf] %v4_v0 }
   0x9   :  { %v10_v1 = vld [vmem:[#allocation1 + $0x2] sm:$0x1]   ;;  %v6_v2 = vld [vmem:[#allocation1] sm:$0x1]   ;;  %v16_v3 = vld [vmem:[#allocation1 + $0x1] sm:$0x1]  }
   0xa   :  { %11 = vrot.lane.b32.xlu0 %v10_v1, %s29_s0  ;;  %8 = vst.msk [vmem:[#allocation0] sm:$0x1] %vm7_vm0, %v6_v2  }
   0xe   :  { %17 = vrot.lane.b32.xlu0 %v16_v3, %s30_s8 }
  0x7c   :  { %v12_v4 = vpop.permute.xlu0 %11  }
  0x7d   :  { %14 = vst.msk [vmem:[#allocation0] sm:$0x1] %vm13_vm1, %v12_v4  }
  0x80   :  { %v18_v5 = vpop.permute.xlu0 %17  }
  0x81   :  { %20 = vst.msk [vmem:[#allocation0] sm:$0x1] %vm19_vm2, %v18_v5  }
  0x88   :  { %v24_v6 = vld [vmem:[#allocation0] sm:$0x1] }
  0x89   :  { %26 = vst [vmem:[%s48_s1] sm:$0x1] %v24_v6 }

// kernel: div.13
= control target key start
LH: loop header
LB: loop body
LE: loop exit
PB: predicated region body
PF: predicated region fallthrough
CT: control target
= control target key end

     0   :  { %s37_s0 = inlined_call_operand.vmem [shape: f32[48], index: 0, kind: input, shape index: {}]   ;;  %s38_s1 = inlined_call_operand.vmem [shape: f32[48], index: 1, kind: input, shape index: {}]   ;;  %s39_s2 = inlined_call_operand.vmem [shape: f32[48], index: 2, kind: output, shape index: {}]  }
   0x1   :  { %v4_v0 = vld [vmem:[%s38_s1] sm:$0x1] }
   0x2   :  { %11 = vrcp.f32 %v4_v0  ;;  %v3_v1 = vld [vmem:[%s37_s0] sm:$0x1] }
   0xc   :  { %v12_v2 = vpop.eup %11 }
   0xd   :  { %v8_v3 = vmul.f32 %v12_v2, %v3_v1 }
   0xf   :  { %10 = vst [vmem:[%s39_s2] sm:$0x1] %v8_v3 }

// kernel: dinov2_featurizer_forward.1
= control target key start
LH: loop header
LB: loop body
LE: loop exit
PB: predicated region body
PF: predicated region fallthrough
CT: control target
= control target key end

     0   :  { %v6365_v0 = vmov 0.0   ;;  %vm4334_vm0 = vmmov 0   ;;  %vm86_vm1 = vcmask 392192   ;;  %vm153_vm2 = vcmask 261120   ;;  %s4335_s23 = smov 120   ;;  %s4336_s24 = smov 112   ;;  %s6346_s1 = inlined_call_operand.vmem [shape: bf16[48,32], index: 1, kind: input, shape index: {}]   ;;  %s6347_s0 = inlined_call_operand.vmem [shape: bf16[40,48], index: 0, kind: input, shape index: {}]   ;;  %s6348_s2 = inlined_call_operand.vmem [shape: f32[40,32], index: 2, kind: input, shape index: {}]   ;;  %s6349_s5 = inlined_call_operand.vmem [shape: bf16[2,32,96], index: 5, kind: input, shape index: {}]   ;;  %s6350_s9 = inlined_call_operand.vmem [shape: f32[2,4,128], index: 9, kind: input, shape index: {}]   ;;  %s6351_s3 = inlined_call_operand.vmem [shape: s32[160,1], index: 3, kind: input, shape index: {}]   ;;  %s6352_s4 = inlined_call_operand.vmem [shape: s32[1,160], index: 4, kind: input, shape index: {}]   ;;  %s6353_s6 = inlined_call_operand.vmem [shape: bf16[2,8,128], index: 6, kind: input, shape index: {}]   ;;  %s6354_s7 = inlined_call_operand.vmem [shape: bf16[2,32,128], index: 7, kind: input, shape index: {}]   ;;  %s6355_s8 = inlined_call_operand.vmem [shape: bf16[2,128,32], index: 8, kind: input, shape index: {}]   ;;  %s6356_s10 = inlined_call_operand.vmem [shape: f32[2,128], index: 10, kind: input, shape index: {}]   ;;  %s6357_s11 = inlined_call_operand.vmem [shape: f32[40,32], index: 11, kind: output, shape index: {}]  }
   0x1   :  { %3716 = vmatprep.subr.bf16.mxu0 %v6365_v0  ;;  %v3991_v1 = vld [vmem:[%s6346_s1] sm:$0xff]   ;;  %3722 = vmatprep.mubr.msk.bf16.mxu0 %vm4334_vm0, %v6365_v0  ;;  %v3992_v2 = vld [vmem:[%s6346_s1 + $0x8] sm:$0xff]   ;;  %v3993_v3 = vld [vmem:[%s6346_s1 + $0x10] sm:$0xff]   ;;  %s4337_s25 = smov 104   ;;  %s4339_s26 = smov 96   ;;  %vm398_vm3 = vcmask 64512  }
   0x2   :  { %3734 = vmatprep.subr.bf16.mxu1 %v6365_v0  ;;  %3738 = vmatprep.mubr.msk.bf16.mxu1 %vm4334_vm0, %v6365_v0  ;;  %v3994_v4 = vld [vmem:[%s6347_s0] sm:$0xff]   ;;  %v3995_v5 = vld [vmem:[%s6347_s0 + $0x8] sm:$0xff]   ;;  %v3996_v6 = vld [vmem:[%s6347_s0 + $0x10] ss:$0 sps:$4 sm:$0xff]   ;;  %s4340_s30 = smov 64   ;;  %s4341_s13 = smov 32  }
   0x3   :  { %3717 = vmatpush3.bf16.msra.mxu0 %v3991_v1  ;;  %v50_v7 = vld [vmem:[%s6348_s2] sm:$0xff]  ;;  %v51_v9 = vld [vmem:[%s6348_s2 + $0x8] sm:$0xff]  ;;  %v52_v16 = vld [vmem:[%s6348_s2 + $0x10] sm:$0xff] }
   0x4   :  { %3718 = vmatprep.subr.bf16.mxu0 %v6365_v0  ;;  %v53_v19 = vld [vmem:[%s6348_s2 + $0x18] sm:$0xff]  ;;  %v54_v26 = vld [vmem:[%s6348_s2 + $0x20] sm:$0xff]  ;;  %v3998_v60 = vld [vmem:[%s6349_s5 + $0x8] sm:$0xff]  }
   0x5   :  { %v3997_v59 = vld [vmem:[%s6349_s5] sm:$0xff]  }
   0x6   :  { %3735 = vmatpush3.bf16.msra.mxu1 %v3997_v59  ;;  %v6367_v59 = vmov 0  }
   0x7   :  { %3719 = vmatpush3.bf16.msra.mxu0 %v3992_v2  ;;  %3736 = vmatprep.subr.bf16.mxu1 %v6365_v0 }
   0x8   :  { %3720 = vmatprep.subr.bf16.mxu0 %v6365_v0  ;;  %3959 = vset.pattern.permute.xlu1 %v6367_v59 }
   0x9   :  { %3960 = vset.pattern.permute.xlu0 %v6367_v59 }
   0xa   :  { %3737 = vmatpush3.bf16.msra.mxu1 %v3998_v60 }
   0xb   :  { %3721 = vmatpush3.bf16.msra.mxu0 %v3993_v3  ;;  %459 = vmatprep.subr.bf16.mxu1 %v6367_v59 }
   0xc   :  { %1181 = vmatprep.subr.bf16.mxu0 %v6367_v59 }
   0xe   :  { %3723 = vmatmul.mubr.msk.bf16.vlgmr.msra.gmra.mrb[0].mxu0 %vm86_vm1, %v3994_v4 }
   0xf   :  { %3726 = vmatprep.mubr.msk.bf16.mxu0 %vm4334_vm0, %v6365_v0 }
  0x16   :  { %3727 = vmatmul.mubr.msk.bf16.gmra.mrb[4].mxu0 %vm86_vm1, %v3995_v5 }
  0x17   :  { %3730 = vmatprep.mubr.msk.bf16.mxu0 %vm4334_vm0, %v6365_v0 }
  0x1e   :  { %3731 = vmatmul.mubr.msk.bf16.gmra.mrb[8].mxu0 %vm86_vm1, %v3996_v6 }
  0xe1   :  { %v130_v8 = vpop.f32.mrb[0].mxu0 }
  0xe2   :  { %v4438_v10 = vadd.f32 %v130_v8, %v50_v7  ;;  %v3724_v11 = vpop.f32.mrb[1].mxu0 }
  0xe3   :  { %v133_v12 = vpop.f32.mrb[2].mxu0 }
  0xe4   :  { %v4440_v13 = vadd.f32 %v133_v12, %v51_v9  ;;  %v3725_v14 = vpop.f32.mrb[3].mxu0  ;;  %v154_v15 = vsel %vm153_vm2, %v4438_v10, 0.0 }
  0xe5   :  { %155 = vadd.xlane.f32.xlu0 %v154_v15 }
  0xe6   :  { %v157_v17 = vsel %vm153_vm2, %v4440_v13, 0.0 }
  0xe9   :  { %158 = vadd.xlane.f32.xlu0 %v157_v17  ;;  %v138_v18 = vpop.f32.mrb[4].mxu0 }
  0xea   :  { %v4452_v20 = vadd.f32 %v138_v18, %v52_v16  ;;  %v3728_v21 = vpop.f32.mrb[5].mxu0 }
  0xeb   :  { %v141_v22 = vpop.f32.mrb[6].mxu0 }
  0xec   :  { %v4454_v23 = vadd.f32 %v141_v22, %v53_v19  ;;  %v3729_v24 = vpop.f32.mrb[7].mxu0  ;;  %v160_v25 = vsel %vm153_vm2, %v4452_v20, 0.0 }
  0xed   :  { %161 = vadd.xlane.f32.xlu1 %v160_v25 }
  0xee   :  { %v163_v27 = vsel %vm153_vm2, %v4454_v23, 0.0 }
  0xf1   :  { %164 = vadd.xlane.f32.xlu1 %v163_v27  ;;  %v146_v28 = vpop.f32.mrb[8].mxu0 }
  0xf2   :  { %v4463_v29 = vadd.f32 %v146_v28, %v54_v26  ;;  %v3732_v30 = vpop.f32.mrb[9].mxu0 }
  0xf3   :  { %v149_v31 = vpop.f32.mrb[10].mxu0 }
  0xf4   :  { %v166_v32 = vsel %vm153_vm2, %v4463_v29, 0.0  ;;  %v3733_v33 = vpop.f32.mrb[11].mxu0  ;;  %v227_v31 = vlaneseq }
  0xf5   :  { %167 = vadd.xlane.f32.xlu0 %v166_v32 }
  0xf6   :  { %v4491_v32 = vshrl.u32 %v227_v31, 7 }
  0xf8   :  { %6441 = vst [vmem:[#allocation2_spill] sm:$0xff] %v4491_v32  ;;  %v4494_v33 = vsub.s32 0, %v4491_v32 }
  0xfa   :  { %6442 = vst [vmem:[#allocation3_spill] sm:$0xff] %v4494_v33 }
 0x172   :  { %v156_v34 = vpop.xlane.xlu0 %155 }
 0x173   :  { %v170_v35 = vmul.f32 0.03125, %v156_v34  ;;  %v152_v34 = vld [vmem:[%s6350_s9] sm:$0xf] }
 0x175   :  { %v175_v36 = vsub.f32 %v4438_v10, %v170_v35  ;;  %v230_v35 = vrot.slane %v152_v34, %v4494_v33  ;;  %v592_v34 = vld [vmem:[%s6351_s3] sm:$0xff] }
 0x176   :  { %v159_v37 = vpop.xlane.xlu0 %158 }
 0x177   :  { %v171_v38 = vmul.f32 0.03125, %v159_v37  ;;  %v180_v39 = vmul.f32 %v175_v36, %v175_v36 }
 0x179   :  { %v176_v40 = vsub.f32 %v4440_v13, %v171_v38  ;;  %v185_v41 = vsel %vm153_vm2, %v180_v39, 0.0 }
 0x17a   :  { %v162_v42 = vpop.xlane.xlu1 %161  ;;  %186 = vadd.xlane.f32.xlu1 %v185_v41 }
 0x17b   :  { %v172_v43 = vmul.f32 0.03125, %v162_v42  ;;  %v181_v44 = vmul.f32 %v176_v40, %v176_v40 }
 0x17d   :  { %v177_v45 = vsub.f32 %v4452_v20, %v172_v43  ;;  %v188_v46 = vsel %vm153_vm2, %v181_v44, 0.0 }
 0x17e   :  { %v165_v47 = vpop.xlane.xlu1 %164  ;;  %189 = vadd.xlane.f32.xlu0 %v188_v46 }
 0x17f   :  { %v173_v48 = vmul.f32 0.03125, %v165_v47  ;;  %v182_v49 = vmul.f32 %v177_v45, %v177_v45 }
 0x181   :  { %v178_v50 = vsub.f32 %v4454_v23, %v173_v48  ;;  %v191_v51 = vsel %vm153_vm2, %v182_v49, 0.0 }
 0x182   :  { %192 = vadd.xlane.f32.xlu1 %v191_v51  ;;  %v168_v52 = vpop.xlane.xlu0 %167 }
 0x183   :  { %v174_v53 = vmul.f32 0.03125, %v168_v52  ;;  %v183_v54 = vmul.f32 %v178_v50, %v178_v50 }
 0x185   :  { %v179_v55 = vsub.f32 %v4463_v29, %v174_v53  ;;  %v194_v56 = vsel %vm153_vm2, %v183_v54, 0.0 }
 0x186   :  { %195 = vadd.xlane.f32.xlu0 %v194_v56 }
 0x187   :  { %v184_v57 = vmul.f32 %v179_v55, %v179_v55 }
 0x189   :  { %v197_v58 = vsel %vm153_vm2, %v184_v57, 0.0 }
 0x18a   :  { %198 = vadd.xlane.f32.xlu1 %v197_v58 }
 0x207   :  { %v187_v61 = vpop.xlane.xlu1 %186 }
 0x208   :  { %v200_v62 = vmul.f32 0.03125, %v187_v61 }
 0x20a   :  { %v205_v63 = vadd.f32 1e-06, %v200_v62 }
 0x20b   :  { %v190_v1 = vpop.xlane.xlu0 %189 }
 0x20c   :  { %v201_v2 = vmul.f32 0.03125, %v190_v1  ;;  %4021 = vrsqrt.f32 %v205_v63 }
 0x20e   :  { %v206_v3 = vadd.f32 1e-06, %v201_v2 }
 0x20f   :  { %v193_v4 = vpop.xlane.xlu1 %192 }
 0x210   :  { %4023 = vrsqrt.f32 %v206_v3  ;;  %v202_v5 = vmul.f32 0.03125, %v193_v4 }
 0x212   :  { %v207_v6 = vadd.f32 1e-06, %v202_v5 }
 0x213   :  { %v196_v7 = vpop.xlane.xlu0 %195 }
 0x214   :  { %v203_v8 = vmul.f32 0.03125, %v196_v7  ;;  %4025 = vrsqrt.f32 %v207_v6 }
 0x216   :  { %v208_v9 = vadd.f32 1e-06, %v203_v8  ;;  %v4022_v12 = vpop.eup %4021 }
 0x217   :  { %v199_v11 = vpop.xlane.xlu1 %198  ;;  %v215_v17 = vmul.f32 %v4022_v12, %v175_v36 }
 0x218   :  { %4027 = vrsqrt.f32 %v208_v9  ;;  %v204_v14 = vmul.f32 0.03125, %v199_v11 }
 0x21a   :  { %v4024_v15 = vpop.eup %4023  ;;  %v209_v16 = vadd.f32 1e-06, %v204_v14 }
 0x21b   :  { %v216_v18 = vmul.f32 %v4024_v15, %v176_v40 }
 0x21c   :  { %4029 = vrsqrt.f32 %v209_v16 }
 0x21d   :  { %v220_v19 = vpack.c.bf16 %v216_v18, %v215_v17 }
 0x21e   :  { %v4026_v21 = vpop.eup %4025 }
 0x21f   :  { %3739 = vmatmul.mubr.msk.bf16.vlgmr.msra.gmra.mrb[0].mxu1 %vm153_vm2, %v220_v19  ;;  %v217_v24 = vmul.f32 %v4026_v21, %v177_v45 }
 0x220   :  { %3742 = vmatprep.mubr.msk.bf16.mxu1 %vm4334_vm0, %v6365_v0 }
 0x222   :  { %v4028_v22 = vpop.eup %4027 }
 0x223   :  { %v218_v25 = vmul.f32 %v4028_v22, %v178_v50 }
 0x225   :  { %v221_v26 = vpack.c.bf16 %v218_v25, %v217_v24 }
 0x226   :  { %v4030_v27 = vpop.eup %4029 }
 0x227   :  { %3743 = vmatmul.mubr.msk.bf16.gmra.mrb[4].mxu1 %vm153_vm2, %v221_v26  ;;  %v219_v28 = vmul.f32 %v4030_v27, %v179_v55 }
 0x228   :  { %3746 = vmatprep.mubr.msk.bf16.mxu1 %vm4334_vm0, %v6365_v0 }
 0x229   :  { %v222_v30 = vpack.c.bf16 %v219_v28, %v219_v28 }
 0x22f   :  { %3747 = vmatmul.mubr.msk.bf16.gmra.mrb[8].mxu1 %vm153_vm2, %v222_v30 }
 0x230   :  { %491 = vmatprep.mubr.bf16.mxu1 %v6367_v59 }
 0x2f2   :  { %v286_v36 = vpop.f32.mrb[0].mxu1 }
 0x2f3   :  { %v287_v37 = vadd.f32 %v286_v36, %v230_v35  ;;  %v3740_v38 = vpop.f32.mrb[1].mxu1 }
 0x2f4   :  { %v289_v39 = vpop.f32.mrb[2].mxu1  ;;  %v594_v38 = vld [vmem:[%s6351_s3 + $0x10] sm:$0xff] }
 0x2f5   :  { %v290_v40 = vadd.f32 %v289_v39, %v230_v35  ;;  %313 = vrot.lane.b32.xlu0 %v287_v37, %s4335_s23  ;;  %v3741_v41 = vpop.f32.mrb[3].mxu1 }
 0x2f6   :  { %v595_v41 = vld [vmem:[%s6351_s3 + $0x18] sm:$0xff] }
 0x2f7   :  { %v3939_v42 = vpack.i.bf16 %v290_v40, %v287_v37  ;;  %v4501_v43 = vpack.c.bf16 %v290_v40, %v287_v37 }
 0x2fa   :  { %v294_v44 = vpop.f32.mrb[4].mxu1 }
 0x2fb   :  { %v295_v45 = vadd.f32 %v294_v44, %v230_v35  ;;  %v3744_v46 = vpop.f32.mrb[5].mxu1  ;;  %v597_v44 = vld [vmem:[%s6351_s3 + $0x28] sm:$0xff] }
 0x2fc   :  { %v297_v47 = vpop.f32.mrb[6].mxu1  ;;  %v599_v46 = vld [vmem:[%s6351_s3 + $0x38] sm:$0xff] }
 0x2fd   :  { %v298_v48 = vadd.f32 %v297_v47, %v230_v35  ;;  %v3745_v49 = vpop.f32.mrb[7].mxu1  ;;  %v3929_v50 = vpack.i.bf16 %v295_v45, %v290_v40  ;;  %v596_v40 = vld [vmem:[%s6351_s3 + $0x20] sm:$0xff]  ;;  %v602_v47 = vld [vmem:[%s6351_s3 + $0x50] sm:$0xff] }
 0x2fe   :  { %v604_v49 = vld [vmem:[%s6351_s3 + $0x60] sm:$0xff] }
 0x2ff   :  { %3930 = vrot.lane.b32.xlu1 %v3929_v50, %s4335_s23  ;;  %v3944_v51 = vpack.i.bf16 %v298_v48, %v295_v45  ;;  %v4504_v52 = vpack.c.bf16 %v298_v48, %v295_v45  ;;  %v600_v45 = vld [vmem:[%s6351_s3 + $0x40] sm:$0xff] }
 0x301   :  { %3945 = vrot.lane.b32.xlu0 %v3944_v51, %s4336_s24  ;;  %v606_v51 = vld [vmem:[%s6351_s3 + $0x70] sm:$0xff] }
 0x302   :  { %v302_v53 = vpop.f32.mrb[8].mxu1 }
 0x303   :  { %v303_v54 = vadd.f32 %v302_v53, %v230_v35  ;;  %v3748_v55 = vpop.f32.mrb[9].mxu1  ;;  %v605_v53 = vld [vmem:[%s6351_s3 + $0x68] sm:$0xff] }
 0x304   :  { %v305_v56 = vpop.f32.mrb[10].mxu1  ;;  %v607_v55 = vld [vmem:[%s6351_s3 + $0x78] sm:$0xff] }
 0x305   :  { %343 = vrot.lane.b32.xlu0 %v287_v37, %s4337_s25  ;;  %v3749_v57 = vpop.f32.mrb[11].mxu1  ;;  %v3934_v58 = vpack.i.bf16 %v303_v54, %v298_v48  ;;  %v593_v37 = vld [vmem:[%s6351_s3 + $0x8] sm:$0xff]  ;;  %v610_v56 = vld [vmem:[%s6351_s3 + $0x90] sm:$0xff] }
 0x306   :  { %v601_v48 = vld [vmem:[%s6351_s3 + $0x48] sm:$0xff] }
 0x307   :  { %3935 = vrot.lane.b32.xlu1 %v3934_v58, %s4335_s23  ;;  %v609_v57 = vld [vmem:[%s6351_s3 + $0x88] sm:$0xff] }
 0x309   :  { %3950 = vrot.lane.b32.xlu0 %v3929_v50, %s4337_s25  ;;  %v603_v50 = vld [vmem:[%s6351_s3 + $0x58] sm:$0xff] }
 0x30b   :  { %3940 = vrot.lane.b32.xlu1 %v3939_v42, %s4336_s24  ;;  %v598_v42 = vld [vmem:[%s6351_s3 + $0x30] sm:$0xff] }
 0x30d   :  { %3955 = vrot.lane.b32.xlu0 %v3934_v58, %s4337_s25  ;;  %v611_v58 = vld [vmem:[%s6351_s3 + $0x98] sm:$0xff] }
 0x30f   :  { %336 = vrot.lane.b32.xlu1 %v303_v54, %s4336_s24 }
 0x313   :  { %378 = vrot.lane.b32.xlu1 %v4501_v43, %s4339_s26 }
 0x317   :  { %380 = vrot.lane.b32.xlu1 %v4504_v52, %s4339_s26 }
 0x367   :  { %v314_v60 = vpop.permute.xlu0 %313 }
 0x368   :  { %v4522_v61 = vpack.c.bf16 %v314_v60, %v303_v54  ;;  %v608_v54 = vld [vmem:[%s6351_s3 + $0x80] sm:$0xff] }
 0x36a   :  { %382 = vrot.lane.b32.xlu1 %v4522_v61, %s4339_s26 }
 0x371   :  { %v3931_v62 = vpop.permute.xlu1 %3930 }
 0x372   :  { %v3933_v63 = vunpack.i.h.bf16 %v3931_v62  ;;  %v3932_v1 = vunpack.i.l.bf16 %v3931_v62 }
 0x373   :  { %v3946_v2 = vpop.permute.xlu0 %3945 }
 0x374   :  { %v4526_v3 = vpack.c.bf16 %v3933_v63, %v3932_v1  ;;  %v3948_v9 = vunpack.i.h.bf16 %v3946_v2  ;;  %v3947_v11 = vunpack.i.l.bf16 %v3946_v2 }
 0x376   :  { %384 = vrot.lane.b32.xlu0 %v4526_v3, %s4339_s26  ;;  %v4536_v21 = vpack.c.bf16 %v3948_v9, %v3947_v11 }
 0x377   :  { %v344_v4 = vpop.permute.xlu0 %343 }
 0x379   :  { %v3936_v5 = vpop.permute.xlu1 %3935 }
 0x37a   :  { %v3938_v6 = vunpack.i.h.bf16 %v3936_v5  ;;  %v3937_v7 = vunpack.i.l.bf16 %v3936_v5 }
 0x37b   :  { %v3951_v8 = vpop.permute.xlu0 %3950 }
 0x37c   :  { %v4530_v12 = vpack.c.bf16 %v3938_v6, %v3937_v7  ;;  %v3953_v17 = vunpack.i.h.bf16 %v3951_v8  ;;  %v3952_v18 = vunpack.i.l.bf16 %v3951_v8 }
 0x37d   :  { %v3941_v14 = vpop.permute.xlu1 %3940 }
 0x37e   :  { %v3943_v15 = vunpack.i.h.bf16 %v3941_v14  ;;  %v3942_v16 = vunpack.i.l.bf16 %v3941_v14  ;;  %386 = vrot.lane.b32.xlu1 %v4530_v12, %s4339_s26  ;;  %v4544_v28 = vpack.c.bf16 %v3953_v17, %v3952_v18 }
 0x37f   :  { %v3956_v22 = vpop.permute.xlu0 %3955 }
 0x380   :  { %v4534_v19 = vpack.c.bf16 %v3943_v15, %v3942_v16  ;;  %v3958_v25 = vunpack.i.h.bf16 %v3956_v22  ;;  %v3957_v26 = vunpack.i.l.bf16 %v3956_v22 }
 0x381   :  { %v337_v24 = vpop.permute.xlu1 %336 }
 0x382   :  { %388 = vrot.lane.b32.xlu0 %v4534_v19, %s4339_s26  ;;  %390 = vrot.lane.b32.xlu1 %v4536_v21, %s4339_s26  ;;  %v4542_v27 = vpack.c.bf16 %v344_v4, %v337_v24  ;;  %v4554_v35 = vpack.c.bf16 %v3958_v25, %v3957_v26 }
 0x385   :  { %v379_v30 = vpop.permute.xlu1 %378 }
 0x386   :  { %v430_v31 = vsel %vm398_vm3, %v379_v30, 0  ;;  %392 = vrot.lane.b32.xlu0 %v4542_v27, %s4339_s26  ;;  %394 = vrot.lane.b32.xlu1 %v4544_v28, %s4339_s26 }
 0x387   :  { %460 = vmatpush1.bf16.xpose.msra.mxu1 %v430_v31 }
 0x388   :  { %461 = vmatprep.subr.bf16.mxu1 %v6367_v59 }
 0x389   :  { %v381_v36 = vpop.permute.xlu1 %380 }
 0x38a   :  { %396 = vrot.lane.b32.xlu0 %v4554_v35, %s4339_s26  ;;  %614 = vperm.xlu1 %3959, %v592_v34   ;;  %v433_v39 = vsel %vm398_vm3, %v381_v36, 0 }
 0x38e   :  { %617 = vperm.xlu0 %3960, %v593_v37   ;;  %620 = vperm.xlu1 %3959, %v594_v38  }
 0x38f   :  { %462 = vmatpush1.bf16.xpose.msra.mxu1 %v433_v39 }
 0x390   :  { %463 = vmatprep.subr.bf16.mxu1 %v6367_v59 }
 0x392   :  { %626 = vperm.xlu0 %3960, %v596_v40   ;;  %623 = vperm.xlu1 %3959, %v595_v41  }
 0x396   :  { %632 = vperm.xlu0 %3960, %v598_v42   ;;  %629 = vperm.xlu1 %3959, %v597_v44  }
 0x39a   :  { %638 = vperm.xlu0 %3960, %v600_v45   ;;  %635 = vperm.xlu1 %3959, %v599_v46  }
 0x39e   :  { %644 = vperm.xlu0 %3960, %v602_v47   ;;  %641 = vperm.xlu1 %3959, %v601_v48  }
 0x3a2   :  { %650 = vperm.xlu0 %3960, %v604_v49   ;;  %647 = vperm.xlu1 %3959, %v603_v50  }
 0x3a6   :  { %656 = vperm.xlu0 %3960, %v606_v51   ;;  %653 = vperm.xlu1 %3959, %v605_v53  }
 0x3aa   :  { %662 = vperm.xlu0 %3960, %v608_v54   ;;  %659 = vperm.xlu1 %3959, %v607_v55  }
 0x3ae   :  { %668 = vperm.xlu0 %3960, %v610_v56   ;;  %665 = vperm.xlu1 %3959, %v609_v57  }
 0x3b2   :  { %1121 = vrot.lane.b32.xlu0 %v4501_v43, %s4340_s30  ;;  %671 = vperm.xlu1 %3959, %v611_v58  }
 0x3b6   :  { %1127 = vrot.lane.b32.xlu0 %v4526_v3, %s4340_s30  ;;  %1123 = vrot.lane.b32.xlu1 %v4504_v52, %s4340_s30 }
 0x3ba   :  { %1131 = vrot.lane.b32.xlu0 %v4534_v19, %s4340_s30  ;;  %1125 = vrot.lane.b32.xlu1 %v4522_v61, %s4340_s30 }
 0x3be   :  { %1129 = vrot.lane.b32.xlu1 %v4530_v12, %s4340_s30 }
 0x3dc   :  { %v383_v60 = vpop.permute.xlu1 %382 }
 0x3dd   :  { %v436_v62 = vsel %vm398_vm3, %v383_v60, 0 }
 0x3de   :  { %464 = vmatpush1.bf16.xpose.msra.mxu1 %v436_v62 }
 0x3df   :  { %465 = vmatprep.subr.bf16.mxu1 %v6367_v59 }
 0x3e8   :  { %v385_v63 = vpop.permute.xlu0 %384 }
 0x3e9   :  { %v439_v1 = vsel %vm398_vm3, %v385_v63, 0 }
 0x3ea   :  { %466 = vmatpush1.bf16.xpose.msra.mxu1 %v439_v1 }
 0x3eb   :  { %467 = vmatprep.subr.bf16.mxu1 %v6367_v59 }
 0x3f0   :  { %v387_v2 = vpop.permute.xlu1 %386 }
 0x3f1   :  { %v442_v4 = vsel %vm398_vm3, %v387_v2, 0 }
 0x3f2   :  { %468 = vmatpush1.bf16.xpose.msra.mxu1 %v442_v4 }
 0x3f3   :  { %469 = vmatprep.subr.bf16.mxu1 %v6367_v59 }
 0x3f4   :  { %v389_v5 = vpop.permute.xlu0 %388  ;;  %v391_v7 = vpop.permute.xlu1 %390 }
 0x3f5   :  { %v445_v6 = vsel %vm398_vm3, %v389_v5, 0  ;;  %v448_v8 = vsel %vm398_vm3, %v391_v7, 0 }
 0x3f8   :  { %v393_v9 = vpop.permute.xlu0 %392  ;;  %v395_v11 = vpop.permute.xlu1 %394 }
 0x3f9   :  { %v451_v14 = vsel %vm398_vm3, %v393_v9, 0  ;;  %v454_v22 = vsel %vm398_vm3, %v395_v11, 0 }
 0x3fa   :  { %470 = vmatpush1.bf16.xpose.msra.mxu1 %v445_v6 }
 0x3fb   :  { %471 = vmatprep.subr.bf16.mxu1 %v6367_v59 }
 0x3fc   :  { %v397_v15 = vpop.permute.xlu0 %396 }
 0x3fd   :  { %v457_v31 = vsel %vm398_vm3, %v397_v15, 0 }
 0x402   :  { %472 = vmatpush1.bf16.xpose.msra.mxu1 %v448_v8 }
 0x403   :  { %473 = vmatprep.subr.bf16.mxu1 %v6367_v59 }
 0x409   :  { %v4641_v16 = vpop.permute.xlu1 %614 }
 0x40a   :  { %6443 = vst [vmem:[#allocation4_spill] sm:$0xff] %v4641_v16  ;;  %474 = vmatpush1.bf16.xpose.msra.mxu1 %v451_v14 }
 0x40b   :  { %475 = vmatprep.subr.bf16.mxu1 %v6367_v59 }
 0x40d   :  { %v4644_v17 = vpop.permute.xlu0 %617  ;;  %v4646_v18 = vpop.permute.xlu1 %620 }
 0x40e   :  { %6444 = vst [vmem:[#allocation5_spill] sm:$0xff] %v4644_v17  ;;  %6445 = vst [vmem:[#allocation6_spill] sm:$0xff] %v4646_v18 }
 0x411   :  { %v4649_v24 = vpop.permute.xlu0 %626  ;;  %v4651_v25 = vpop.permute.xlu1 %623 }
 0x412   :  { %6446 = vst [vmem:[#allocation7_spill] sm:$0xff] %v4649_v24  ;;  %6447 = vst [vmem:[#allocation8_spill] sm:$0xff] %v4651_v25  ;;  %476 = vmatpush1.bf16.xpose.msra.mxu1 %v454_v22 }
 0x413   :  { %477 = vmatprep.subr.bf16.mxu1 %v6367_v59 }
 0x415   :  { %v4654_v26 = vpop.permute.xlu0 %632  ;;  %v4656_v30 = vpop.permute.xlu1 %629 }
 0x416   :  { %6448 = vst [vmem:[#allocation9_spill] sm:$0xff] %v4654_v26  ;;  %6449 = vst [vmem:[#allocation10_spill] sm:$0xff] %v4656_v30 }
 0x419   :  { %v4659_v34 = vpop.permute.xlu0 %638  ;;  %v4661_v36 = vpop.permute.xlu1 %635 }
 0x41a   :  { %6450 = vst [vmem:[#allocation11_spill] sm:$0xff] %v4659_v34  ;;  %6451 = vst [vmem:[#allocation12_spill] sm:$0xff] %v4661_v36  ;;  %478 = vmatpush1.bf16.xpose.msra.mxu1 %v457_v31 }
 0x41b   :  { %3772 = vmatprep.subr.bf16.mxu1 %v6365_v0 }
 0x41d   :  { %v4664_v37 = vpop.permute.xlu0 %644  ;;  %v4666_v38 = vpop.permute.xlu1 %641 }
 0x41e   :  { %6452 = vst [vmem:[#allocation13_spill] sm:$0xff] %v4664_v37  ;;  %6453 = vst [vmem:[#allocation14_spill] sm:$0xff] %v4666_v38 }
 0x421   :  { %v4668_v39 = vpop.permute.xlu0 %650  ;;  %3529 = vmatmul.mubr.msk.bf16.vlgmr.msra.gmra.mrb[12].mxu1 %vm398_vm3, %v4501_v43  ;;  %v4672_v40 = vpop.permute.xlu1 %647 }
 0x422   :  { %6454 = vst [vmem:[#allocation15_spill] sm:$0xff] %v4668_v39  ;;  %6455 = vst [vmem:[#allocation16_spill] sm:$0xff] %v4672_v40  ;;  %501 = vmatprep.mubr.bf16.mxu1 %v6367_v59 }
 0x425   :  { %v4675_v41 = vpop.permute.xlu0 %656  ;;  %v4677_v42 = vpop.permute.xlu1 %653 }
 0x426   :  { %6456 = vst [vmem:[#allocation17_spill] sm:$0xff] %v4675_v41  ;;  %6457 = vst [vmem:[#allocation18_spill] sm:$0xff] %v4677_v42 }
 0x429   :  { %v4679_v44 = vpop.permute.xlu0 %662  ;;  %3530 = vmatmul.mubr.msk.bf16.gmra.mrb[16].mxu1 %vm398_vm3, %v4504_v52  ;;  %v4683_v45 = vpop.permute.xlu1 %659 }
 0x42a   :  { %6458 = vst [vmem:[#allocation19_spill] sm:$0xff] %v4679_v44  ;;  %6459 = vst [vmem:[#allocation20_spill] sm:$0xff] %v4683_v45  ;;  %511 = vmatprep.mubr.bf16.mxu1 %v6367_v59 }
 0x42d   :  { %v4686_v46 = vpop.permute.xlu0 %668  ;;  %v4688_v43 = vpop.permute.xlu1 %665 }
 0x42e   :  { %6460 = vst [vmem:[#allocation21_spill] sm:$0xff] %v4686_v46  ;;  %6461 = vst [vmem:[#allocation22_spill] sm:$0xff] %v4688_v43 }
 0x431   :  { %v1122_v47 = vpop.permute.xlu0 %1121  ;;  %3531 = vmatmul.mubr.msk.bf16.gmra.mrb[20].mxu1 %vm398_vm3, %v4522_v61  ;;  %v4692_v48 = vpop.permute.xlu1 %671 }
 0x432   :  { %6462 = vst [vmem:[#allocation23_spill] sm:$0xff] %v4692_v48  ;;  %1182 = vmatpush1.bf16.msra.mxu0 %v1122_v47  ;;  %521 = vmatprep.mubr.bf16.mxu1 %v6367_v59 }
 0x433   :  { %1183 = vmatprep.subr.bf16.mxu0 %v6367_v59 }
 0x435   :  { %v1124_v52 = vpop.permute.xlu1 %1123  ;;  %v1128_v61 = vpop.permute.xlu0 %1127 }
 0x436   :  { %1184 = vmatpush1.bf16.msra.mxu0 %v1124_v52 }
 0x437   :  { %1185 = vmatprep.subr.bf16.mxu0 %v6367_v59 }
 0x439   :  { %3532 = vmatmul.mubr.msk.bf16.gmra.mrb[24].mxu1 %vm398_vm3, %v4526_v3  ;;  %v1126_v49 = vpop.permute.xlu1 %1125  ;;  %v1132_v3 = vpop.permute.xlu0 %1131 }
 0x43a   :  { %1186 = vmatpush1.bf16.msra.mxu0 %v1126_v49  ;;  %531 = vmatprep.mubr.bf16.mxu1 %v6367_v59 }
 0x43b   :  { %1187 = vmatprep.subr.bf16.mxu0 %v6367_v59 }
 0x43d   :  { %v1130_v50 = vpop.permute.xlu1 %1129 }
 0x43e   :  { %1188 = vmatpush1.bf16.msra.mxu0 %v1128_v61 }
 0x43f   :  { %1189 = vmatprep.subr.bf16.mxu0 %v6367_v59 }
 0x441   :  { %3533 = vmatmul.mubr.msk.bf16.gmra.mrb[28].mxu1 %vm398_vm3, %v4530_v12  ;;  %v4724_v12 = vsub.s32 1, %v4491_v32 }
 0x442   :  { %1190 = vmatpush1.bf16.msra.mxu0 %v1130_v50  ;;  %541 = vmatprep.mubr.bf16.mxu1 %v6367_v59 }
 0x443   :  { %1191 = vmatprep.subr.bf16.mxu0 %v6367_v59 }
 0x446   :  { %1192 = vmatpush1.bf16.msra.mxu0 %v1132_v3 }
 0x447   :  { %1193 = vmatprep.subr.bf16.mxu0 %v6367_v59 }
 0x449   :  { %3534 = vmatmul.mubr.msk.bf16.gmra.mrb[32].mxu1 %vm398_vm3, %v4534_v19  ;;  %v612_v19 = vld [vmem:[%s6352_s4] sm:$0x3] }
 0x44a   :  { %551 = vmatprep.mubr.bf16.mxu1 %v6367_v59  ;;  %v4730_v51 = vrot.slane %v612_v19, %v4724_v12  ;;  %v4733_v53 = vrot.slane %v612_v19, %v4494_v33 }
 0x44c   :  { %6463 = vst [vmem:[#allocation24_spill] sm:$0xff] %v4733_v53  ;;  %vm682_vm4 = vcmp.eq.s32.totalorder %v4641_v16, %v4730_v51  ;;  %vm681_vm5 = vcmp.eq.s32.totalorder %v4641_v16, %v4733_v53  ;;  %vm684_vm6 = vcmp.eq.s32.totalorder %v4644_v17, %v4730_v51  ;;  %vm683_vm7 = vcmp.eq.s32.totalorder %v4644_v17, %v4733_v53 }
 0x44d   :  { %vm686_vm8 = vcmp.eq.s32.totalorder %v4646_v18, %v4730_v51  ;;  %vm685_vm9 = vcmp.eq.s32.totalorder %v4646_v18, %v4733_v53  ;;  %vm688_vm10 = vcmp.eq.s32.totalorder %v4651_v25, %v4730_v51  ;;  %vm687_vm11 = vcmp.eq.s32.totalorder %v4651_v25, %v4733_v53 }
 0x44e   :  { %vm690_vm12 = vcmp.eq.s32.totalorder %v4649_v24, %v4730_v51  ;;  %vm6360_vm13 = vcmp.eq.s32.totalorder %v4649_v24, %v4733_v53  ;;  %vm6358_vm14 = vcmp.eq.s32.totalorder %v4656_v30, %v4730_v51  ;;  %vm6359_vm15 = vcmp.eq.s32.totalorder %v4656_v30, %v4733_v53 }
 0x44f   :  { %vm6407_vm1 = vcmp.eq.s32.totalorder %v4654_v26, %v4730_v51 }
 0x451   :  { %3535 = vmatmul.mubr.msk.bf16.gmra.mrb[36].mxu1 %vm398_vm3, %v4536_v21 }
 0x452   :  { %561 = vmatprep.mubr.bf16.mxu1 %v6367_v59 }
 0x459   :  { %3536 = vmatmul.mubr.msk.bf16.gmra.mrb[40].mxu1 %vm398_vm3, %v4542_v27 }
 0x45a   :  { %571 = vmatprep.mubr.bf16.mxu1 %v6367_v59 }
 0x461   :  { %3537 = vmatmul.mubr.msk.bf16.gmra.mrb[44].mxu1 %vm398_vm3, %v4544_v28 }
 0x462   :  { %581 = vmatprep.mubr.bf16.mxu1 %v6367_v59 }
 0x469   :  { %3538 = vmatmul.mubr.msk.bf16.gmra.mrb[48].mxu1 %vm398_vm3, %v4554_v35 }
 0x46a   :  { %3776 = vmatprep.mubr.msk.bf16.mxu1 %vm4334_vm0, %v6365_v0 }
 0x4f4   :  { %v493_v54 = vpop.f32.mrb[12].mxu1 }
 0x4f5   :  { %v495_v55 = vpop.f32.mrb[13].mxu1  ;;  %v4751_v58 = vsel %vm681_vm5, %v493_v54, -1e+30 }
 0x4f6   :  { %v4744_v56 = vsel %vm682_vm4, %v495_v55, -1e+30  ;;  %v497_v57 = vpop.f32.mrb[14].mxu1 }
 0x4f7   :  { %v761_v60 = vsel %vm153_vm2, %v4744_v56, -inf  ;;  %v499_v62 = vpop.f32.mrb[15].mxu1  ;;  %v4764_v2 = vsel %vm683_vm7, %v497_v57, -1e+30 }
 0x4f8   :  { %v4758_v63 = vsel %vm684_vm6, %v499_v62, -1e+30  ;;  %v762_v1 = vmax.f32 %v4751_v58, %v761_v60 }
 0x4f9   :  { %v765_v4 = vsel %vm153_vm2, %v4758_v63, -inf }
 0x4fa   :  { %763 = vmax.xlane.f32.xlu0 %v762_v1  ;;  %v766_v5 = vmax.f32 %v4764_v2, %v765_v4 }
 0x4fc   :  { %767 = vmax.xlane.f32.xlu1 %v766_v5  ;;  %v503_v6 = vpop.f32.mrb[16].mxu1 }
 0x4fd   :  { %v505_v7 = vpop.f32.mrb[17].mxu1  ;;  %v4785_v11 = vsel %vm685_vm9, %v503_v6, -1e+30 }
 0x4fe   :  { %v4778_v8 = vsel %vm686_vm8, %v505_v7, -1e+30  ;;  %v507_v9 = vpop.f32.mrb[18].mxu1 }
 0x4ff   :  { %v769_v14 = vsel %vm153_vm2, %v4778_v8, -inf  ;;  %v509_v15 = vpop.f32.mrb[19].mxu1  ;;  %v4798_v47 = vsel %vm687_vm11, %v507_v9, -1e+30 }
 0x500   :  { %v4792_v22 = vsel %vm688_vm10, %v509_v15, -1e+30  ;;  %v770_v31 = vmax.f32 %v4785_v11, %v769_v14 }
 0x501   :  { %v773_v52 = vsel %vm153_vm2, %v4792_v22, -inf }
 0x502   :  { %771 = vmax.xlane.f32.xlu0 %v770_v31  ;;  %v774_v49 = vmax.f32 %v4798_v47, %v773_v52 }
 0x504   :  { %v513_v61 = vpop.f32.mrb[20].mxu1  ;;  %775 = vmax.xlane.f32.xlu1 %v774_v49 }
 0x505   :  { %v515_v50 = vpop.f32.mrb[21].mxu1  ;;  %v4815_v54 = vsel %vm6360_vm13, %v513_v61, -1e+30  ;;  %vm6363_vm13 = vcmp.eq.s32.totalorder %v4661_v36, %v4733_v53 }
 0x506   :  { %v4810_v3 = vsel %vm690_vm12, %v515_v50, -1e+30  ;;  %v517_v19 = vpop.f32.mrb[22].mxu1 }
 0x507   :  { %v777_v55 = vsel %vm153_vm2, %v4810_v3, -inf  ;;  %v519_v57 = vpop.f32.mrb[23].mxu1  ;;  %v4834_v4 = vsel %vm6359_vm15, %v517_v19, -1e+30  ;;  %vm6361_vm15 = vcmp.eq.s32.totalorder %v4661_v36, %v4730_v51 }
 0x508   :  { %v4824_v60 = vsel %vm6358_vm14, %v519_v57, -1e+30  ;;  %v778_v62 = vmax.f32 %v4815_v54, %v777_v55  ;;  %vm6362_vm14 = vcmp.eq.s32.totalorder %v4654_v26, %v4733_v53 }
 0x509   :  { %v781_v1 = vsel %vm153_vm2, %v4824_v60, -inf }
 0x50a   :  { %779 = vmax.xlane.f32.xlu0 %v778_v62  ;;  %v782_v6 = vmax.f32 %v4834_v4, %v781_v1 }
 0x50c   :  { %v523_v5 = vpop.f32.mrb[24].mxu1 }
 0x50d   :  { %v525_v7 = vpop.f32.mrb[25].mxu1  ;;  %v4849_v15 = vsel %vm6362_vm14, %v523_v5, -1e+30  ;;  %vm6369_vm14 = vcmp.eq.s32.totalorder %v4659_v34, %v4733_v53 }
 0x50e   :  { %v4844_v9 = vsel %vm6407_vm1, %v525_v7, -1e+30  ;;  %v527_v14 = vpop.f32.mrb[26].mxu1  ;;  %783 = vmax.xlane.f32.xlu0 %v782_v6  ;;  %vm6412_vm1 = vcmp.eq.s32.totalorder %v4672_v40, %v4733_v53 }
 0x50f   :  { %v785_v31 = vsel %vm153_vm2, %v4844_v9, -inf  ;;  %v529_v52 = vpop.f32.mrb[27].mxu1  ;;  %v4866_v50 = vsel %vm6363_vm13, %v527_v14, -1e+30  ;;  %vm6370_vm13 = vcmp.eq.s32.totalorder %v4664_v37, %v4730_v51 }
 0x510   :  { %v4860_v49 = vsel %vm6361_vm15, %v529_v52, -1e+30  ;;  %v786_v61 = vmax.f32 %v4849_v15, %v785_v31  ;;  %vm6364_vm15 = vcmp.eq.s32.totalorder %v4659_v34, %v4730_v51 }
 0x511   :  { %v789_v19 = vsel %vm153_vm2, %v4860_v49, -inf }
 0x512   :  { %787 = vmax.xlane.f32.xlu0 %v786_v61  ;;  %v790_v55 = vmax.f32 %v4866_v50, %v789_v19 }
 0x514   :  { %v533_v57 = vpop.f32.mrb[28].mxu1  ;;  %791 = vmax.xlane.f32.xlu1 %v790_v55 }
 0x515   :  { %v535_v62 = vpop.f32.mrb[29].mxu1  ;;  %v4883_v6 = vsel %vm6369_vm14, %v533_v57, -1e+30  ;;  %vm6378_vm14 = vcmp.eq.s32.totalorder %v4668_v39, %v4730_v51 }
 0x516   :  { %v4878_v1 = vsel %vm6364_vm15, %v535_v62, -1e+30  ;;  %v537_v5 = vpop.f32.mrb[30].mxu1  ;;  %vm6377_vm15 = vcmp.eq.s32.totalorder %v4664_v37, %v4733_v53 }
 0x517   :  { %v793_v7 = vsel %vm153_vm2, %v4878_v1, -inf  ;;  %v539_v14 = vpop.f32.mrb[31].mxu1 }
 0x518   :  { %v794_v31 = vmax.f32 %v4883_v6, %v793_v7 }
 0x51a   :  { %795 = vmax.xlane.f32.xlu0 %v794_v31 }
 0x51c   :  { %v543_v52 = vpop.f32.mrb[32].mxu1 }
 0x51d   :  { %v545_v61 = vpop.f32.mrb[33].mxu1  ;;  %v4900_v57 = vsel %vm6377_vm15, %v543_v52, -1e+30  ;;  %vm6388_vm15 = vcmp.eq.s32.totalorder %v4675_v41, %v4730_v51 }
 0x51e   :  { %v4895_v19 = vsel %vm6370_vm13, %v545_v61, -1e+30  ;;  %v547_v55 = vpop.f32.mrb[34].mxu1  ;;  %vm6387_vm13 = vcmp.eq.s32.totalorder %v4668_v39, %v4733_v53 }
 0x51f   :  { %v801_v62 = vsel %vm153_vm2, %v4895_v19, -inf  ;;  %v549_v7 = vpop.f32.mrb[35].mxu1 }
 0x520   :  { %v802_v31 = vmax.f32 %v4900_v57, %v801_v62 }
 0x522   :  { %803 = vmax.xlane.f32.xlu0 %v802_v31 }
 0x524   :  { %v553_v0 = vpop.f32.mrb[36].mxu1 }
 0x525   :  { %v555_v59 = vpop.f32.mrb[37].mxu1  ;;  %1133 = vrot.lane.b32.xlu1 %v4536_v21, %s4340_s30  ;;  %v4919_v62 = vsel %vm6387_vm13, %v553_v0, -1e+30  ;;  %vm6401_vm13 = vcmp.eq.s32.totalorder %v4679_v44, %v4730_v51 }
 0x526   :  { %v4914_v52 = vsel %vm6378_vm14, %v555_v59, -1e+30  ;;  %v557_v61 = vpop.f32.mrb[38].mxu1  ;;  %vm6403_vm14 = vcmp.eq.s32.totalorder %v4675_v41, %v4733_v53 }
 0x527   :  { %v809_v31 = vsel %vm153_vm2, %v4914_v52, -inf  ;;  %v559_v37 = vpop.f32.mrb[39].mxu1 }
 0x528   :  { %v810_v21 = vmax.f32 %v4919_v62, %v809_v31 }
 0x52a   :  { %811 = vmax.xlane.f32.xlu0 %v810_v21 }
 0x52c   :  { %v563_v34 = vpop.f32.mrb[40].mxu1 }
 0x52d   :  { %v565_v36 = vpop.f32.mrb[41].mxu1  ;;  %v4936_v39 = vsel %vm6403_vm14, %v563_v34, -1e+30  ;;  %vm6410_vm14 = vcmp.eq.s32.totalorder %v4666_v38, %v4733_v53 }
 0x52e   :  { %v4931_v0 = vsel %vm6388_vm15, %v565_v36, -1e+30  ;;  %v567_v59 = vpop.f32.mrb[42].mxu1  ;;  %vm6402_vm15 = vcmp.eq.s32.totalorder %v4679_v44, %v4733_v53 }
 0x52f   :  { %v817_v31 = vsel %vm153_vm2, %v4931_v0, -inf  ;;  %v569_v21 = vpop.f32.mrb[43].mxu1 }
 0x530   :  { %v818_v26 = vmax.f32 %v4936_v39, %v817_v31 }
 0x532   :  { %819 = vmax.xlane.f32.xlu0 %v818_v26 }
 0x534   :  { %v573_v30 = vpop.f32.mrb[44].mxu1 }
 0x535   :  { %v575_v24 = vpop.f32.mrb[45].mxu1  ;;  %v4953_v41 = vsel %vm6402_vm15, %v573_v30, -1e+30  ;;  %vm6411_vm15 = vcmp.eq.s32.totalorder %v4672_v40, %v4730_v51 }
 0x536   :  { %v4948_v34 = vsel %vm6401_vm13, %v575_v24, -1e+30  ;;  %v577_v36 = vpop.f32.mrb[46].mxu1  ;;  %vm6406_vm13 = vcmp.eq.s32.totalorder %v4666_v38, %v4730_v51 }
 0x537   :  { %v825_v26 = vsel %vm153_vm2, %v4948_v34, -inf  ;;  %v579_v31 = vpop.f32.mrb[47].mxu1  ;;  %v4963_v24 = vsel %vm6406_vm13, %v539_v14, -1e+30  ;;  %vm6415_vm13 = vcmp.eq.s32.totalorder %v4677_v42, %v4730_v51 }
 0x538   :  { %v826_v25 = vmax.f32 %v4953_v41, %v825_v26  ;;  %v797_v30 = vsel %vm153_vm2, %v4963_v24, -inf  ;;  %v4979_v26 = vsel %vm6410_vm14, %v537_v5, -1e+30  ;;  %v4996_v5 = vsel %vm6412_vm1, %v547_v55, -1e+30 }
 0x539   :  { %v798_v14 = vmax.f32 %v4979_v26, %v797_v30  ;;  %vm6413_vm14 = vcmp.eq.s32.totalorder %v4683_v45, %v4730_v51  ;;  %vm716_vm1 = vcmp.eq.s32.totalorder %v4688_v43, %v4730_v51 }
 0x53a   :  { %827 = vmax.xlane.f32.xlu0 %v826_v25  ;;  %v4974_v25 = vsel %vm6411_vm15, %v549_v7, -1e+30  ;;  %v4991_v7 = vsel %vm6415_vm13, %v559_v37, -1e+30  ;;  %vm6414_vm15 = vcmp.eq.s32.totalorder %v4677_v42, %v4733_v53  ;;  %v5008_v37 = vsel %vm6413_vm14, %v569_v21, -1e+30 }
 0x53b   :  { %v805_v44 = vsel %vm153_vm2, %v4974_v25, -inf  ;;  %v813_v38 = vsel %vm153_vm2, %v4991_v7, -inf  ;;  %v5013_v55 = vsel %vm6414_vm15, %v557_v61, -1e+30  ;;  %vm6416_vm14 = vcmp.eq.s32.totalorder %v4683_v45, %v4733_v53 }
 0x53c   :  { %v583_v18 = vpop.f32.mrb[48].mxu1  ;;  %v806_v30 = vmax.f32 %v4996_v5, %v805_v44  ;;  %v814_v44 = vmax.f32 %v5013_v55, %v813_v38  ;;  %v5027_v21 = vsel %vm716_vm1, %v579_v31, -1e+30  ;;  %v5032_v38 = vsel %vm6416_vm14, %v567_v59, -1e+30 }
 0x53d   :  { %v585_v17 = vpop.f32.mrb[49].mxu1  ;;  %vm6418_vm15 = vcmp.eq.s32.totalorder %v4692_v48, %v4730_v51  ;;  %vm6417_vm13 = vcmp.eq.s32.totalorder %v4688_v43, %v4733_v53  ;;  %vm719_vm14 = vcmp.eq.s32.totalorder %v4692_v48, %v4733_v53 }
 0x53e   :  { %v587_v16 = vpop.f32.mrb[50].mxu1  ;;  %v5049_v59 = vsel %vm6417_vm13, %v577_v36, -1e+30  ;;  %vm718_vm13 = vcmp.eq.s32.totalorder %v4686_v46, %v4730_v51 }
 0x53f   :  { %v589_v33 = vpop.f32.mrb[51].mxu1  ;;  %v5067_v36 = vsel %vm718_vm13, %v585_v17, -1e+30 }
 0x549   :  { %799 = vmax.xlane.f32.xlu1 %v798_v14  ;;  %v821_v14 = vsel %vm153_vm2, %v5008_v37, -inf }
 0x54a   :  { %v822_v61 = vmax.f32 %v5032_v38, %v821_v14 }
 0x54d   :  { %807 = vmax.xlane.f32.xlu1 %v806_v30  ;;  %v829_v30 = vsel %vm153_vm2, %v5027_v21, -inf }
 0x54e   :  { %v830_v31 = vmax.f32 %v5049_v59, %v829_v30 }
 0x550   :  { %1135 = vrot.lane.b32.xlu0 %v4542_v27, %s4340_s30  ;;  %v5044_v27 = vsel %vm6418_vm15, %v589_v33, -1e+30  ;;  %v5059_v33 = vsel %vm719_vm14, %v587_v16, -1e+30  ;;  %vm6433_vm15 = vcmp.eq.s32.totalorder %v4686_v46, %v4733_v53 }
 0x551   :  { %815 = vmax.xlane.f32.xlu1 %v814_v44  ;;  %v837_v44 = vsel %vm153_vm2, %v5044_v27, -inf  ;;  %v5076_v16 = vsel %vm6433_vm15, %v583_v18, -1e+30  ;;  %vm1335_vm15 = vcmask 1043456  }
 0x552   :  { %v838_v14 = vmax.f32 %v5059_v33, %v837_v44 }
 0x555   :  { %823 = vmax.xlane.f32.xlu1 %v822_v61  ;;  %v833_v61 = vsel %vm153_vm2, %v5067_v36, -inf }
 0x556   :  { %v834_v30 = vmax.f32 %v5076_v16, %v833_v61 }
 0x559   :  { %831 = vmax.xlane.f32.xlu1 %v830_v31 }
 0x55d   :  { %839 = vmax.xlane.f32.xlu1 %v838_v14 }
 0x56f   :  { %835 = vmax.xlane.f32.xlu0 %v834_v30 }
 0x587   :  { %v764_v31 = vpop.xlane.xlu0 %763 }
 0x588   :  { %v841_v44 = vsub.f32 %v4751_v58, %v764_v31  ;;  %v842_v17 = vsub.f32 %v4744_v56, %v764_v31 }
 0x589   :  { %v768_v14 = vpop.xlane.xlu1 %767 }
 0x58a   :  { %v881_v48 = vmul.f32 1.442695, %v841_v44  ;;  %v883_v43 = vmul.f32 1.442695, %v842_v17  ;;  %v843_v45 = vsub.f32 %v4764_v2, %v768_v14  ;;  %v844_v42 = vsub.f32 %v4758_v63, %v768_v14 }
 0x58c   :  { %4031 = vpow2.f32 %v881_v48  ;;  %v885_v40 = vmul.f32 1.442695, %v843_v45  ;;  %v887_v46 = vmul.f32 1.442695, %v844_v42 }
 0x58d   :  { %4033 = vpow2.f32 %v883_v43 }
 0x58e   :  { %4035 = vpow2.f32 %v885_v40 }
 0x58f   :  { %4037 = vpow2.f32 %v887_v46  ;;  %v772_v18 = vpop.xlane.xlu0 %771 }
 0x590   :  { %v845_v61 = vsub.f32 %v4785_v11, %v772_v18  ;;  %v846_v58 = vsub.f32 %v4778_v8, %v772_v18 }
 0x591   :  { %v776_v30 = vpop.xlane.xlu1 %775 }
 0x592   :  { %v889_v56 = vmul.f32 1.442695, %v845_v61  ;;  %v891_v31 = vmul.f32 1.442695, %v846_v58  ;;  %v847_v44 = vsub.f32 %v4798_v47, %v776_v30  ;;  %v848_v2 = vsub.f32 %v4792_v22, %v776_v30 }
 0x594   :  { %4039 = vpow2.f32 %v889_v56  ;;  %v893_v63 = vmul.f32 1.442695, %v847_v44  ;;  %v895_v48 = vmul.f32 1.442695, %v848_v2 }
 0x595   :  { %4041 = vpow2.f32 %v891_v31 }
 0x596   :  { %v5087_v42 = vpop.eup %4031  ;;  %4043 = vpow2.f32 %v893_v63 }
 0x597   :  { %v5089_v40 = vpop.eup %4033  ;;  %4045 = vpow2.f32 %v895_v48  ;;  %v780_v45 = vpop.xlane.xlu0 %779 }
 0x598   :  { %v5091_v46 = vpop.eup %4035  ;;  %v849_v43 = vsub.f32 %v4815_v54, %v780_v45  ;;  %v850_v8 = vsub.f32 %v4810_v3, %v780_v45  ;;  %v961_v11 = vsel %vm153_vm2, %v5089_v40, 0.0 }
 0x599   :  { %v5097_v22 = vpop.eup %4037  ;;  %v962_v47 = vadd.f32 %v5087_v42, %v961_v11 }
 0x59a   :  { %v897_v17 = vmul.f32 1.442695, %v849_v43  ;;  %v899_v14 = vmul.f32 1.442695, %v850_v8  ;;  %v965_v18 = vsel %vm153_vm2, %v5097_v22, 0.0 }
 0x59b   :  { %963 = vadd.xlane.f32.xlu1 %v962_v47  ;;  %v784_v61 = vpop.xlane.xlu0 %783  ;;  %v966_v58 = vadd.f32 %v5091_v46, %v965_v18 }
 0x59c   :  { %4047 = vpow2.f32 %v897_v17  ;;  %v851_v54 = vsub.f32 %v4834_v4, %v784_v61  ;;  %v852_v3 = vsub.f32 %v4824_v60, %v784_v61 }
 0x59d   :  { %4049 = vpow2.f32 %v899_v14  ;;  %967 = vadd.xlane.f32.xlu0 %v966_v58 }
 0x59e   :  { %v5105_v30 = vpop.eup %4039  ;;  %v901_v56 = vmul.f32 1.442695, %v851_v54  ;;  %v903_v31 = vmul.f32 1.442695, %v852_v3 }
 0x59f   :  { %v5107_v44 = vpop.eup %4041 }
 0x5a0   :  { %v5109_v2 = vpop.eup %4043  ;;  %4051 = vpow2.f32 %v901_v56  ;;  %v969_v63 = vsel %vm153_vm2, %v5107_v44, 0.0 }
 0x5a1   :  { %v5113_v48 = vpop.eup %4045  ;;  %4053 = vpow2.f32 %v903_v31  ;;  %v792_v4 = vpop.xlane.xlu1 %791  ;;  %v970_v60 = vadd.f32 %v5105_v30, %v969_v63 }
 0x5a2   :  { %v855_v45 = vsub.f32 %v4866_v50, %v792_v4  ;;  %v856_v43 = vsub.f32 %v4860_v49, %v792_v4  ;;  %v973_v8 = vsel %vm153_vm2, %v5113_v48, 0.0  ;;  %v6464_v50 = vmov 0  }
 0x5a3   :  { %971 = vadd.xlane.f32.xlu1 %v970_v60  ;;  %v974_v17 = vadd.f32 %v5109_v2, %v973_v8 }
 0x5a4   :  { %v909_v11 = vmul.f32 1.442695, %v855_v45  ;;  %v911_v47 = vmul.f32 1.442695, %v856_v43  ;;  %v788_v45 = vpop.xlane.xlu0 %787 }
 0x5a5   :  { %v1134_v14 = vpop.permute.xlu1 %1133  ;;  %975 = vadd.xlane.f32.xlu0 %v974_v17 }
 0x5a6   :  { %v5121_v18 = vpop.eup %4047  ;;  %4055 = vpow2.f32 %v909_v11  ;;  %1194 = vmatpush1.bf16.msra.mxu0 %v1134_v14  ;;  %v854_v14 = vsub.f32 %v4844_v9, %v788_v45 }
 0x5a7   :  { %v5123_v61 = vpop.eup %4049  ;;  %4057 = vpow2.f32 %v911_v47  ;;  %1195 = vmatprep.subr.bf16.mxu0 %v6464_v50 }
 0x5a8   :  { %v977_v49 = vsel %vm153_vm2, %v5123_v61, 0.0  ;;  %v796_v8 = vpop.xlane.xlu0 %795 }
 0x5a9   :  { %v978_v58 = vadd.f32 %v5121_v18, %v977_v49 }
 0x5aa   :  { %v5129_v54 = vpop.eup %4051 }
 0x5ab   :  { %v5131_v3 = vpop.eup %4053  ;;  %979 = vadd.xlane.f32.xlu1 %v978_v58  ;;  %v853_v58 = vsub.f32 %v4849_v15, %v788_v45 }
 0x5ac   :  { %v981_v56 = vsel %vm153_vm2, %v5131_v3, 0.0 }
 0x5ad   :  { %v982_v31 = vadd.f32 %v5129_v54, %v981_v56  ;;  %v907_v56 = vmul.f32 1.442695, %v854_v14 }
 0x5af   :  { %983 = vadd.xlane.f32.xlu0 %v982_v31  ;;  %v804_v11 = vpop.xlane.xlu0 %803  ;;  %v858_v31 = vsub.f32 %v4878_v1, %v796_v8  ;;  %4059 = vpow2.f32 %v907_v56 }
 0x5b0   :  { %v5136_v63 = vpop.eup %4055  ;;  %v862_v15 = vsub.f32 %v4895_v19, %v804_v11  ;;  %v861_v1 = vsub.f32 %v4900_v57, %v804_v11 }
 0x5b1   :  { %v5138_v4 = vpop.eup %4057  ;;  %v915_v53 = vmul.f32 1.442695, %v858_v31 }
 0x5b2   :  { %v989_v60 = vsel %vm153_vm2, %v5138_v4, 0.0  ;;  %v923_v45 = vmul.f32 1.442695, %v862_v15  ;;  %v921_v31 = vmul.f32 1.442695, %v861_v1 }
 0x5b3   :  { %v990_v43 = vadd.f32 %v5136_v63, %v989_v60 }
 0x5b5   :  { %991 = vadd.xlane.f32.xlu0 %v990_v43  ;;  %v905_v43 = vmul.f32 1.442695, %v853_v58 }
 0x5b7   :  { %v812_v47 = vpop.xlane.xlu0 %811  ;;  %4061 = vpow2.f32 %v905_v43 }
 0x5b8   :  { %4063 = vpow2.f32 %v915_v53 }
 0x5bc   :  { %1137 = vrot.lane.b32.xlu1 %v4544_v28, %s4340_s30  ;;  %v857_v28 = vsub.f32 %v4883_v6, %v796_v8  ;;  %v866_v6 = vsub.f32 %v4914_v52, %v812_v47 }
 0x5be   :  { %v913_v9 = vmul.f32 1.442695, %v857_v28  ;;  %v931_v11 = vmul.f32 1.442695, %v866_v6 }
 0x5bf   :  { %v5145_v17 = vpop.xlane.xlu0 %819 }
 0x5c0   :  { %4065 = vpow2.f32 %v913_v9 }
 0x5c1   :  { %4067 = vpow2.f32 %v923_v45  ;;  %v865_v45 = vsub.f32 %v4919_v62, %v812_v47 }
 0x5c3   :  { %v929_v62 = vmul.f32 1.442695, %v865_v45 }
 0x5c7   :  { %v5148_v49 = vpop.xlane.xlu0 %827 }
 0x5cb   :  { %1139 = vrot.lane.b32.xlu0 %v4554_v35, %s4340_s30  ;;  %v1136_v60 = vpop.permute.xlu0 %1135 }
 0x5cc   :  { %1196 = vmatpush1.bf16.msra.mxu0 %v1136_v60  ;;  %v5160_v60 = vpop.eup %4059 }
 0x5cd   :  { %1197 = vmatprep.subr.bf16.mxu0 %v6464_v50  ;;  %v5163_v43 = vpop.eup %4061 }
 0x5d6   :  { %v800_v14 = vpop.xlane.xlu1 %799 }
 0x5d7   :  { %v859_v35 = vsub.f32 %v4979_v26, %v800_v14  ;;  %v860_v58 = vsub.f32 %v4963_v24, %v800_v14  ;;  %v985_v26 = vsel %vm153_vm2, %v5160_v60, 0.0  ;;  %v5169_v24 = vpop.eup %4063 }
 0x5d8   :  { %v986_v15 = vadd.f32 %v5163_v43, %v985_v26  ;;  %v5172_v1 = vpop.eup %4065  ;;  %v993_v14 = vsel %vm153_vm2, %v5169_v24, 0.0 }
 0x5d9   :  { %v917_v8 = vmul.f32 1.442695, %v859_v35  ;;  %v919_v56 = vmul.f32 1.442695, %v860_v58  ;;  %v870_v35 = vsub.f32 %v4931_v0, %v5145_v17 }
 0x5da   :  { %v808_v53 = vpop.xlane.xlu1 %807 }
 0x5db   :  { %4069 = vpow2.f32 %v917_v8  ;;  %v863_v19 = vsub.f32 %v4996_v5, %v808_v53  ;;  %v864_v57 = vsub.f32 %v4974_v25, %v808_v53  ;;  %v939_v47 = vmul.f32 1.442695, %v870_v35 }
 0x5dc   :  { %4071 = vpow2.f32 %v919_v56  ;;  %v994_v56 = vadd.f32 %v5172_v1, %v993_v14 }
 0x5dd   :  { %v927_v52 = vmul.f32 1.442695, %v864_v57  ;;  %4073 = vpow2.f32 %v921_v31  ;;  %v925_v28 = vmul.f32 1.442695, %v863_v19 }
 0x5de   :  { %v816_v9 = vpop.xlane.xlu1 %815 }
 0x5df   :  { %v867_v5 = vsub.f32 %v5013_v55, %v816_v9  ;;  %v868_v25 = vsub.f32 %v4991_v7, %v816_v9  ;;  %4075 = vpow2.f32 %v927_v52  ;;  %v869_v55 = vsub.f32 %v4936_v39, %v5145_v17  ;;  %v5184_v7 = vpop.eup %4067 }
 0x5e0   :  { %987 = vadd.xlane.f32.xlu1 %v986_v15  ;;  %4077 = vpow2.f32 %v931_v11  ;;  %v874_v17 = vsub.f32 %v4948_v34, %v5148_v49  ;;  %v873_v15 = vsub.f32 %v4953_v41, %v5148_v49 }
 0x5e1   :  { %v933_v58 = vmul.f32 1.442695, %v867_v5  ;;  %v935_v6 = vmul.f32 1.442695, %v868_v25  ;;  %4079 = vpow2.f32 %v925_v28  ;;  %v937_v19 = vmul.f32 1.442695, %v869_v55 }
 0x5e2   :  { %v824_v8 = vpop.xlane.xlu1 %823  ;;  %v1001_v28 = vsel %vm153_vm2, %v5184_v7, 0.0  ;;  %v947_v34 = vmul.f32 1.442695, %v874_v17 }
 0x5e3   :  { %4081 = vpow2.f32 %v933_v58  ;;  %v872_v0 = vsub.f32 %v5008_v37, %v824_v8  ;;  %v871_v57 = vsub.f32 %v5032_v38, %v824_v8  ;;  %v945_v8 = vmul.f32 1.442695, %v873_v15 }
 0x5e4   :  { %4083 = vpow2.f32 %v935_v6  ;;  %995 = vadd.xlane.f32.xlu1 %v994_v56 }
 0x5e5   :  { %v5187_v31 = vpop.eup %4069  ;;  %4085 = vpow2.f32 %v929_v62  ;;  %v943_v11 = vmul.f32 1.442695, %v872_v0  ;;  %v941_v45 = vmul.f32 1.442695, %v871_v57 }
 0x5e6   :  { %v5189_v53 = vpop.eup %4071  ;;  %4087 = vpow2.f32 %v939_v47  ;;  %v832_v52 = vpop.xlane.xlu1 %831 }
 0x5e7   :  { %v997_v26 = vsel %vm153_vm2, %v5189_v53, 0.0  ;;  %v5194_v39 = vpop.eup %4073  ;;  %4089 = vpow2.f32 %v937_v19  ;;  %v876_v25 = vsub.f32 %v5027_v21, %v832_v52  ;;  %v875_v41 = vsub.f32 %v5049_v59, %v832_v52 }
 0x5e8   :  { %v998_v37 = vadd.f32 %v5187_v31, %v997_v26  ;;  %4091 = vpow2.f32 %v943_v11  ;;  %v1002_v14 = vadd.f32 %v5194_v39, %v1001_v28 }
 0x5e9   :  { %v5201_v9 = vpop.eup %4075  ;;  %4093 = vpow2.f32 %v941_v45  ;;  %v951_v56 = vmul.f32 1.442695, %v876_v25  ;;  %v949_v59 = vmul.f32 1.442695, %v875_v41 }
 0x5ea   :  { %999 = vadd.xlane.f32.xlu1 %v998_v37  ;;  %v5203_v38 = vpop.eup %4077  ;;  %v1005_v58 = vsel %vm153_vm2, %v5201_v9, 0.0  ;;  %4095 = vpow2.f32 %v947_v34  ;;  %v840_v26 = vpop.xlane.xlu1 %839 }
 0x5eb   :  { %v5207_v5 = vpop.eup %4079  ;;  %v1009_v47 = vsel %vm153_vm2, %v5203_v38, 0.0  ;;  %4097 = vpow2.f32 %v945_v8  ;;  %v880_v37 = vsub.f32 %v5044_v27, %v840_v26  ;;  %v879_v8 = vsub.f32 %v5059_v33, %v840_v26 }
 0x5ec   :  { %v1006_v21 = vadd.f32 %v5207_v5, %v1005_v58  ;;  %4099 = vpow2.f32 %v951_v56 }
 0x5ed   :  { %v5211_v35 = vpop.eup %4081  ;;  %4101 = vpow2.f32 %v949_v59  ;;  %v959_v34 = vmul.f32 1.442695, %v880_v37 }
 0x5ee   :  { %v5215_v6 = vpop.eup %4083  ;;  %1003 = vadd.xlane.f32.xlu1 %v1002_v14 }
 0x5ef   :  { %v1013_v49 = vsel %vm153_vm2, %v5215_v6, 0.0  ;;  %v5222_v55 = vpop.eup %4085  ;;  %4103 = vpow2.f32 %v959_v34 }
 0x5f0   :  { %v1014_v62 = vadd.f32 %v5211_v35, %v1013_v49  ;;  %v5226_v0 = vpop.eup %4087  ;;  %v1010_v19 = vadd.f32 %v5222_v55, %v1009_v47 }
 0x5f1   :  { %v5229_v57 = vpop.eup %4089  ;;  %v1017_v17 = vsel %vm153_vm2, %v5226_v0, 0.0 }
 0x5f2   :  { %1007 = vadd.xlane.f32.xlu1 %v1006_v21  ;;  %1015 = vadd.xlane.f32.xlu0 %v1014_v62  ;;  %v5233_v11 = vpop.eup %4091  ;;  %v1018_v52 = vadd.f32 %v5229_v57, %v1017_v17 }
 0x5f3   :  { %v5237_v28 = vpop.eup %4093  ;;  %v1021_v15 = vsel %vm153_vm2, %v5233_v11, 0.0 }
 0x5f4   :  { %v5241_v45 = vpop.eup %4095  ;;  %v1022_v14 = vadd.f32 %v5237_v28, %v1021_v15 }
 0x5f5   :  { %v5244_v58 = vpop.eup %4097  ;;  %v1025_v49 = vsel %vm153_vm2, %v5241_v45, 0.0 }
 0x5f6   :  { %1011 = vadd.xlane.f32.xlu1 %v1010_v19  ;;  %v5251_v56 = vpop.eup %4099  ;;  %v1026_v47 = vadd.f32 %v5244_v58, %v1025_v49  ;;  %v957_v19 = vmul.f32 1.442695, %v879_v8 }
 0x5f7   :  { %v5254_v59 = vpop.eup %4101  ;;  %v1029_v33 = vsel %vm153_vm2, %v5251_v56, 0.0 }
 0x5fa   :  { %1019 = vadd.xlane.f32.xlu1 %v1018_v52 }
 0x5fc   :  { %v836_v25 = vpop.xlane.xlu0 %835 }
 0x5fd   :  { %v877_v27 = vsub.f32 %v5076_v16, %v836_v25  ;;  %v878_v41 = vsub.f32 %v5067_v36, %v836_v25  ;;  %v1030_v36 = vadd.f32 %v5254_v59, %v1029_v33  ;;  %v5259_v16 = vpop.eup %4103 }
 0x5fe   :  { %1023 = vadd.xlane.f32.xlu1 %v1022_v14  ;;  %v1037_v34 = vsel %vm153_vm2, %v5259_v16, 0.0 }
 0x5ff   :  { %v953_v21 = vmul.f32 1.442695, %v877_v27  ;;  %v955_v62 = vmul.f32 1.442695, %v878_v41 }
 0x601   :  { %4105 = vpow2.f32 %v953_v21 }
 0x602   :  { %4107 = vpow2.f32 %v955_v62  ;;  %1027 = vadd.xlane.f32.xlu1 %v1026_v47 }
 0x603   :  { %4109 = vpow2.f32 %v957_v19 }
 0x606   :  { %1031 = vadd.xlane.f32.xlu1 %v1030_v36 }
 0x60b   :  { %v5261_v26 = vpop.eup %4105 }
 0x60c   :  { %v5263_v17 = vpop.eup %4107 }
 0x60d   :  { %v1033_v37 = vsel %vm153_vm2, %v5263_v17, 0.0  ;;  %v5268_v15 = vpop.eup %4109 }
 0x60e   :  { %v1034_v52 = vadd.f32 %v5261_v26, %v1033_v37  ;;  %v1038_v25 = vadd.f32 %v5268_v15, %v1037_v34 }
 0x610   :  { %1035 = vadd.xlane.f32.xlu1 %v1034_v52 }
 0x614   :  { %1039 = vadd.xlane.f32.xlu1 %v1038_v25 }
 0x628   :  { %v964_v14 = vpop.xlane.xlu1 %963 }
 0x629   :  { %4111 = vrcp.f32 %v964_v14  ;;  %v1304_v14 = vld [vmem:[%s6353_s6] sm:$0xf] }
 0x62a   :  { %v968_v8 = vpop.xlane.xlu0 %967 }
 0x62b   :  { %4113 = vrcp.f32 %v968_v8 }
 0x630   :  { %v972_v41 = vpop.xlane.xlu1 %971 }
 0x632   :  { %v976_v21 = vpop.xlane.xlu0 %975 }
 0x633   :  { %v4112_v27 = vpop.eup %4111  ;;  %4115 = vrcp.f32 %v976_v21 }
 0x634   :  { %v1062_v62 = vmul.f32 %v4112_v27, %v5089_v40  ;;  %4117 = vrcp.f32 %v972_v41  ;;  %v1061_v8 = vmul.f32 %v4112_v27, %v5087_v42 }
 0x635   :  { %v4114_v49 = vpop.eup %4113 }
 0x636   :  { %v1064_v47 = vmul.f32 %v4114_v49, %v5097_v22  ;;  %v1063_v40 = vmul.f32 %v4114_v49, %v5091_v46 }
 0x638   :  { %v980_v19 = vpop.xlane.xlu1 %979  ;;  %v1102_v33 = vpack.c.bf16 %v1064_v47, %v1062_v62  ;;  %v1101_v62 = vpack.c.bf16 %v1063_v40, %v1061_v8  ;;  %v1337_v47 = vsel %vm1335_vm15, %v1304_v14, 0 }
 0x63a   :  { %3539 = vmatprep.mubr.msk.bf16.mxu0 %vm153_vm2, %v1102_v33  ;;  %v6465_v33 = vmov 0.0  }
 0x63c   :  { %v1138_v36 = vpop.permute.xlu1 %1137  ;;  %v984_v37 = vpop.xlane.xlu0 %983 }
 0x63d   :  { %1198 = vmatpush1.bf16.msra.mxu0 %v1138_v36  ;;  %4119 = vrcp.f32 %v984_v37  ;;  %v4116_v52 = vpop.eup %4115 }
 0x63e   :  { %1199 = vmatprep.subr.bf16.mxu0 %v6464_v50  ;;  %4121 = vrcp.f32 %v980_v19  ;;  %v4118_v25 = vpop.eup %4117  ;;  %v1068_v22 = vmul.f32 %v4116_v52, %v5113_v48  ;;  %v1067_v49 = vmul.f32 %v4116_v52, %v5109_v2 }
 0x63f   :  { %v1066_v21 = vmul.f32 %v4118_v25, %v5107_v44  ;;  %v1065_v44 = vmul.f32 %v4118_v25, %v5105_v30 }
 0x641   :  { %v1104_v19 = vpack.c.bf16 %v1068_v22, %v1066_v21  ;;  %v1103_v36 = vpack.c.bf16 %v1067_v49, %v1065_v44 }
 0x642   :  { %v992_v34 = vpop.xlane.xlu0 %991 }
 0x643   :  { %4123 = vrcp.f32 %v992_v34 }
 0x646   :  { %v1140_v41 = vpop.permute.xlu0 %1139 }
 0x647   :  { %1200 = vmatpush1.bf16.msra.mxu0 %v1140_v41  ;;  %v4120_v46 = vpop.eup %4119 }
 0x648   :  { %3918 = vmatprep.subr.msk.bf16.mxu0 %vm1335_vm15, %v1304_v14  ;;  %v4122_v48 = vpop.eup %4121  ;;  %v1072_v42 = vmul.f32 %v4120_v46, %v5131_v3  ;;  %v1071_v40 = vmul.f32 %v4120_v46, %v5129_v54 }
 0x649   :  { %v1070_v27 = vmul.f32 %v4122_v48, %v5123_v61  ;;  %v1069_v22 = vmul.f32 %v4122_v48, %v5121_v18 }
 0x64a   :  { %1214 = vmatmul.mubr.bf16.vlgmr.msra.gmra.mrb[12].mxu0 %v1101_v62 }
 0x64b   :  { %3540 = vmatprep.mubr.msk.bf16.mxu0 %vm153_vm2, %v1104_v19  ;;  %3751 = vmatpush3.bf16.msra.mxu0 %v1337_v47  ;;  %v1106_v37 = vpack.c.bf16 %v1072_v42, %v1070_v27  ;;  %v1105_v14 = vpack.c.bf16 %v1071_v40, %v1069_v22 }
 0x64c   :  { %3788 = vmatprep.subr.bf16.mxu0 %v6465_v33 }
 0x64d   :  { %v4124_v3 = vpop.eup %4123 }
 0x64e   :  { %v1076_v8 = vmul.f32 %v4124_v3, %v5138_v4  ;;  %v1075_v54 = vmul.f32 %v4124_v3, %v5136_v63 }
 0x652   :  { %1222 = vmatmul.mubr.bf16.gmra.mrb[16].mxu0 %v1103_v36 }
 0x653   :  { %3541 = vmatprep.mubr.msk.bf16.mxu0 %vm153_vm2, %v1106_v37 }
 0x65a   :  { %1230 = vmatmul.mubr.bf16.gmra.mrb[20].mxu0 %v1105_v14 }
 0x66d   :  { %v988_v2 = vpop.xlane.xlu1 %987 }
 0x66e   :  { %4125 = vrcp.f32 %v988_v2 }
 0x671   :  { %v996_v52 = vpop.xlane.xlu1 %995 }
 0x672   :  { %4127 = vrcp.f32 %v996_v52 }
 0x677   :  { %v1000_v30 = vpop.xlane.xlu1 %999 }
 0x678   :  { %v4126_v25 = vpop.eup %4125  ;;  %4129 = vrcp.f32 %v1000_v30 }
 0x679   :  { %v1074_v61 = vmul.f32 %v4126_v25, %v5160_v60  ;;  %v1073_v41 = vmul.f32 %v4126_v25, %v5163_v43 }
 0x67b   :  { %v1004_v18 = vpop.xlane.xlu1 %1003  ;;  %v1108_v21 = vpack.c.bf16 %v1076_v8, %v1074_v61  ;;  %v1107_v62 = vpack.c.bf16 %v1075_v54, %v1073_v41 }
 0x67c   :  { %4131 = vrcp.f32 %v1004_v18  ;;  %v4128_v19 = vpop.eup %4127 }
 0x67d   :  { %3542 = vmatprep.mubr.msk.bf16.mxu0 %vm153_vm2, %v1108_v21  ;;  %v1078_v4 = vmul.f32 %v4128_v19, %v5169_v24  ;;  %v1077_v63 = vmul.f32 %v4128_v19, %v5172_v1 }
 0x67e   :  { %1238 = vmatmul.mubr.bf16.gmra.mrb[24].mxu0 %v1107_v62 }
 0x67f   :  { %v1016_v34 = vpop.xlane.xlu0 %1015  ;;  %v1008_v47 = vpop.xlane.xlu1 %1007 }
 0x680   :  { %4133 = vrcp.f32 %v1008_v47 }
 0x681   :  { %4135 = vrcp.f32 %v1016_v34 }
 0x682   :  { %v4130_v46 = vpop.eup %4129 }
 0x683   :  { %v1012_v60 = vpop.xlane.xlu1 %1011  ;;  %v1080_v43 = vmul.f32 %v4130_v46, %v5189_v53  ;;  %v1079_v48 = vmul.f32 %v4130_v46, %v5187_v31 }
 0x684   :  { %4137 = vrcp.f32 %v1012_v60 }
 0x685   :  { %v1110_v49 = vpack.c.bf16 %v1080_v43, %v1078_v4  ;;  %v1109_v42 = vpack.c.bf16 %v1079_v48, %v1077_v63 }
 0x686   :  { %v4132_v27 = vpop.eup %4131 }
 0x687   :  { %3543 = vmatprep.mubr.msk.bf16.mxu0 %vm153_vm2, %v1110_v49  ;;  %v1020_v44 = vpop.xlane.xlu1 %1019  ;;  %v1082_v40 = vmul.f32 %v4132_v27, %v5184_v7  ;;  %v1081_v1 = vmul.f32 %v4132_v27, %v5194_v39 }
 0x688   :  { %1246 = vmatmul.mubr.bf16.gmra.mrb[28].mxu0 %v1109_v42  ;;  %4139 = vrcp.f32 %v1020_v44 }
 0x68a   :  { %v4134_v36 = vpop.eup %4133 }
 0x68b   :  { %v1024_v37 = vpop.xlane.xlu1 %1023  ;;  %v4136_v24 = vpop.eup %4135  ;;  %v1084_v53 = vmul.f32 %v4134_v36, %v5201_v9  ;;  %v1083_v31 = vmul.f32 %v4134_v36, %v5207_v5 }
 0x68c   :  { %4141 = vrcp.f32 %v1024_v37  ;;  %v1088_v30 = vmul.f32 %v4136_v24, %v5215_v6  ;;  %v1087_v5 = vmul.f32 %v4136_v24, %v5211_v35 }
 0x68d   :  { %v1112_v14 = vpack.c.bf16 %v1084_v53, %v1082_v40  ;;  %v1111_v2 = vpack.c.bf16 %v1083_v31, %v1081_v1 }
 0x68e   :  { %v4138_v22 = vpop.eup %4137 }
 0x68f   :  { %v1028_v52 = vpop.xlane.xlu1 %1027  ;;  %v1086_v3 = vmul.f32 %v4138_v22, %v5203_v38  ;;  %3544 = vmatprep.mubr.msk.bf16.mxu0 %vm153_vm2, %v1112_v14  ;;  %v1085_v39 = vmul.f32 %v4138_v22, %v5222_v55 }
 0x690   :  { %1254 = vmatmul.mubr.bf16.gmra.mrb[32].mxu0 %v1111_v2  ;;  %4143 = vrcp.f32 %v1028_v52 }
 0x691   :  { %v1114_v7 = vpack.c.bf16 %v1088_v30, %v1086_v3  ;;  %v1113_v8 = vpack.c.bf16 %v1087_v5, %v1085_v39 }
 0x692   :  { %v4140_v25 = vpop.eup %4139 }
 0x693   :  { %3545 = vmatprep.mubr.msk.bf16.mxu0 %vm153_vm2, %v1114_v7  ;;  %v1032_v9 = vpop.xlane.xlu1 %1031  ;;  %v1090_v38 = vmul.f32 %v4140_v25, %v5226_v0  ;;  %v1089_v55 = vmul.f32 %v4140_v25, %v5229_v57 }
 0x694   :  { %4145 = vrcp.f32 %v1032_v9 }
 0x696   :  { %v4142_v61 = vpop.eup %4141 }
 0x697   :  { %v1092_v6 = vmul.f32 %v4142_v61, %v5233_v11  ;;  %v1091_v54 = vmul.f32 %v4142_v61, %v5237_v28 }
 0x698   :  { %1262 = vmatmul.mubr.bf16.gmra.mrb[36].mxu0 %v1113_v8 }
 0x699   :  { %v1116_v41 = vpack.c.bf16 %v1092_v6, %v1090_v38  ;;  %v1115_v34 = vpack.c.bf16 %v1091_v54, %v1089_v55 }
 0x69a   :  { %v4144_v18 = vpop.eup %4143 }
 0x69b   :  { %3546 = vmatprep.mubr.msk.bf16.mxu0 %vm153_vm2, %v1116_v41  ;;  %v1094_v35 = vmul.f32 %v4144_v18, %v5241_v45  ;;  %v1093_v28 = vmul.f32 %v4144_v18, %v5244_v58 }
 0x69d   :  { %v1036_v21 = vpop.xlane.xlu1 %1035 }
 0x69e   :  { %v4146_v62 = vpop.eup %4145  ;;  %4147 = vrcp.f32 %v1036_v21 }
 0x69f   :  { %v1096_v47 = vmul.f32 %v4146_v62, %v5251_v56  ;;  %v1095_v19 = vmul.f32 %v4146_v62, %v5254_v59 }
 0x6a0   :  { %1270 = vmatmul.mubr.bf16.gmra.mrb[40].mxu0 %v1115_v34 }
 0x6a1   :  { %v1040_v0 = vpop.xlane.xlu1 %1039  ;;  %v1118_v11 = vpack.c.bf16 %v1096_v47, %v1094_v35  ;;  %v1117_v46 = vpack.c.bf16 %v1095_v19, %v1093_v28 }
 0x6a2   :  { %4149 = vrcp.f32 %v1040_v0 }
 0x6a3   :  { %3547 = vmatprep.mubr.msk.bf16.mxu0 %vm153_vm2, %v1118_v11 }
 0x6a8   :  { %1278 = vmatmul.mubr.bf16.gmra.mrb[44].mxu0 %v1117_v46  ;;  %v4148_v57 = vpop.eup %4147 }
 0x6a9   :  { %v1098_v4 = vmul.f32 %v4148_v57, %v5263_v17  ;;  %v1097_v56 = vmul.f32 %v4148_v57, %v5261_v26 }
 0x6ac   :  { %v4150_v60 = vpop.eup %4149 }
 0x6ad   :  { %v1100_v45 = vmul.f32 %v4150_v60, %v5259_v16  ;;  %v1099_v43 = vmul.f32 %v4150_v60, %v5268_v15 }
 0x6af   :  { %v1120_v63 = vpack.c.bf16 %v1100_v45, %v1098_v4  ;;  %v1119_v48 = vpack.c.bf16 %v1099_v43, %v1097_v56 }
 0x6b1   :  { %3548 = vmatprep.mubr.msk.bf16.mxu0 %vm153_vm2, %v1120_v63 }
 0x6b2   :  { %1286 = vmatmul.mubr.bf16.gmra.mrb[48].mxu0 %v1119_v48 }
 0x71d   :  { %v1215_v59 = vpop.f32.mrb[12].mxu0 }
 0x71e   :  { %v1217_v49 = vpop.f32.mrb[13].mxu0 }
 0x71f   :  { %v1218_v58 = vpop.f32.mrb[14].mxu0 }
 0x720   :  { %v1294_v42 = vpack.c.bf16 %v1218_v58, %v1215_v59  ;;  %v1220_v44 = vpop.f32.mrb[15].mxu0 }
 0x722   :  { %3752 = vmatprep.mubr.msk.bf16.mxu0 %vm398_vm3, %v1294_v42 }
 0x725   :  { %v1223_v27 = vpop.f32.mrb[16].mxu0 }
 0x726   :  { %v1225_v17 = vpop.f32.mrb[17].mxu0 }
 0x727   :  { %v1226_v36 = vpop.f32.mrb[18].mxu0 }
 0x728   :  { %v1295_v16 = vpack.c.bf16 %v1226_v36, %v1223_v27  ;;  %v1228_v37 = vpop.f32.mrb[19].mxu0 }
 0x72a   :  { %3753 = vmatmul.mubr.msk.bf16.vlgmr.msra.gmra.mrb[52].mxu0 %vm398_vm3, %v1295_v16 }
 0x72d   :  { %v1231_v26 = vpop.f32.mrb[20].mxu0 }
 0x72e   :  { %v1233_v15 = vpop.f32.mrb[21].mxu0 }
 0x72f   :  { %v1234_v40 = vpop.f32.mrb[22].mxu0 }
 0x730   :  { %v1296_v24 = vpack.c.bf16 %v1234_v40, %v1231_v26  ;;  %v1236_v53 = vpop.f32.mrb[23].mxu0 }
 0x732   :  { %3756 = vmatprep.mubr.msk.bf16.mxu0 %vm398_vm3, %v1296_v24 }
 0x751   :  { %v1239_v1 = vpop.f32.mrb[24].mxu0 }
 0x752   :  { %v1241_v31 = vpop.f32.mrb[25].mxu0 }
 0x753   :  { %v1242_v22 = vpop.f32.mrb[26].mxu0 }
 0x754   :  { %v1297_v14 = vpack.c.bf16 %v1242_v22, %v1239_v1  ;;  %v1244_v2 = vpop.f32.mrb[27].mxu0 }
 0x756   :  { %3757 = vmatmul.mubr.msk.bf16.gmra.mrb[56].mxu0 %vm398_vm3, %v1297_v14 }
 0x75b   :  { %v1247_v52 = vpop.f32.mrb[28].mxu0 }
 0x75c   :  { %v1249_v3 = vpop.f32.mrb[29].mxu0 }
 0x75d   :  { %v1250_v30 = vpop.f32.mrb[30].mxu0 }
 0x75e   :  { %v1298_v7 = vpack.c.bf16 %v1250_v30, %v1247_v52  ;;  %v1252_v9 = vpop.f32.mrb[31].mxu0  ;;  %v5362_v30 = vld [vmem:[%s6350_s9] sm:$0xf] }
 0x760   :  { %3760 = vmatprep.mubr.msk.bf16.mxu0 %vm398_vm3, %v1298_v7  ;;  %v1530_v7 = vrot.slane %v5362_v30, %v4724_v12 }
 0x763   :  { %v1255_v39 = vpop.f32.mrb[32].mxu0 }
 0x764   :  { %v1257_v25 = vpop.f32.mrb[33].mxu0 }
 0x765   :  { %v1258_v5 = vpop.f32.mrb[34].mxu0 }
 0x766   :  { %v1299_v61 = vpack.c.bf16 %v1258_v5, %v1255_v39  ;;  %v1260_v8 = vpop.f32.mrb[35].mxu0 }
 0x768   :  { %3761 = vmatmul.mubr.msk.bf16.gmra.mrb[60].mxu0 %vm398_vm3, %v1299_v61 }
 0x76b   :  { %v1263_v38 = vpop.f32.mrb[36].mxu0 }
 0x76c   :  { %v1265_v6 = vpop.f32.mrb[37].mxu0 }
 0x76d   :  { %v1266_v41 = vpop.f32.mrb[38].mxu0 }
 0x76e   :  { %v1300_v54 = vpack.c.bf16 %v1266_v41, %v1263_v38  ;;  %v1268_v18 = vpop.f32.mrb[39].mxu0 }
 0x770   :  { %3764 = vmatprep.mubr.msk.bf16.mxu0 %vm398_vm3, %v1300_v54 }
 0x773   :  { %v1271_v21 = vpop.f32.mrb[40].mxu0 }
 0x774   :  { %v1273_v55 = vpop.f32.mrb[41].mxu0 }
 0x775   :  { %v1274_v62 = vpop.f32.mrb[42].mxu0 }
 0x776   :  { %v1301_v34 = vpack.c.bf16 %v1274_v62, %v1271_v21  ;;  %v1276_v35 = vpop.f32.mrb[43].mxu0 }
 0x778   :  { %3765 = vmatmul.mubr.msk.bf16.gmra.mrb[64].mxu0 %vm398_vm3, %v1301_v34 }
 0x77b   :  { %v1279_v47 = vpop.f32.mrb[44].mxu0 }
 0x77c   :  { %v1281_v0 = vpop.f32.mrb[45].mxu0 }
 0x77d   :  { %v1282_v11 = vpop.f32.mrb[46].mxu0 }
 0x77e   :  { %v1302_v19 = vpack.c.bf16 %v1282_v11, %v1279_v47  ;;  %v1284_v28 = vpop.f32.mrb[47].mxu0 }
 0x780   :  { %3768 = vmatprep.mubr.msk.bf16.mxu0 %vm398_vm3, %v1302_v19 }
 0x785   :  { %v1287_v46 = vpop.f32.mrb[48].mxu0 }
 0x786   :  { %v1289_v57 = vpop.f32.mrb[49].mxu0 }
 0x787   :  { %v1290_v60 = vpop.f32.mrb[50].mxu0 }
 0x788   :  { %v1303_v4 = vpack.c.bf16 %v1290_v60, %v1287_v46  ;;  %v1292_v45 = vpop.f32.mrb[51].mxu0 }
 0x78a   :  { %3769 = vmatmul.mubr.msk.bf16.gmra.mrb[68].mxu0 %vm398_vm3, %v1303_v4 }
 0x78b   :  { %3804 = vmatprep.mubr.msk.bf16.mxu0 %vm4334_vm0, %v6465_v33 }
 0x7fd   :  { %v3754_v56 = vpop.f32.mrb[52].mxu0 }
 0x7fe   :  { %v1373_v43 = vpop.f32.mrb[53].mxu0 }
 0x7ff   :  { %v3755_v63 = vpop.f32.mrb[54].mxu0 }
 0x800   :  { %v1376_v48 = vpop.f32.mrb[55].mxu0 }
 0x829   :  { %v3758_v59 = vpop.f32.mrb[56].mxu0 }
 0x82a   :  { %1459 = vrot.lane.b32.xlu0 %v3758_v59, %s4339_s26  ;;  %v5343_v49 = vpop.f32.mrb[57].mxu0 }
 0x82b   :  { %v3759_v58 = vpop.f32.mrb[58].mxu0 }
 0x82c   :  { %1461 = vrot.lane.b32.xlu1 %v3759_v58, %s4339_s26  ;;  %v1392_v42 = vpop.f32.mrb[59].mxu0 }
 0x830   :  { %1457 = vrot.lane.b32.xlu1 %v1392_v42, %s4339_s26 }
 0x83b   :  { %v3762_v44 = vpop.f32.mrb[60].mxu0 }
 0x83c   :  { %1482 = vrot.lane.b32.xlu1 %v3762_v44, %s4340_s30  ;;  %v1405_v27 = vpop.f32.mrb[61].mxu0 }
 0x83d   :  { %1463 = vrot.lane.b32.xlu0 %v1405_v27, %s4339_s26  ;;  %v3763_v17 = vpop.f32.mrb[62].mxu0 }
 0x83e   :  { %v1408_v36 = vpop.f32.mrb[63].mxu0 }
 0x840   :  { %1484 = vrot.lane.b32.xlu1 %v3763_v17, %s4340_s30 }
 0x84b   :  { %v3766_v16 = vpop.f32.mrb[64].mxu0 }
 0x84c   :  { %v1421_v37 = vpop.f32.mrb[65].mxu0 }
 0x84d   :  { %v3767_v26 = vpop.f32.mrb[66].mxu0 }
 0x84e   :  { %1507 = vrot.lane.b32.xlu1 %v3767_v26, %s4341_s13  ;;  %v1424_v15 = vpop.f32.mrb[67].mxu0 }
 0x852   :  { %1486 = vrot.lane.b32.xlu1 %v1421_v37, %s4340_s30 }
 0x85d   :  { %v3770_v40 = vpop.f32.mrb[68].mxu0 }
 0x85e   :  { %v1437_v24 = vpop.f32.mrb[69].mxu0 }
 0x85f   :  { %1509 = vrot.lane.b32.xlu0 %v1437_v24, %s4341_s13  ;;  %v3771_v53 = vpop.f32.mrb[70].mxu0 }
 0x860   :  { %v1440_v1 = vpop.f32.mrb[71].mxu0 }
 0x861   :  { %1511 = vrot.lane.b32.xlu1 %v1440_v1, %s4341_s13 }
 0x863   :  { %1488 = vrot.lane.b32.xlu0 %v1424_v15, %s4340_s30 }
 0x865   :  { %1465 = vrot.lane.b32.xlu1 %v1408_v36, %s4339_s26 }
 0x867   :  { %1513 = vrot.lane.b32.xlu0 %v3770_v40, %s4341_s13 }
 0x869   :  { %1515 = vrot.lane.b32.xlu1 %v3771_v53, %s4341_s13 }
 0x86b   :  { %1490 = vrot.lane.b32.xlu0 %v3766_v16, %s4340_s30 }
 0x89c   :  { %v1460_v8 = vpop.permute.xlu0 %1459 }
 0x89d   :  { %v1473_v6 = vadd.f32 %v1460_v8, %v1376_v48 }
 0x89e   :  { %v1462_v31 = vpop.permute.xlu1 %1461 }
 0x89f   :  { %v1474_v54 = vadd.f32 %v3754_v56, %v1462_v31 }
 0x8a2   :  { %v1458_v22 = vpop.permute.xlu1 %1457 }
 0x8a3   :  { %v1472_v52 = vadd.f32 %v1458_v22, %v1373_v43 }
 0x8ae   :  { %v1483_v14 = vpop.permute.xlu1 %1482 }
 0x8af   :  { %v1497_v3 = vadd.f32 %v1483_v14, %v1472_v52  ;;  %v1464_v38 = vpop.permute.xlu0 %1463 }
 0x8b0   :  { %v1475_v11 = vadd.f32 %v3755_v63, %v1464_v38 }
 0x8b2   :  { %v1485_v2 = vpop.permute.xlu1 %1484 }
 0x8b3   :  { %v1498_v18 = vadd.f32 %v1485_v2, %v1473_v6 }
 0x8c0   :  { %v1508_v9 = vpop.permute.xlu1 %1507 }
 0x8c1   :  { %v1522_v39 = vadd.f32 %v1508_v9, %v1497_v3 }
 0x8c3   :  { %v1531_v25 = vadd.f32 %v1530_v7, %v1522_v39 }
 0x8c4   :  { %v1487_v41 = vpop.permute.xlu1 %1486 }
 0x8c5   :  { %v5367_v5 = vadd.f32 %v1531_v25, %v4438_v10  ;;  %v1499_v55 = vadd.f32 %v1487_v41, %v1474_v54  ;;  %v4001_v54 = vld [vmem:[%s6355_s8] sm:$0xff]  }
 0x8c6   :  { %3789 = vmatpush3.bf16.msra.mxu0 %v4001_v54 }
 0x8c7   :  { %v1541_v61 = vsel %vm153_vm2, %v5367_v5, 0.0  ;;  %3790 = vmatprep.subr.bf16.mxu0 %v6465_v33 }
 0x8c8   :  { %1542 = vadd.xlane.f32.xlu0 %v1541_v61 }
 0x8d1   :  { %v1510_v21 = vpop.permute.xlu0 %1509 }
 0x8d2   :  { %v1523_v62 = vadd.f32 %v1510_v21, %v1498_v18  ;;  %v4002_v18 = vld [vmem:[%s6355_s8 + $0x8] sm:$0xff]   ;;  %v4003_v21 = vld [vmem:[%s6355_s8 + $0x10] sm:$0xff]  }
 0x8d3   :  { %v1512_v34 = vpop.permute.xlu1 %1511  ;;  %3791 = vmatpush3.bf16.msra.mxu0 %v4002_v18 }
 0x8d4   :  { %v1532_v35 = vadd.f32 %v1530_v7, %v1523_v62  ;;  %v1524_v47 = vadd.f32 %v1512_v34, %v1499_v55  ;;  %3792 = vmatprep.subr.bf16.mxu0 %v6465_v33  ;;  %v4004_v55 = vld [vmem:[%s6355_s8 + $0x18] sm:$0xff]  }
 0x8d5   :  { %v1489_v0 = vpop.permute.xlu0 %1488 }
 0x8d6   :  { %v5372_v10 = vadd.f32 %v1532_v35, %v4440_v13  ;;  %v1533_v19 = vadd.f32 %v1530_v7, %v1524_v47  ;;  %v1500_v46 = vadd.f32 %v1489_v0, %v1475_v11 }
 0x8d7   :  { %v1466_v60 = vpop.permute.xlu1 %1465  ;;  %3793 = vmatpush3.bf16.msra.mxu0 %v4003_v21 }
 0x8d8   :  { %v5375_v28 = vadd.f32 %v1533_v19, %v4452_v20  ;;  %v1544_v57 = vsel %vm153_vm2, %v5372_v10, 0.0  ;;  %v1476_v43 = vadd.f32 %v1466_v60, %v5343_v49  ;;  %v4000_v49 = vld [vmem:[%s6354_s7 + $0x8] sm:$0xff]   ;;  %3794 = vmatprep.subr.bf16.mxu0 %v6465_v33 }
 0x8d9   :  { %v1514_v4 = vpop.permute.xlu0 %1513  ;;  %1545 = vadd.xlane.f32.xlu1 %v1544_v57 }
 0x8da   :  { %v1525_v45 = vadd.f32 %v1514_v4, %v1500_v46  ;;  %v1547_v56 = vsel %vm153_vm2, %v5375_v28, 0.0 }
 0x8db   :  { %1548 = vadd.xlane.f32.xlu0 %v1547_v56  ;;  %v1516_v59 = vpop.permute.xlu1 %1515  ;;  %3795 = vmatpush3.bf16.msra.mxu0 %v4004_v55 }
 0x8dc   :  { %v1534_v13 = vadd.f32 %v1530_v7, %v1525_v45  ;;  %3796 = vmatprep.subr.bf16.mxu0 %v6465_v33 }
 0x8dd   :  { %v1491_v63 = vpop.permute.xlu0 %1490 }
 0x8de   :  { %v5383_v48 = vadd.f32 %v1534_v13, %v4454_v23  ;;  %v1501_v20 = vadd.f32 %v1491_v63, %v1476_v43  ;;  %v3999_v23 = vld [vmem:[%s6354_s7] sm:$0xff]  }
 0x8df   :  { %3773 = vmatpush3.bf16.msra.mxu1 %v3999_v23 }
 0x8e0   :  { %v1526_v58 = vadd.f32 %v1516_v59, %v1501_v20  ;;  %v1550_v42 = vsel %vm153_vm2, %v5383_v48, 0.0  ;;  %3774 = vmatprep.subr.bf16.mxu1 %v6465_v33 }
 0x8e1   :  { %1551 = vadd.xlane.f32.xlu0 %v1550_v42 }
 0x8e2   :  { %v1535_v44 = vadd.f32 %v1530_v7, %v1526_v58 }
 0x8e3   :  { %3775 = vmatpush3.bf16.msra.mxu1 %v4000_v49 }
 0x8e4   :  { %v5388_v27 = vadd.f32 %v1535_v44, %v4463_v29  ;;  %3816 = vmatprep.subr.bf16.mxu1 %v6465_v33 }
 0x8e6   :  { %v1553_v17 = vsel %vm153_vm2, %v5388_v27, 0.0 }
 0x8e7   :  { %1554 = vadd.xlane.f32.xlu1 %v1553_v17 }
 0x955   :  { %v1543_v29 = vpop.xlane.xlu0 %1542 }
 0x956   :  { %v1556_v36 = vmul.f32 0.03125, %v1543_v29 }
 0x958   :  { %v1561_v16 = vsub.f32 %v5367_v5, %v1556_v36 }
 0x95a   :  { %v1566_v37 = vmul.f32 %v1561_v16, %v1561_v16 }
 0x95c   :  { %v1571_v26 = vsel %vm153_vm2, %v1566_v37, 0.0 }
 0x95d   :  { %1572 = vadd.xlane.f32.xlu0 %v1571_v26  ;;  %v4005_v26 = vld [vmem:[%s6355_s8 + $0x20] sm:$0xff]  }
 0x95e   :  { %3797 = vmatpush3.bf16.msra.mxu0 %v4005_v26 }
 0x95f   :  { %3798 = vmatprep.subr.bf16.mxu0 %v6465_v33 }
 0x966   :  { %v1546_v15 = vpop.xlane.xlu1 %1545 }
 0x967   :  { %v1557_v40 = vmul.f32 0.03125, %v1546_v15  ;;  %v4006_v15 = vld [vmem:[%s6355_s8 + $0x28] sm:$0xff]  }
 0x968   :  { %v1549_v24 = vpop.xlane.xlu0 %1548  ;;  %3799 = vmatpush3.bf16.msra.mxu0 %v4006_v15 }
 0x969   :  { %v1562_v53 = vsub.f32 %v5372_v10, %v1557_v40  ;;  %v1558_v1 = vmul.f32 0.03125, %v1549_v24  ;;  %3800 = vmatprep.subr.bf16.mxu0 %v6465_v33  ;;  %v4007_v40 = vld [vmem:[%s6355_s8 + $0x30] sm:$0xff]   ;;  %v4008_v24 = vld [vmem:[%s6355_s8 + $0x38] sm:$0xff]  }
 0x96b   :  { %v1563_v31 = vsub.f32 %v5375_v28, %v1558_v1  ;;  %v1567_v22 = vmul.f32 %v1562_v53, %v1562_v53 }
 0x96c   :  { %3801 = vmatpush3.bf16.msra.mxu0 %v4007_v40 }
 0x96d   :  { %v1574_v14 = vsel %vm153_vm2, %v1567_v22, 0.0  ;;  %v1568_v2 = vmul.f32 %v1563_v31, %v1563_v31  ;;  %3802 = vmatprep.subr.bf16.mxu0 %v6465_v33 }
 0x96e   :  { %v1552_v52 = vpop.xlane.xlu0 %1551  ;;  %1575 = vadd.xlane.f32.xlu1 %v1574_v14 }
 0x96f   :  { %v1559_v3 = vmul.f32 0.03125, %v1552_v52  ;;  %v1577_v7 = vsel %vm153_vm2, %v1568_v2, 0.0 }
 0x970   :  { %1578 = vadd.xlane.f32.xlu0 %v1577_v7  ;;  %3803 = vmatpush3.bf16.msra.mxu0 %v4008_v24 }
 0x971   :  { %v1564_v9 = vsub.f32 %v5383_v48, %v1559_v3  ;;  %2157 = vmatprep.subr.bf16.mxu0 %v6464_v50 }
 0x973   :  { %v1569_v39 = vmul.f32 %v1564_v9, %v1564_v9 }
 0x974   :  { %v1555_v25 = vpop.xlane.xlu1 %1554 }
 0x975   :  { %v1560_v61 = vmul.f32 0.03125, %v1555_v25  ;;  %v1580_v8 = vsel %vm153_vm2, %v1569_v39, 0.0 }
 0x976   :  { %1581 = vadd.xlane.f32.xlu1 %v1580_v8 }
 0x977   :  { %v1565_v38 = vsub.f32 %v5388_v27, %v1560_v61 }
 0x979   :  { %v1570_v6 = vmul.f32 %v1565_v38, %v1565_v38 }
 0x97b   :  { %v1583_v41 = vsel %vm153_vm2, %v1570_v6, 0.0 }
 0x97c   :  { %1584 = vadd.xlane.f32.xlu0 %v1583_v41 }
 0x9ea   :  { %v1573_v62 = vpop.xlane.xlu0 %1572 }
 0x9eb   :  { %v1586_v34 = vmul.f32 0.03125, %v1573_v62 }
 0x9ed   :  { %v1591_v35 = vadd.f32 1e-06, %v1586_v34 }
 0x9ef   :  { %4151 = vrsqrt.f32 %v1591_v35 }
 0x9f9   :  { %v4152_v56 = vpop.eup %4151 }
 0x9fa   :  { %v1601_v20 = vmul.f32 %v4152_v56, %v1561_v16 }
 0x9fb   :  { %v1576_v47 = vpop.xlane.xlu1 %1575 }
 0x9fc   :  { %v1587_v0 = vmul.f32 0.03125, %v1576_v47 }
 0x9fd   :  { %v1579_v11 = vpop.xlane.xlu0 %1578 }
 0x9fe   :  { %v1592_v19 = vadd.f32 1e-06, %v1587_v0  ;;  %v1588_v46 = vmul.f32 0.03125, %v1579_v11 }
 0xa00   :  { %4153 = vrsqrt.f32 %v1592_v19  ;;  %v1593_v57 = vadd.f32 1e-06, %v1588_v46 }
 0xa02   :  { %4155 = vrsqrt.f32 %v1593_v57 }
 0xa03   :  { %v1582_v60 = vpop.xlane.xlu1 %1581 }
 0xa04   :  { %v1589_v4 = vmul.f32 0.03125, %v1582_v60 }
 0xa06   :  { %v1594_v45 = vadd.f32 1e-06, %v1589_v4 }
 0xa08   :  { %4157 = vrsqrt.f32 %v1594_v45 }
 0xa09   :  { %v1585_v43 = vpop.xlane.xlu0 %1584 }
 0xa0a   :  { %v4154_v13 = vpop.eup %4153  ;;  %v1590_v63 = vmul.f32 0.03125, %v1585_v43 }
 0xa0b   :  { %v1602_v59 = vmul.f32 %v4154_v13, %v1562_v53  ;;  %v6435_v53 = vsub.s32 2, %v4491_v32 }
 0xa0c   :  { %v1595_v58 = vadd.f32 1e-06, %v1590_v63  ;;  %v4156_v44 = vpop.eup %4155 }
 0xa0d   :  { %v1606_v42 = vpack.c.bf16 %v1602_v59, %v1601_v20  ;;  %v1603_v23 = vmul.f32 %v4156_v44, %v1563_v31  ;;  %v1616_v1 = vrot.slane %v5362_v30, %v6435_v53 }
 0xa0e   :  { %4159 = vrsqrt.f32 %v1595_v58 }
 0xa0f   :  { %3777 = vmatmul.mubr.msk.bf16.vlgmr.msra.gmra.mrb[52].mxu1 %vm153_vm2, %v1606_v42 }
 0xa10   :  { %3780 = vmatprep.mubr.msk.bf16.mxu1 %vm4334_vm0, %v6465_v33 }
 0xa12   :  { %v4158_v17 = vpop.eup %4157 }
 0xa13   :  { %v1604_v49 = vmul.f32 %v4158_v17, %v1564_v9 }
 0xa15   :  { %v1607_v29 = vpack.c.bf16 %v1604_v49, %v1603_v23 }
 0xa17   :  { %3781 = vmatmul.mubr.msk.bf16.gmra.mrb[56].mxu1 %vm153_vm2, %v1607_v29 }
 0xa18   :  { %v4160_v36 = vpop.eup %4159  ;;  %3784 = vmatprep.mubr.msk.bf16.mxu1 %vm4334_vm0, %v6465_v33 }
 0xa19   :  { %v1605_v16 = vmul.f32 %v4160_v36, %v1565_v38 }
 0xa1b   :  { %v1608_v37 = vpack.c.bf16 %v1605_v16, %v1605_v16  ;;  %v6434_v16 = vsub.s32 3, %v4491_v32 }
 0xa1f   :  { %3785 = vmatmul.mubr.msk.bf16.gmra.mrb[60].mxu1 %vm153_vm2, %v1608_v37  ;;  %v1741_v37 = vrot.slane %v5362_v30, %v6434_v16 }
 0xa20   :  { %3820 = vmatprep.mubr.msk.bf16.mxu1 %vm4334_vm0, %v6465_v33 }
 0xae2   :  { %v1672_v31 = vpop.f32.mrb[52].mxu1 }
 0xae3   :  { %v1673_v22 = vadd.f32 %v1672_v31, %v1616_v1  ;;  %v3778_v14 = vpop.f32.mrb[53].mxu1 }
 0xae4   :  { %v1675_v2 = vpop.f32.mrb[54].mxu1 }
 0xae5   :  { %v1699_v52 = vmul.f32 0.70710677, %v1673_v22  ;;  %v1676_v3 = vadd.f32 %v1675_v2, %v1616_v1  ;;  %v3779_v7 = vpop.f32.mrb[55].mxu1  ;;  %v1694_v47 = vmul.f32 0.5, %v1673_v22 }
 0xae7   :  { %4161 = verf.f32 %v1699_v52  ;;  %v1700_v9 = vmul.f32 0.70710677, %v1676_v3  ;;  %v1695_v0 = vmul.f32 0.5, %v1676_v3 }
 0xae9   :  { %4163 = verf.f32 %v1700_v9 }
 0xaea   :  { %v1680_v39 = vpop.f32.mrb[56].mxu1 }
 0xaeb   :  { %v1681_v25 = vadd.f32 %v1680_v39, %v1616_v1  ;;  %v3782_v61 = vpop.f32.mrb[57].mxu1 }
 0xaec   :  { %v1683_v8 = vpop.f32.mrb[58].mxu1 }
 0xaed   :  { %v1701_v38 = vmul.f32 0.70710677, %v1681_v25  ;;  %v1684_v6 = vadd.f32 %v1683_v8, %v1616_v1  ;;  %v3783_v41 = vpop.f32.mrb[59].mxu1  ;;  %v1696_v63 = vmul.f32 0.5, %v1681_v25 }
 0xaef   :  { %4165 = verf.f32 %v1701_v38  ;;  %v1702_v54 = vmul.f32 0.70710677, %v1684_v6  ;;  %v1697_v20 = vmul.f32 0.5, %v1684_v6 }
 0xaf1   :  { %v4162_v18 = vpop.eup %4161  ;;  %4167 = verf.f32 %v1702_v54 }
 0xaf2   :  { %v1709_v21 = vadd.f32 1.0, %v4162_v18  ;;  %v1688_v55 = vpop.f32.mrb[60].mxu1 }
 0xaf3   :  { %v4164_v62 = vpop.eup %4163  ;;  %v1689_v34 = vadd.f32 %v1688_v55, %v1616_v1  ;;  %v3786_v35 = vpop.f32.mrb[61].mxu1 }
 0xaf4   :  { %v1710_v11 = vadd.f32 1.0, %v4164_v62  ;;  %v1691_v19 = vpop.f32.mrb[62].mxu1  ;;  %v1714_v60 = vmul.f32 %v1709_v21, %v1694_v47  ;;  %v4009_v21 = vld [vmem:[%s6349_s5 + $0x10] sm:$0xff]  }
 0xaf5   :  { %v1703_v46 = vmul.f32 0.70710677, %v1689_v34  ;;  %v3787_v57 = vpop.f32.mrb[63].mxu1  ;;  %v1698_v23 = vmul.f32 0.5, %v1689_v34  ;;  %3817 = vmatpush3.bf16.msra.mxu1 %v4009_v21 }
 0xaf6   :  { %v1715_v4 = vmul.f32 %v1710_v11, %v1695_v0  ;;  %3818 = vmatprep.subr.bf16.mxu1 %v6465_v33 }
 0xaf7   :  { %4169 = verf.f32 %v1703_v46 }
 0xaf8   :  { %v1719_v45 = vpack.c.bf16 %v1715_v4, %v1714_v60 }
 0xaf9   :  { %v4166_v56 = vpop.eup %4165 }
 0xafa   :  { %v1711_v43 = vadd.f32 1.0, %v4166_v56  ;;  %3805 = vmatmul.mubr.bf16.vlgmr.msra.gmra.mrb[72].mxu0 %v1719_v45 }
 0xafb   :  { %v4168_v13 = vpop.eup %4167  ;;  %3808 = vmatprep.mubr.msk.bf16.mxu0 %vm4334_vm0, %v6465_v33 }
 0xafc   :  { %v1712_v59 = vadd.f32 1.0, %v4168_v13  ;;  %v1716_v58 = vmul.f32 %v1711_v43, %v1696_v63 }
 0xafe   :  { %v1717_v42 = vmul.f32 %v1712_v59, %v1697_v20 }
 0xb00   :  { %v1720_v44 = vpack.c.bf16 %v1717_v42, %v1716_v58 }
 0xb01   :  { %v4170_v17 = vpop.eup %4169 }
 0xb02   :  { %v1713_v49 = vadd.f32 1.0, %v4170_v17  ;;  %3809 = vmatmul.mubr.bf16.gmra.mrb[76].mxu0 %v1720_v44 }
 0xb03   :  { %3812 = vmatprep.mubr.msk.bf16.mxu0 %vm4334_vm0, %v6465_v33 }
 0xb04   :  { %v1718_v29 = vmul.f32 %v1713_v49, %v1698_v23  ;;  %v4010_v49 = vld [vmem:[%s6349_s5 + $0x18] sm:$0xff]  }
 0xb05   :  { %3819 = vmatpush3.bf16.msra.mxu1 %v4010_v49 }
 0xb06   :  { %v1721_v36 = vpack.c.bf16 %v1718_v29, %v1718_v29  ;;  %3898 = vmatprep.subr.bf16.mxu1 %v6464_v50 }
 0xb0a   :  { %3813 = vmatmul.mubr.bf16.gmra.mrb[80].mxu0 %v1721_v36 }
 0xb0b   :  { %2189 = vmatprep.mubr.bf16.mxu0 %v6464_v50 }
 0xbcd   :  { %v1824_v26 = vpop.f32.mrb[72].mxu0 }
 0xbce   :  { %v1825_v15 = vadd.f32 %v1824_v26, %v1741_v37  ;;  %v3806_v40 = vpop.f32.mrb[73].mxu0 }
 0xbcf   :  { %v1827_v24 = vpop.f32.mrb[74].mxu0 }
 0xbd0   :  { %v5465_v1 = vadd.f32 %v1825_v15, %v5367_v5  ;;  %v1828_v31 = vadd.f32 %v1827_v24, %v1741_v37  ;;  %v3807_v22 = vpop.f32.mrb[75].mxu0 }
 0xbd2   :  { %v5468_v14 = vadd.f32 %v1828_v31, %v5372_v10  ;;  %v1853_v2 = vsel %vm153_vm2, %v5465_v1, 0.0 }
 0xbd3   :  { %1854 = vadd.xlane.f32.xlu1 %v1853_v2 }
 0xbd4   :  { %v1856_v52 = vsel %vm153_vm2, %v5468_v14, 0.0 }
 0xbd5   :  { %1857 = vadd.xlane.f32.xlu0 %v1856_v52  ;;  %v1832_v30 = vpop.f32.mrb[76].mxu0 }
 0xbd6   :  { %v1833_v3 = vadd.f32 %v1832_v30, %v1741_v37  ;;  %v3810_v7 = vpop.f32.mrb[77].mxu0 }
 0xbd7   :  { %v1835_v9 = vpop.f32.mrb[78].mxu0 }
 0xbd8   :  { %v5475_v5 = vadd.f32 %v1833_v3, %v5375_v28  ;;  %v1836_v39 = vadd.f32 %v1835_v9, %v1741_v37  ;;  %v3811_v25 = vpop.f32.mrb[79].mxu0 }
 0xbda   :  { %6466 = vst [vmem:[#allocation25_spill] sm:$0xff] %v5475_v5  ;;  %v5478_v10 = vadd.f32 %v1836_v39, %v5383_v48  ;;  %v1859_v61 = vsel %vm153_vm2, %v5475_v5, 0.0 }
 0xbdb   :  { %1860 = vadd.xlane.f32.xlu1 %v1859_v61 }
 0xbdc   :  { %6467 = vst [vmem:[#allocation26_spill] sm:$0xff] %v5478_v10  ;;  %v1862_v8 = vsel %vm153_vm2, %v5478_v10, 0.0 }
 0xbdd   :  { %1863 = vadd.xlane.f32.xlu0 %v1862_v8  ;;  %v1840_v38 = vpop.f32.mrb[80].mxu0 }
 0xbde   :  { %v1841_v6 = vadd.f32 %v1840_v38, %v1741_v37  ;;  %v3814_v41 = vpop.f32.mrb[81].mxu0 }
 0xbdf   :  { %v1843_v54 = vpop.f32.mrb[82].mxu0 }
 0xbe0   :  { %v5485_v28 = vadd.f32 %v1841_v6, %v5388_v27  ;;  %v3815_v18 = vpop.f32.mrb[83].mxu0 }
 0xbe2   :  { %6468 = vst [vmem:[#allocation27_spill] sm:$0xff] %v5485_v28  ;;  %v1865_v48 = vsel %vm153_vm2, %v5485_v28, 0.0 }
 0xbe3   :  { %1866 = vadd.xlane.f32.xlu1 %v1865_v48 }
 0xc60   :  { %v1855_v55 = vpop.xlane.xlu1 %1854 }
 0xc61   :  { %v1868_v62 = vmul.f32 0.03125, %v1855_v55 }
 0xc62   :  { %v1858_v34 = vpop.xlane.xlu0 %1857 }
 0xc63   :  { %v1873_v35 = vsub.f32 %v5465_v1, %v1868_v62  ;;  %v1869_v47 = vmul.f32 0.03125, %v1858_v34  ;;  %v3572_v34 = vld [vmem:[%s6350_s9 + $0x4] sm:$0xf] }
 0xc65   :  { %v1874_v27 = vsub.f32 %v5468_v14, %v1869_v47  ;;  %v1878_v0 = vmul.f32 %v1873_v35, %v1873_v35 }
 0xc67   :  { %v1883_v11 = vsel %vm153_vm2, %v1878_v0, 0.0  ;;  %v1879_v19 = vmul.f32 %v1874_v27, %v1874_v27 }
 0xc68   :  { %1884 = vadd.xlane.f32.xlu0 %v1883_v11  ;;  %v1861_v46 = vpop.xlane.xlu1 %1860 }
 0xc69   :  { %v1870_v57 = vmul.f32 0.03125, %v1861_v46  ;;  %v1886_v60 = vsel %vm153_vm2, %v1879_v19, 0.0 }
 0xc6a   :  { %v1864_v4 = vpop.xlane.xlu0 %1863  ;;  %1887 = vadd.xlane.f32.xlu1 %v1886_v60 }
 0xc6b   :  { %v1875_v45 = vsub.f32 %v5475_v5, %v1870_v57  ;;  %v1871_v56 = vmul.f32 0.03125, %v1864_v4 }
 0xc6d   :  { %v1876_v43 = vsub.f32 %v5478_v10, %v1871_v56  ;;  %v1880_v13 = vmul.f32 %v1875_v45, %v1875_v45 }
 0xc6f   :  { %v1889_v63 = vsel %vm153_vm2, %v1880_v13, 0.0  ;;  %v1881_v20 = vmul.f32 %v1876_v43, %v1876_v43 }
 0xc70   :  { %1890 = vadd.xlane.f32.xlu0 %v1889_v63  ;;  %v1867_v59 = vpop.xlane.xlu1 %1866 }
 0xc71   :  { %v1872_v58 = vmul.f32 0.03125, %v1867_v59  ;;  %v1892_v42 = vsel %vm153_vm2, %v1881_v20, 0.0 }
 0xc72   :  { %1893 = vadd.xlane.f32.xlu1 %v1892_v42 }
 0xc73   :  { %v1877_v44 = vsub.f32 %v5485_v28, %v1872_v58 }
 0xc75   :  { %v1882_v17 = vmul.f32 %v1877_v44, %v1877_v44 }
 0xc77   :  { %v1895_v23 = vsel %vm153_vm2, %v1882_v17, 0.0 }
 0xc78   :  { %1896 = vadd.xlane.f32.xlu0 %v1895_v23 }
 0xcf5   :  { %v1885_v29 = vpop.xlane.xlu0 %1884 }
 0xcf6   :  { %v1898_v36 = vmul.f32 0.03125, %v1885_v29 }
 0xcf7   :  { %v1888_v37 = vpop.xlane.xlu1 %1887 }
 0xcf8   :  { %v1903_v26 = vadd.f32 1e-06, %v1898_v36  ;;  %v1899_v15 = vmul.f32 0.03125, %v1888_v37 }
 0xcfa   :  { %4171 = vrsqrt.f32 %v1903_v26  ;;  %v1904_v40 = vadd.f32 1e-06, %v1899_v15 }
 0xcfc   :  { %4173 = vrsqrt.f32 %v1904_v40 }
 0xcfd   :  { %v1891_v24 = vpop.xlane.xlu0 %1890 }
 0xcfe   :  { %v1900_v31 = vmul.f32 0.03125, %v1891_v24 }
 0xcff   :  { %v1894_v22 = vpop.xlane.xlu1 %1893 }
 0xd00   :  { %v1905_v2 = vadd.f32 1e-06, %v1900_v31  ;;  %v1901_v52 = vmul.f32 0.03125, %v1894_v22 }
 0xd02   :  { %4175 = vrsqrt.f32 %v1905_v2  ;;  %v1906_v30 = vadd.f32 1e-06, %v1901_v52 }
 0xd04   :  { %v4172_v3 = vpop.eup %4171  ;;  %4177 = vrsqrt.f32 %v1906_v30 }
 0xd05   :  { %v1897_v7 = vpop.xlane.xlu0 %1896  ;;  %v1913_v25 = vmul.f32 %v4172_v3, %v1873_v35  ;;  %v6469_v35 = vld [vmem:[#allocation3_spill] sm:$0xff] }
 0xd06   :  { %v4174_v9 = vpop.eup %4173  ;;  %v1902_v39 = vmul.f32 0.03125, %v1897_v7  ;;  %v1929_v47 = vrot.slane %v3572_v34, %v6469_v35 }
 0xd07   :  { %v1914_v61 = vmul.f32 %v4174_v9, %v1874_v27 }
 0xd08   :  { %v1907_v8 = vadd.f32 1e-06, %v1902_v39 }
 0xd09   :  { %v1918_v38 = vpack.c.bf16 %v1914_v61, %v1913_v25 }
 0xd0a   :  { %4179 = vrsqrt.f32 %v1907_v8 }
 0xd0b   :  { %3821 = vmatmul.mubr.msk.bf16.vlgmr.msra.gmra.mrb[64].mxu1 %vm153_vm2, %v1918_v38 }
 0xd0c   :  { %v4176_v6 = vpop.eup %4175  ;;  %3824 = vmatprep.mubr.msk.bf16.mxu1 %vm4334_vm0, %v6465_v33 }
 0xd0d   :  { %v1915_v54 = vmul.f32 %v4176_v6, %v1875_v45 }
 0xd0e   :  { %v4178_v41 = vpop.eup %4177 }
 0xd0f   :  { %v1916_v18 = vmul.f32 %v4178_v41, %v1876_v43 }
 0xd11   :  { %v1919_v48 = vpack.c.bf16 %v1916_v18, %v1915_v54 }
 0xd13   :  { %3825 = vmatmul.mubr.msk.bf16.gmra.mrb[68].mxu1 %vm153_vm2, %v1919_v48 }
 0xd14   :  { %v4180_v21 = vpop.eup %4179  ;;  %3828 = vmatprep.mubr.msk.bf16.mxu1 %vm4334_vm0, %v6465_v33 }
 0xd15   :  { %v1917_v55 = vmul.f32 %v4180_v21, %v1877_v44 }
 0xd17   :  { %v1920_v62 = vpack.c.bf16 %v1917_v55, %v1917_v55 }
 0xd1b   :  { %3829 = vmatmul.mubr.msk.bf16.gmra.mrb[72].mxu1 %vm153_vm2, %v1920_v62 }
 0xdde   :  { %v1985_v27 = vpop.f32.mrb[64].mxu1 }
 0xddf   :  { %v1986_v0 = vadd.f32 %v1985_v27, %v1929_v47  ;;  %v3822_v11 = vpop.f32.mrb[65].mxu1 }
 0xde0   :  { %v1988_v19 = vpop.f32.mrb[66].mxu1 }
 0xde1   :  { %v1989_v46 = vadd.f32 %v1988_v19, %v1929_v47  ;;  %2012 = vrot.lane.b32.xlu1 %v1986_v0, %s4335_s23  ;;  %v3823_v57 = vpop.f32.mrb[67].mxu1 }
 0xde3   :  { %v3971_v60 = vpack.i.bf16 %v1989_v46, %v1986_v0  ;;  %v5519_v4 = vpack.c.bf16 %v1989_v46, %v1986_v0 }
 0xde6   :  { %v1993_v45 = vpop.f32.mrb[68].mxu1 }
 0xde7   :  { %v1994_v56 = vadd.f32 %v1993_v45, %v1929_v47  ;;  %v3826_v43 = vpop.f32.mrb[69].mxu1 }
 0xde8   :  { %v1996_v13 = vpop.f32.mrb[70].mxu1 }
 0xde9   :  { %v1997_v63 = vadd.f32 %v1996_v13, %v1929_v47  ;;  %v3827_v20 = vpop.f32.mrb[71].mxu1  ;;  %v3961_v59 = vpack.i.bf16 %v1994_v56, %v1989_v46 }
 0xdeb   :  { %3962 = vrot.lane.b32.xlu0 %v3961_v59, %s4335_s23  ;;  %v3976_v58 = vpack.i.bf16 %v1997_v63, %v1994_v56  ;;  %v5522_v42 = vpack.c.bf16 %v1997_v63, %v1994_v56 }
 0xdee   :  { %v2001_v44 = vpop.f32.mrb[72].mxu1 }
 0xdef   :  { %v2002_v17 = vadd.f32 %v2001_v44, %v1929_v47  ;;  %3977 = vrot.lane.b32.xlu0 %v3976_v58, %s4336_s24  ;;  %v3830_v23 = vpop.f32.mrb[73].mxu1 }
 0xdf0   :  { %v2004_v49 = vpop.f32.mrb[74].mxu1 }
 0xdf1   :  { %v3831_v29 = vpop.f32.mrb[75].mxu1  ;;  %v3966_v36 = vpack.i.bf16 %v2002_v17, %v1997_v63 }
 0xdf3   :  { %2042 = vrot.lane.b32.xlu0 %v1986_v0, %s4337_s25  ;;  %3967 = vrot.lane.b32.xlu1 %v3966_v36, %s4335_s23 }
 0xdf7   :  { %3982 = vrot.lane.b32.xlu0 %v3961_v59, %s4337_s25  ;;  %3972 = vrot.lane.b32.xlu1 %v3971_v60, %s4336_s24 }
 0xdfb   :  { %3987 = vrot.lane.b32.xlu0 %v3966_v36, %s4337_s25  ;;  %2035 = vrot.lane.b32.xlu1 %v2002_v17, %s4336_s24 }
 0xdff   :  { %2077 = vrot.lane.b32.xlu1 %v5519_v4, %s4339_s26 }
 0xe03   :  { %2079 = vrot.lane.b32.xlu1 %v5522_v42, %s4339_s26 }
 0xe53   :  { %v2013_v37 = vpop.permute.xlu1 %2012 }
 0xe54   :  { %v5535_v26 = vpack.c.bf16 %v2013_v37, %v2002_v17 }
 0xe56   :  { %2081 = vrot.lane.b32.xlu1 %v5535_v26, %s4339_s26 }
 0xe5d   :  { %v3963_v15 = vpop.permute.xlu0 %3962 }
 0xe5e   :  { %v3965_v40 = vunpack.i.h.bf16 %v3963_v15  ;;  %v3964_v24 = vunpack.i.l.bf16 %v3963_v15 }
 0xe60   :  { %v5539_v31 = vpack.c.bf16 %v3965_v40, %v3964_v24 }
 0xe61   :  { %v3978_v22 = vpop.permute.xlu0 %3977 }
 0xe62   :  { %2083 = vrot.lane.b32.xlu0 %v5539_v31, %s4339_s26  ;;  %v3980_v7 = vunpack.i.h.bf16 %v3978_v22  ;;  %v3979_v9 = vunpack.i.l.bf16 %v3978_v22 }
 0xe64   :  { %v5547_v6 = vpack.c.bf16 %v3980_v7, %v3979_v9 }
 0xe65   :  { %v2043_v2 = vpop.permute.xlu0 %2042  ;;  %v3968_v52 = vpop.permute.xlu1 %3967 }
 0xe66   :  { %v3970_v30 = vunpack.i.h.bf16 %v3968_v52  ;;  %v3969_v3 = vunpack.i.l.bf16 %v3968_v52 }
 0xe68   :  { %v5543_v39 = vpack.c.bf16 %v3970_v30, %v3969_v3  ;;  %v6471_v30 = vld [vmem:[#allocation24_spill] sm:$0xff] }
 0xe69   :  { %v3983_v25 = vpop.permute.xlu0 %3982  ;;  %v3973_v61 = vpop.permute.xlu1 %3972 }
 0xe6a   :  { %v3975_v8 = vunpack.i.h.bf16 %v3973_v61  ;;  %v3974_v38 = vunpack.i.l.bf16 %v3973_v61  ;;  %2085 = vrot.lane.b32.xlu1 %v5543_v39, %s4339_s26  ;;  %v3985_v41 = vunpack.i.h.bf16 %v3983_v25  ;;  %v3984_v54 = vunpack.i.l.bf16 %v3983_v25 }
 0xe6c   :  { %v5549_v18 = vpack.c.bf16 %v3975_v8, %v3974_v38  ;;  %v5555_v55 = vpack.c.bf16 %v3985_v41, %v3984_v54 }
 0xe6d   :  { %v3988_v48 = vpop.permute.xlu0 %3987  ;;  %v2036_v21 = vpop.permute.xlu1 %2035 }
 0xe6e   :  { %2087 = vrot.lane.b32.xlu0 %v5549_v18, %s4339_s26  ;;  %2089 = vrot.lane.b32.xlu1 %v5547_v6, %s4339_s26  ;;  %v3990_v62 = vunpack.i.h.bf16 %v3988_v48  ;;  %v3989_v34 = vunpack.i.l.bf16 %v3988_v48  ;;  %v5557_v47 = vpack.c.bf16 %v2043_v2, %v2036_v21  ;;  %v6486_v48 = vld [vmem:[#allocation11_spill] sm:$0xff] }
 0xe70   :  { %v5564_v11 = vpack.c.bf16 %v3990_v62, %v3989_v34 }
 0xe71   :  { %v2078_v27 = vpop.permute.xlu1 %2077 }
 0xe72   :  { %v2128_v0 = vsel %vm398_vm3, %v2078_v27, 0  ;;  %2091 = vrot.lane.b32.xlu0 %v5557_v47, %s4339_s26  ;;  %2093 = vrot.lane.b32.xlu1 %v5555_v55, %s4339_s26 }
 0xe73   :  { %2158 = vmatpush1.bf16.xpose.msra.mxu0 %v2128_v0 }
 0xe74   :  { %2159 = vmatprep.subr.bf16.mxu0 %v6464_v50 }
 0xe75   :  { %v2080_v19 = vpop.permute.xlu1 %2079 }
 0xe76   :  { %2095 = vrot.lane.b32.xlu0 %v5564_v11, %s4339_s26  ;;  %2692 = vrot.lane.b32.xlu1 %v5522_v42, %s4340_s30  ;;  %v2131_v46 = vsel %vm398_vm3, %v2080_v19, 0 }
 0xe7a   :  { %2690 = vrot.lane.b32.xlu0 %v5519_v4, %s4340_s30  ;;  %2694 = vrot.lane.b32.xlu1 %v5535_v26, %s4340_s30 }
 0xe7b   :  { %2160 = vmatpush1.bf16.xpose.msra.mxu0 %v2131_v46 }
 0xe7c   :  { %2161 = vmatprep.subr.bf16.mxu0 %v6464_v50 }
 0xe7e   :  { %2696 = vrot.lane.b32.xlu0 %v5539_v31, %s4340_s30  ;;  %2698 = vrot.lane.b32.xlu1 %v5543_v39, %s4340_s30 }
 0xe82   :  { %2700 = vrot.lane.b32.xlu0 %v5549_v18, %s4340_s30 }
 0xec8   :  { %v2082_v57 = vpop.permute.xlu1 %2081 }
 0xec9   :  { %v2134_v60 = vsel %vm398_vm3, %v2082_v57, 0 }
 0xeca   :  { %2162 = vmatpush1.bf16.xpose.msra.mxu0 %v2134_v60 }
 0xecb   :  { %2163 = vmatprep.subr.bf16.mxu0 %v6464_v50 }
 0xed4   :  { %v2084_v45 = vpop.permute.xlu0 %2083 }
 0xed5   :  { %v2137_v56 = vsel %vm398_vm3, %v2084_v45, 0 }
 0xed6   :  { %2164 = vmatpush1.bf16.xpose.msra.mxu0 %v2137_v56 }
 0xed7   :  { %2165 = vmatprep.subr.bf16.mxu0 %v6464_v50 }
 0xedc   :  { %v2086_v43 = vpop.permute.xlu1 %2085 }
 0xedd   :  { %v2140_v13 = vsel %vm398_vm3, %v2086_v43, 0 }
 0xede   :  { %2166 = vmatpush1.bf16.xpose.msra.mxu0 %v2140_v13 }
 0xedf   :  { %2167 = vmatprep.subr.bf16.mxu0 %v6464_v50 }
 0xee0   :  { %v2088_v63 = vpop.permute.xlu0 %2087  ;;  %v2090_v20 = vpop.permute.xlu1 %2089 }
 0xee1   :  { %v2143_v58 = vsel %vm398_vm3, %v2088_v63, 0  ;;  %v2146_v49 = vsel %vm398_vm3, %v2090_v20, 0  ;;  %v6475_v63 = vld [vmem:[#allocation7_spill] sm:$0xff] }
 0xee4   :  { %v2092_v59 = vpop.permute.xlu0 %2091  ;;  %v2094_v44 = vpop.permute.xlu1 %2093 }
 0xee5   :  { %v2149_v37 = vsel %vm398_vm3, %v2092_v59, 0  ;;  %v2152_v24 = vsel %vm398_vm3, %v2094_v44, 0 }
 0xee6   :  { %2168 = vmatpush1.bf16.xpose.msra.mxu0 %v2143_v58 }
 0xee7   :  { %2169 = vmatprep.subr.bf16.mxu0 %v6464_v50 }
 0xee8   :  { %v2096_v17 = vpop.permute.xlu0 %2095  ;;  %v2693_v29 = vpop.permute.xlu1 %2692 }
 0xee9   :  { %v2155_v2 = vsel %vm398_vm3, %v2096_v17, 0 }
 0xeec   :  { %v2691_v23 = vpop.permute.xlu0 %2690  ;;  %v2695_v36 = vpop.permute.xlu1 %2694 }
 0xeed   :  { %3908 = vmatpush1.bf16.msra.mxu1 %v2691_v23 }
 0xeee   :  { %2170 = vmatpush1.bf16.xpose.msra.mxu0 %v2146_v49  ;;  %3899 = vmatprep.subr.bf16.mxu1 %v6464_v50  ;;  %v6477_v49 = vld [vmem:[#allocation10_spill] sm:$0xff] }
 0xeef   :  { %2171 = vmatprep.subr.bf16.mxu0 %v6464_v50 }
 0xef0   :  { %v2697_v15 = vpop.permute.xlu0 %2696  ;;  %v2699_v40 = vpop.permute.xlu1 %2698 }
 0xef1   :  { %3909 = vmatpush1.bf16.msra.mxu1 %v2693_v29 }
 0xef2   :  { %3900 = vmatprep.subr.bf16.mxu1 %v6464_v50 }
 0xef4   :  { %v2701_v22 = vpop.permute.xlu0 %2700 }
 0xef5   :  { %3910 = vmatpush1.bf16.msra.mxu1 %v2695_v36 }
 0xef6   :  { %2172 = vmatpush1.bf16.xpose.msra.mxu0 %v2149_v37  ;;  %3901 = vmatprep.subr.bf16.mxu1 %v6464_v50 }
 0xef7   :  { %2173 = vmatprep.subr.bf16.mxu0 %v6464_v50 }
 0xef9   :  { %3911 = vmatpush1.bf16.msra.mxu1 %v2697_v15 }
 0xefa   :  { %3902 = vmatprep.subr.bf16.mxu1 %v6464_v50 }
 0xefd   :  { %3912 = vmatpush1.bf16.msra.mxu1 %v2699_v40 }
 0xefe   :  { %2174 = vmatpush1.bf16.xpose.msra.mxu0 %v2152_v24  ;;  %3903 = vmatprep.subr.bf16.mxu1 %v6464_v50 }
 0xeff   :  { %2175 = vmatprep.subr.bf16.mxu0 %v6464_v50 }
 0xf01   :  { %3913 = vmatpush1.bf16.msra.mxu1 %v2701_v22 }
 0xf02   :  { %3904 = vmatprep.subr.bf16.mxu1 %v6464_v50 }
 0xf06   :  { %2176 = vmatpush1.bf16.xpose.msra.mxu0 %v2155_v2 }
 0xf07   :  { %2750 = vmatprep.subr.bf16.mxu0 %v6464_v50 }
 0xf0d   :  { %3582 = vmatmul.mubr.msk.bf16.vlgmr.msra.gmra.mrb[84].mxu0 %vm398_vm3, %v5519_v4 }
 0xf0e   :  { %2751 = vmatpush1.bf16.msra.mxu0 %v2691_v23  ;;  %2199 = vmatprep.mubr.bf16.mxu0 %v6464_v50 }
 0xf0f   :  { %2752 = vmatprep.subr.bf16.mxu0 %v6464_v50 }
 0xf12   :  { %2753 = vmatpush1.bf16.msra.mxu0 %v2693_v29 }
 0xf13   :  { %2754 = vmatprep.subr.bf16.mxu0 %v6464_v50 }
 0xf15   :  { %3583 = vmatmul.mubr.msk.bf16.gmra.mrb[88].mxu0 %vm398_vm3, %v5522_v42 }
 0xf16   :  { %2755 = vmatpush1.bf16.msra.mxu0 %v2695_v36  ;;  %2209 = vmatprep.mubr.bf16.mxu0 %v6464_v50 }
 0xf17   :  { %2756 = vmatprep.subr.bf16.mxu0 %v6464_v50 }
 0xf1a   :  { %2757 = vmatpush1.bf16.msra.mxu0 %v2697_v15 }
 0xf1b   :  { %2758 = vmatprep.subr.bf16.mxu0 %v6464_v50 }
 0xf1d   :  { %3584 = vmatmul.mubr.msk.bf16.gmra.mrb[92].mxu0 %vm398_vm3, %v5535_v26 }
 0xf1e   :  { %2759 = vmatpush1.bf16.msra.mxu0 %v2699_v40  ;;  %2219 = vmatprep.mubr.bf16.mxu0 %v6464_v50 }
 0xf1f   :  { %2760 = vmatprep.subr.bf16.mxu0 %v6464_v50 }
 0xf22   :  { %2761 = vmatpush1.bf16.msra.mxu0 %v2701_v22  ;;  %v6480_v22 = vld [vmem:[#allocation9_spill] sm:$0xff] }
 0xf23   :  { %2762 = vmatprep.subr.bf16.mxu0 %v6464_v50 }
 0xf25   :  { %3585 = vmatmul.mubr.msk.bf16.gmra.mrb[96].mxu0 %vm398_vm3, %v5539_v31 }
 0xf26   :  { %2229 = vmatprep.mubr.bf16.mxu0 %v6464_v50 }
 0xf2d   :  { %3586 = vmatmul.mubr.msk.bf16.gmra.mrb[100].mxu0 %vm398_vm3, %v5543_v39 }
 0xf2e   :  { %2239 = vmatprep.mubr.bf16.mxu0 %v6464_v50 }
 0xf35   :  { %3587 = vmatmul.mubr.msk.bf16.gmra.mrb[104].mxu0 %vm398_vm3, %v5549_v18 }
 0xf36   :  { %2249 = vmatprep.mubr.bf16.mxu0 %v6464_v50 }
 0xf3d   :  { %3588 = vmatmul.mubr.msk.bf16.gmra.mrb[108].mxu0 %vm398_vm3, %v5547_v6 }
 0xf3e   :  { %2259 = vmatprep.mubr.bf16.mxu0 %v6464_v50 }
 0xf45   :  { %3589 = vmatmul.mubr.msk.bf16.gmra.mrb[112].mxu0 %vm398_vm3, %v5557_v47 }
 0xf46   :  { %2269 = vmatprep.mubr.bf16.mxu0 %v6464_v50 }
 0xf4d   :  { %3590 = vmatmul.mubr.msk.bf16.gmra.mrb[116].mxu0 %vm398_vm3, %v5555_v55 }
 0xf4e   :  { %2279 = vmatprep.mubr.bf16.mxu0 %v6464_v50 }
 0xf55   :  { %3591 = vmatmul.mubr.msk.bf16.gmra.mrb[120].mxu0 %vm398_vm3, %v5564_v11 }
 0xfe0   :  { %v2191_v4 = vpop.f32.mrb[84].mxu0 }
 0xfe1   :  { %v2193_v42 = vpop.f32.mrb[85].mxu0  ;;  %v5648_v3 = vsel %vm681_vm5, %v2191_v4, -1e+30  ;;  %vm6478_vm5 = vcmp.eq.s32.totalorder %v6477_v49, %v4730_v51 }
 0xfe2   :  { %v5643_v31 = vsel %vm682_vm4, %v2193_v42, -1e+30  ;;  %v2195_v52 = vpop.f32.mrb[86].mxu0  ;;  %vm6476_vm4 = vcmp.eq.s32.totalorder %v6475_v63, %v6471_v30 }
 0xfe3   :  { %v2330_v7 = vsel %vm153_vm2, %v5643_v31, -inf  ;;  %v2197_v9 = vpop.f32.mrb[87].mxu0  ;;  %v5661_v8 = vsel %vm683_vm7, %v2195_v52, -1e+30  ;;  %vm6481_vm7 = vcmp.eq.s32.totalorder %v6480_v22, %v4730_v51 }
 0xfe4   :  { %v2331_v39 = vmax.f32 %v5648_v3, %v2330_v7  ;;  %v5656_v61 = vsel %vm684_vm6, %v2197_v9, -1e+30  ;;  %vm6479_vm6 = vcmp.eq.s32.totalorder %v6477_v49, %v6471_v30  ;;  %v6483_v9 = vld [vmem:[#allocation12_spill] sm:$0xff] }
 0xfe5   :  { %v2334_v38 = vsel %vm153_vm2, %v5656_v61, -inf }
 0xfe6   :  { %v2335_v41 = vmax.f32 %v5661_v8, %v2334_v38  ;;  %2332 = vmax.xlane.f32.xlu0 %v2331_v39 }
 0xfe8   :  { %2336 = vmax.xlane.f32.xlu1 %v2335_v41  ;;  %v2201_v54 = vpop.f32.mrb[88].mxu0 }
 0xfe9   :  { %v2203_v18 = vpop.f32.mrb[89].mxu0  ;;  %v5674_v34 = vsel %vm685_vm9, %v2201_v54, -1e+30  ;;  %vm6484_vm9 = vcmp.eq.s32.totalorder %v6483_v9, %v4730_v51 }
 0xfea   :  { %v5669_v21 = vsel %vm686_vm8, %v2203_v18, -1e+30  ;;  %v2205_v62 = vpop.f32.mrb[90].mxu0  ;;  %vm6482_vm8 = vcmp.eq.s32.totalorder %v6480_v22, %v6471_v30 }
 0xfeb   :  { %v2338_v27 = vsel %vm153_vm2, %v5669_v21, -inf  ;;  %v2207_v0 = vpop.f32.mrb[91].mxu0  ;;  %v5687_v60 = vsel %vm687_vm11, %v2205_v62, -1e+30  ;;  %vm6487_vm11 = vcmp.eq.s32.totalorder %v6486_v48, %v4730_v51 }
 0xfec   :  { %v2339_v19 = vmax.f32 %v5674_v34, %v2338_v27  ;;  %v5682_v57 = vsel %vm688_vm10, %v2207_v0, -1e+30  ;;  %vm6485_vm10 = vcmp.eq.s32.totalorder %v6483_v9, %v6471_v30 }
 0xfed   :  { %v2342_v45 = vsel %vm153_vm2, %v5682_v57, -inf }
 0xfee   :  { %v2343_v56 = vmax.f32 %v5687_v60, %v2342_v45  ;;  %2340 = vmax.xlane.f32.xlu1 %v2339_v19 }
 0xff0   :  { %2344 = vmax.xlane.f32.xlu0 %v2343_v56  ;;  %v2211_v43 = vpop.f32.mrb[92].mxu0 }
 0xff1   :  { %v2213_v13 = vpop.f32.mrb[93].mxu0  ;;  %v5700_v58 = vsel %vm6476_vm4, %v2211_v43, -1e+30 }
 0xff2   :  { %v5695_v20 = vsel %vm690_vm12, %v2213_v13, -1e+30  ;;  %v2215_v59 = vpop.f32.mrb[94].mxu0  ;;  %vm6488_vm12 = vcmp.eq.s32.totalorder %v6486_v48, %v6471_v30  ;;  %v6489_v13 = vld [vmem:[#allocation13_spill] sm:$0xff] }
 0xff3   :  { %v2346_v44 = vsel %vm153_vm2, %v5695_v20, -inf  ;;  %v2217_v17 = vpop.f32.mrb[95].mxu0  ;;  %v5713_v36 = vsel %vm6479_vm6, %v2215_v59, -1e+30  ;;  %vm6490_vm4 = vcmp.eq.s32.totalorder %v6489_v13, %v4730_v51 }
 0xff4   :  { %v2347_v23 = vmax.f32 %v5700_v58, %v2346_v44  ;;  %v5708_v29 = vsel %vm6478_vm5, %v2217_v17, -1e+30  ;;  %vm6491_vm5 = vcmp.eq.s32.totalorder %v6489_v13, %v6471_v30  ;;  %v6498_v13 = vld [vmem:[#allocation19_spill] sm:$0xff] }
 0xff5   :  { %v2350_v37 = vsel %vm153_vm2, %v5708_v29, -inf }
 0xff6   :  { %v2351_v15 = vmax.f32 %v5713_v36, %v2350_v37  ;;  %2348 = vmax.xlane.f32.xlu0 %v2347_v23 }
 0xff8   :  { %2352 = vmax.xlane.f32.xlu1 %v2351_v15  ;;  %v2221_v40 = vpop.f32.mrb[96].mxu0 }
 0xff9   :  { %v2223_v24 = vpop.f32.mrb[97].mxu0  ;;  %v5726_v42 = vsel %vm6482_vm8, %v2221_v40, -1e+30  ;;  %v6492_v40 = vld [vmem:[#allocation15_spill] sm:$0xff] }
 0xffa   :  { %v5721_v2 = vsel %vm6481_vm7, %v2223_v24, -1e+30  ;;  %v2225_v4 = vpop.f32.mrb[98].mxu0  ;;  %vm6493_vm6 = vcmp.eq.s32.totalorder %v6492_v40, %v4730_v51  ;;  %vm6494_vm7 = vcmp.eq.s32.totalorder %v6492_v40, %v6471_v30 }
 0xffb   :  { %v2354_v26 = vsel %vm153_vm2, %v5721_v2, -inf  ;;  %v2227_v52 = vpop.f32.mrb[99].mxu0  ;;  %v5739_v25 = vsel %vm6485_vm10, %v2225_v4, -1e+30  ;;  %vm6499_vm10 = vcmp.eq.s32.totalorder %v6498_v13, %v4730_v51 }
 0xffc   :  { %v2355_v7 = vmax.f32 %v5726_v42, %v2354_v26  ;;  %v5734_v39 = vsel %vm6484_vm9, %v2227_v52, -1e+30 }
 0xffd   :  { %v2358_v38 = vsel %vm153_vm2, %v5734_v39, -inf }
 0xffe   :  { %v2359_v41 = vmax.f32 %v5739_v25, %v2358_v38  ;;  %2356 = vmax.xlane.f32.xlu0 %v2355_v7  ;;  %v6495_v38 = vld [vmem:[#allocation17_spill] sm:$0xff] }
 0xfff   :  { %vm6496_vm8 = vcmp.eq.s32.totalorder %v6495_v38, %v4730_v51  ;;  %vm6497_vm9 = vcmp.eq.s32.totalorder %v6495_v38, %v6471_v30 }
0x1000   :  { %2360 = vmax.xlane.f32.xlu1 %v2359_v41  ;;  %v2231_v54 = vpop.f32.mrb[100].mxu0 }
0x1001   :  { %v2233_v18 = vpop.f32.mrb[101].mxu0  ;;  %v5752_v0 = vsel %vm6488_vm12, %v2231_v54, -1e+30 }
0x1002   :  { %v5747_v62 = vsel %vm6487_vm11, %v2233_v18, -1e+30  ;;  %v2235_v27 = vpop.f32.mrb[102].mxu0  ;;  %vm6500_vm11 = vcmp.eq.s32.totalorder %v6498_v13, %v6471_v30 }
0x1003   :  { %v2362_v19 = vsel %vm153_vm2, %v5747_v62, -inf  ;;  %v2237_v46 = vpop.f32.mrb[103].mxu0 }
0x1004   :  { %v2363_v45 = vmax.f32 %v5752_v0, %v2362_v19 }
0x1006   :  { %2364 = vmax.xlane.f32.xlu0 %v2363_v45 }
0x1008   :  { %v2241_v56 = vpop.f32.mrb[104].mxu0 }
0x1009   :  { %v2243_v43 = vpop.f32.mrb[105].mxu0  ;;  %v5765_v44 = vsel %vm6491_vm5, %v2241_v56, -1e+30 }
0x100a   :  { %v5760_v63 = vsel %vm6490_vm4, %v2243_v43, -1e+30  ;;  %v2245_v59 = vpop.f32.mrb[106].mxu0 }
0x100b   :  { %v2370_v17 = vsel %vm153_vm2, %v5760_v63, -inf  ;;  %v2247_v23 = vpop.f32.mrb[107].mxu0 }
0x100c   :  { %v2371_v49 = vmax.f32 %v5765_v44, %v2370_v17 }
0x100e   :  { %2372 = vmax.xlane.f32.xlu0 %v2371_v49 }
0x1010   :  { %v2251_v37 = vpop.f32.mrb[108].mxu0 }
0x1011   :  { %2702 = vrot.lane.b32.xlu1 %v5547_v6, %s4340_s30  ;;  %v2253_v15 = vpop.f32.mrb[109].mxu0  ;;  %v5780_v4 = vsel %vm6494_vm7, %v2251_v37, -1e+30 }
0x1012   :  { %v5775_v24 = vsel %vm6493_vm6, %v2253_v15, -1e+30  ;;  %v2255_v22 = vpop.f32.mrb[110].mxu0 }
0x1013   :  { %v2378_v26 = vsel %vm153_vm2, %v5775_v24, -inf  ;;  %v2257_v52 = vpop.f32.mrb[111].mxu0 }
0x1014   :  { %v2379_v7 = vmax.f32 %v5780_v4, %v2378_v26 }
0x1016   :  { %2380 = vmax.xlane.f32.xlu0 %v2379_v7 }
0x1018   :  { %v2261_v6 = vpop.f32.mrb[112].mxu0 }
0x1019   :  { %v2263_v9 = vpop.f32.mrb[113].mxu0  ;;  %v5793_v18 = vsel %vm6497_vm9, %v2261_v6, -1e+30 }
0x101a   :  { %v5788_v41 = vsel %vm6496_vm8, %v2263_v9, -1e+30  ;;  %v2265_v54 = vpop.f32.mrb[114].mxu0 }
0x101b   :  { %v2386_v48 = vsel %vm153_vm2, %v5788_v41, -inf  ;;  %v2267_v19 = vpop.f32.mrb[115].mxu0 }
0x101c   :  { %v2387_v45 = vmax.f32 %v5793_v18, %v2386_v48  ;;  %v6501_v48 = vld [vmem:[#allocation14_spill] sm:$0xff] }
0x101d   :  { %vm6502_vm12 = vcmp.eq.s32.totalorder %v6501_v48, %v4730_v51  ;;  %vm6505_vm5 = vcmp.eq.s32.totalorder %v6501_v48, %v6471_v30 }
0x101e   :  { %2388 = vmax.xlane.f32.xlu0 %v2387_v45  ;;  %v5814_v45 = vsel %vm6502_vm12, %v2237_v46, -1e+30  ;;  %v6506_v46 = vld [vmem:[#allocation18_spill] sm:$0xff] }
0x101f   :  { %vm6507_vm6 = vcmp.eq.s32.totalorder %v6506_v46, %v4730_v51  ;;  %vm6511_vm9 = vcmp.eq.s32.totalorder %v6506_v46, %v6471_v30 }
0x1020   :  { %v2271_v56 = vpop.f32.mrb[116].mxu0  ;;  %v5834_v53 = vsel %vm6507_vm6, %v2257_v52, -1e+30  ;;  %v5852_v52 = vsel %vm6511_vm9, %v2255_v22, -1e+30 }
0x1021   :  { %v2273_v43 = vpop.f32.mrb[117].mxu0  ;;  %v5806_v37 = vsel %vm6500_vm11, %v2271_v56, -1e+30  ;;  %v2366_v56 = vsel %vm153_vm2, %v5814_v45, -inf }
0x1022   :  { %v5801_v17 = vsel %vm6499_vm10, %v2273_v43, -1e+30  ;;  %v2275_v49 = vpop.f32.mrb[118].mxu0  ;;  %v6503_v43 = vld [vmem:[#allocation16_spill] sm:$0xff] }
0x1023   :  { %v2394_v15 = vsel %vm153_vm2, %v5801_v17, -inf  ;;  %v2277_v40 = vpop.f32.mrb[119].mxu0  ;;  %vm6504_vm4 = vcmp.eq.s32.totalorder %v6503_v43, %v4730_v51  ;;  %vm6508_vm7 = vcmp.eq.s32.totalorder %v6503_v43, %v6471_v30 }
0x1024   :  { %v2395_v26 = vmax.f32 %v5806_v37, %v2394_v15  ;;  %v5821_v13 = vsel %vm6504_vm4, %v2247_v23, -1e+30  ;;  %v5826_v15 = vsel %vm6505_vm5, %v2235_v27, -1e+30  ;;  %v5839_v23 = vsel %vm6508_vm7, %v2245_v59, -1e+30 }
0x1025   :  { %v2374_v16 = vsel %vm153_vm2, %v5821_v13, -inf  ;;  %v2382_v27 = vsel %vm153_vm2, %v5834_v53, -inf }
0x1026   :  { %2396 = vmax.xlane.f32.xlu0 %v2395_v26  ;;  %v2367_v26 = vmax.f32 %v5826_v15, %v2366_v56  ;;  %v2375_v48 = vmax.f32 %v5839_v23, %v2374_v16  ;;  %v6509_v56 = vld [vmem:[#allocation20_spill] sm:$0xff]  ;;  %v2383_v43 = vmax.f32 %v5852_v52, %v2382_v27  ;;  %v6512_v16 = vld [vmem:[#allocation22_spill] sm:$0xff] }
0x1027   :  { %vm6510_vm8 = vcmp.eq.s32.totalorder %v6509_v56, %v4730_v51  ;;  %vm6513_vm10 = vcmp.eq.s32.totalorder %v6509_v56, %v6471_v30 }
0x1028   :  { %v2281_v7 = vpop.f32.mrb[120].mxu0  ;;  %v5847_v35 = vsel %vm6510_vm8, %v2267_v19, -1e+30  ;;  %v5867_v19 = vsel %vm6513_vm10, %v2265_v54, -1e+30 }
0x1029   :  { %v2283_v6 = vpop.f32.mrb[121].mxu0  ;;  %v2390_v59 = vsel %vm153_vm2, %v5847_v35, -inf }
0x102a   :  { %v2285_v9 = vpop.f32.mrb[122].mxu0  ;;  %v2391_v22 = vmax.f32 %v5867_v19, %v2390_v59  ;;  %v5894_v59 = vsel %vm718_vm13, %v2283_v6, -1e+30 }
0x102b   :  { %v2287_v38 = vpop.f32.mrb[123].mxu0  ;;  %v5888_v56 = vsel %vm719_vm14, %v2285_v9, -1e+30 }
0x1035   :  { %2368 = vmax.xlane.f32.xlu1 %v2367_v26  ;;  %v5862_v26 = vsel %vm716_vm1, %v2277_v40, -1e+30  ;;  %vm6516_vm1 = vcmp.eq.s32.totalorder %v6512_v16, %v6471_v30 }
0x1036   :  { %v2398_v46 = vsel %vm153_vm2, %v5862_v26, -inf  ;;  %v5880_v40 = vsel %vm6516_vm1, %v2275_v49, -1e+30  ;;  %v2402_v49 = vsel %vm153_vm2, %v5894_v59, -inf }
0x1037   :  { %v2399_v27 = vmax.f32 %v5880_v40, %v2398_v46 }
0x1039   :  { %2376 = vmax.xlane.f32.xlu1 %v2375_v48  ;;  %v6514_v48 = vld [vmem:[#allocation23_spill] sm:$0xff] }
0x103a   :  { %vm6515_vm11 = vcmp.eq.s32.totalorder %v6514_v48, %v4730_v51 }
0x103c   :  { %2704 = vrot.lane.b32.xlu0 %v5557_v47, %s4340_s30  ;;  %v5875_v47 = vsel %vm6515_vm11, %v2287_v38, -1e+30 }
0x103d   :  { %2384 = vmax.xlane.f32.xlu1 %v2383_v43  ;;  %v2406_v54 = vsel %vm153_vm2, %v5875_v47, -inf  ;;  %v6517_v43 = vld [vmem:[#allocation21_spill] sm:$0xff] }
0x103e   :  { %v2407_v38 = vmax.f32 %v5888_v56, %v2406_v54  ;;  %vm6518_vm12 = vcmp.eq.s32.totalorder %v6517_v43, %v6471_v30 }
0x103f   :  { %v5901_v16 = vsel %vm6518_vm12, %v2281_v7, -1e+30 }
0x1041   :  { %2392 = vmax.xlane.f32.xlu1 %v2391_v22  ;;  %v2403_v22 = vmax.f32 %v5901_v16, %v2402_v49 }
0x1045   :  { %2400 = vmax.xlane.f32.xlu1 %v2399_v27 }
0x1049   :  { %2408 = vmax.xlane.f32.xlu1 %v2407_v38 }
0x105b   :  { %2404 = vmax.xlane.f32.xlu0 %v2403_v22 }
0x1073   :  { %v5906_v46 = vpop.xlane.xlu0 %2332 }
0x1075   :  { %v5904_v9 = vpop.xlane.xlu1 %2336 }
0x107b   :  { %v2341_v48 = vpop.xlane.xlu1 %2340 }
0x107c   :  { %v2414_v51 = vsub.f32 %v5674_v34, %v2341_v48  ;;  %v2415_v6 = vsub.f32 %v5669_v21, %v2341_v48 }
0x107d   :  { %v2345_v27 = vpop.xlane.xlu0 %2344 }
0x107e   :  { %v2458_v54 = vmul.f32 1.442695, %v2414_v51  ;;  %v2460_v38 = vmul.f32 1.442695, %v2415_v6  ;;  %v2416_v32 = vsub.f32 %v5687_v60, %v2345_v27  ;;  %v2417_v30 = vsub.f32 %v5682_v57, %v2345_v27 }
0x1080   :  { %4181 = vpow2.f32 %v2458_v54  ;;  %v2462_v7 = vmul.f32 1.442695, %v2416_v32  ;;  %v2464_v43 = vmul.f32 1.442695, %v2417_v30 }
0x1081   :  { %4183 = vpow2.f32 %v2460_v38 }
0x1082   :  { %4185 = vpow2.f32 %v2462_v7 }
0x1083   :  { %4187 = vpow2.f32 %v2464_v43  ;;  %v2349_v49 = vpop.xlane.xlu0 %2348 }
0x1084   :  { %v2418_v22 = vsub.f32 %v5700_v58, %v2349_v49  ;;  %v2419_v34 = vsub.f32 %v5695_v20, %v2349_v49 }
0x1085   :  { %v2353_v48 = vpop.xlane.xlu1 %2352 }
0x1086   :  { %v2466_v28 = vmul.f32 1.442695, %v2418_v22  ;;  %v2468_v21 = vmul.f32 1.442695, %v2419_v34 }
0x1088   :  { %4189 = vpow2.f32 %v2466_v28 }
0x1089   :  { %4191 = vpow2.f32 %v2468_v21 }
0x108a   :  { %v5914_v51 = vpop.eup %4181 }
0x108b   :  { %v5916_v60 = vpop.eup %4183  ;;  %v2357_v57 = vpop.xlane.xlu0 %2356 }
0x108c   :  { %v5918_v32 = vpop.eup %4185  ;;  %v2422_v6 = vsub.f32 %v5726_v42, %v2357_v57  ;;  %v2423_v27 = vsub.f32 %v5721_v2, %v2357_v57  ;;  %v2538_v58 = vsel %vm153_vm2, %v5916_v60, 0.0 }
0x108d   :  { %v5924_v20 = vpop.eup %4187  ;;  %v2361_v54 = vpop.xlane.xlu1 %2360  ;;  %v2539_v28 = vadd.f32 %v5914_v51, %v2538_v58 }
0x108e   :  { %v2474_v38 = vmul.f32 1.442695, %v2422_v6  ;;  %v2476_v30 = vmul.f32 1.442695, %v2423_v27  ;;  %v2542_v7 = vsel %vm153_vm2, %v5924_v20, 0.0 }
0x108f   :  { %2540 = vadd.xlane.f32.xlu0 %v2539_v28  ;;  %v2543_v43 = vadd.f32 %v5918_v32, %v2542_v7 }
0x1090   :  { %4193 = vpow2.f32 %v2474_v38 }
0x1091   :  { %4195 = vpow2.f32 %v2476_v30  ;;  %v2703_v42 = vpop.permute.xlu1 %2702  ;;  %2544 = vadd.xlane.f32.xlu1 %v2543_v43 }
0x1092   :  { %v5930_v2 = vpop.eup %4189  ;;  %2763 = vmatpush1.bf16.msra.mxu0 %v2703_v42  ;;  %3914 = vmatpush1.bf16.msra.mxu1 %v2703_v42 }
0x1093   :  { %v5932_v49 = vpop.eup %4191  ;;  %v2365_v22 = vpop.xlane.xlu0 %2364  ;;  %2764 = vmatprep.subr.bf16.mxu0 %v6464_v50  ;;  %3905 = vmatprep.subr.bf16.mxu1 %v6464_v50 }
0x1094   :  { %v2426_v34 = vsub.f32 %v5752_v0, %v2365_v22  ;;  %v2427_v21 = vsub.f32 %v5747_v62, %v2365_v22  ;;  %v2546_v57 = vsel %vm153_vm2, %v5932_v49, 0.0 }
0x1095   :  { %v2547_v6 = vadd.f32 %v5930_v2, %v2546_v57 }
0x1096   :  { %v2482_v27 = vmul.f32 1.442695, %v2426_v34  ;;  %v2484_v58 = vmul.f32 1.442695, %v2427_v21  ;;  %v2421_v21 = vsub.f32 %v5708_v29, %v2353_v48  ;;  %v2410_v29 = vsub.f32 %v5648_v3, %v5906_v46 }
0x1097   :  { %2548 = vadd.xlane.f32.xlu0 %v2547_v6  ;;  %v2420_v6 = vsub.f32 %v5713_v36, %v2353_v48 }
0x1098   :  { %4197 = vpow2.f32 %v2482_v27  ;;  %v2472_v27 = vmul.f32 1.442695, %v2421_v21 }
0x1099   :  { %4199 = vpow2.f32 %v2484_v58  ;;  %v2425_v58 = vsub.f32 %v5734_v39, %v2361_v54  ;;  %v2413_v39 = vsub.f32 %v5656_v61, %v5904_v9 }
0x109a   :  { %v5941_v28 = vpop.eup %4193  ;;  %4201 = vpow2.f32 %v2472_v27 }
0x109b   :  { %v5943_v38 = vpop.eup %4195  ;;  %v2373_v22 = vpop.xlane.xlu0 %2372  ;;  %v2456_v3 = vmul.f32 1.442695, %v2413_v39 }
0x109c   :  { %v2554_v0 = vsel %vm153_vm2, %v5943_v38, 0.0  ;;  %v2431_v61 = vsub.f32 %v5760_v63, %v2373_v22 }
0x109d   :  { %v2555_v62 = vadd.f32 %v5941_v28, %v2554_v0 }
0x109e   :  { %v2492_v63 = vmul.f32 1.442695, %v2431_v61 }
0x109f   :  { %2556 = vadd.xlane.f32.xlu0 %v2555_v62  ;;  %v2424_v62 = vsub.f32 %v5739_v25, %v2361_v54  ;;  %v2412_v25 = vsub.f32 %v5661_v8, %v5904_v9  ;;  %v2430_v9 = vsub.f32 %v5765_v44, %v2373_v22 }
0x10a1   :  { %v2478_v5 = vmul.f32 1.442695, %v2424_v62 }
0x10a2   :  { %v5948_v30 = vpop.eup %4197  ;;  %2706 = vrot.lane.b32.xlu1 %v5555_v55, %s4340_s30  ;;  %v2470_v55 = vmul.f32 1.442695, %v2420_v6 }
0x10a3   :  { %v5950_v7 = vpop.eup %4199  ;;  %v2381_v34 = vpop.xlane.xlu0 %2380 }
0x10a4   :  { %v2562_v43 = vsel %vm153_vm2, %v5950_v7, 0.0  ;;  %4203 = vpow2.f32 %v2470_v55  ;;  %v2435_v54 = vsub.f32 %v5775_v24, %v2381_v34  ;;  %v2434_v27 = vsub.f32 %v5780_v4, %v2381_v34 }
0x10a5   :  { %v2563_v42 = vadd.f32 %v5948_v30, %v2562_v43  ;;  %v2411_v43 = vsub.f32 %v5643_v31, %v5906_v46  ;;  %v2450_v31 = vmul.f32 1.442695, %v2410_v29  ;;  %v2454_v46 = vmul.f32 1.442695, %v2412_v25 }
0x10a6   :  { %v2498_v4 = vmul.f32 1.442695, %v2434_v27 }
0x10a7   :  { %2564 = vadd.xlane.f32.xlu0 %v2563_v42  ;;  %v2480_v42 = vmul.f32 1.442695, %v2425_v58  ;;  %v2452_v36 = vmul.f32 1.442695, %v2411_v43  ;;  %v2500_v43 = vmul.f32 1.442695, %v2435_v54 }
0x10a9   :  { %4205 = vpow2.f32 %v2480_v42 }
0x10aa   :  { %4207 = vpow2.f32 %v2478_v5 }
0x10ab   :  { %v5958_v57 = vpop.xlane.xlu0 %2388  ;;  %4209 = vpow2.f32 %v2452_v36 }
0x10ac   :  { %4211 = vpow2.f32 %v2450_v31  ;;  %v2439_v61 = vsub.f32 %v5788_v41, %v5958_v57 }
0x10ad   :  { %4213 = vpow2.f32 %v2456_v3 }
0x10ae   :  { %4215 = vpow2.f32 %v2454_v46  ;;  %v2508_v27 = vmul.f32 1.442695, %v2439_v61 }
0x10b3   :  { %v5962_v0 = vpop.xlane.xlu0 %2396 }
0x10b7   :  { %v2705_v10 = vpop.permute.xlu0 %2704 }
0x10b8   :  { %2765 = vmatpush1.bf16.msra.mxu0 %v2705_v10  ;;  %3915 = vmatpush1.bf16.msra.mxu1 %v2705_v10  ;;  %v5977_v10 = vpop.eup %4201 }
0x10b9   :  { %2766 = vmatprep.subr.bf16.mxu0 %v6464_v50  ;;  %3906 = vmatprep.subr.bf16.mxu1 %v6464_v50  ;;  %v5980_v48 = vpop.eup %4203  ;;  %v2550_v5 = vsel %vm153_vm2, %v5977_v10, 0.0 }
0x10ba   :  { %v5985_v8 = vpop.eup %4205  ;;  %v2551_v24 = vadd.f32 %v5980_v48, %v2550_v5 }
0x10bb   :  { %v5992_v62 = vpop.eup %4207  ;;  %v2558_v29 = vsel %vm153_vm2, %v5985_v8, 0.0 }
0x10bc   :  { %v5996_v44 = vpop.eup %4209  ;;  %v2559_v36 = vadd.f32 %v5992_v62, %v2558_v29 }
0x10bd   :  { %2708 = vrot.lane.b32.xlu0 %v5564_v11, %s4340_s30  ;;  %v6001_v39 = vpop.eup %4211  ;;  %v2530_v25 = vsel %vm153_vm2, %v5996_v44, 0.0 }
0x10be   :  { %v6005_v3 = vpop.eup %4213 }
0x10bf   :  { %v6012_v5 = vpop.eup %4215 }
0x10c2   :  { %v2369_v21 = vpop.xlane.xlu1 %2368 }
0x10c3   :  { %v2428_v11 = vsub.f32 %v5826_v15, %v2369_v21  ;;  %v2429_v6 = vsub.f32 %v5814_v45, %v2369_v21  ;;  %v2490_v15 = vmul.f32 1.442695, %v2430_v9  ;;  %v2531_v21 = vadd.f32 %v6001_v39, %v2530_v25 }
0x10c5   :  { %v2486_v58 = vmul.f32 1.442695, %v2428_v11  ;;  %v2488_v55 = vmul.f32 1.442695, %v2429_v6  ;;  %v2534_v11 = vsel %vm153_vm2, %v6005_v3, 0.0 }
0x10c6   :  { %v2377_v42 = vpop.xlane.xlu1 %2376  ;;  %2552 = vadd.xlane.f32.xlu1 %v2551_v24 }
0x10c7   :  { %4217 = vpow2.f32 %v2486_v58  ;;  %v2433_v45 = vsub.f32 %v5821_v13, %v2377_v42  ;;  %v2432_v22 = vsub.f32 %v5839_v23, %v2377_v42 }
0x10c8   :  { %4219 = vpow2.f32 %v2488_v55 }
0x10c9   :  { %4221 = vpow2.f32 %v2492_v63  ;;  %v2496_v34 = vmul.f32 1.442695, %v2433_v45  ;;  %v2494_v46 = vmul.f32 1.442695, %v2432_v22  ;;  %v2535_v63 = vadd.f32 %v6012_v5, %v2534_v11 }
0x10ca   :  { %4223 = vpow2.f32 %v2500_v43  ;;  %v2385_v31 = vpop.xlane.xlu1 %2384  ;;  %2560 = vadd.xlane.f32.xlu1 %v2559_v36  ;;  %v2442_v36 = vsub.f32 %v5806_v37, %v5962_v0 }
0x10cb   :  { %4225 = vpow2.f32 %v2490_v15  ;;  %v2437_v13 = vsub.f32 %v5834_v53, %v2385_v31  ;;  %v2436_v23 = vsub.f32 %v5852_v52, %v2385_v31  ;;  %v2438_v53 = vsub.f32 %v5793_v18, %v5958_v57 }
0x10cc   :  { %4227 = vpow2.f32 %v2498_v4 }
0x10cd   :  { %4229 = vpow2.f32 %v2496_v34  ;;  %v2504_v54 = vmul.f32 1.442695, %v2437_v13  ;;  %v2502_v6 = vmul.f32 1.442695, %v2436_v23  ;;  %v2506_v18 = vmul.f32 1.442695, %v2438_v53 }
0x10ce   :  { %v2393_v9 = vpop.xlane.xlu1 %2392  ;;  %2532 = vadd.xlane.f32.xlu1 %v2531_v21  ;;  %4231 = vpow2.f32 %v2494_v46  ;;  %v2514_v21 = vmul.f32 1.442695, %v2442_v36 }
0x10cf   :  { %4233 = vpow2.f32 %v2504_v54  ;;  %v2441_v41 = vsub.f32 %v5847_v35, %v2393_v9  ;;  %v2440_v57 = vsub.f32 %v5867_v19, %v2393_v9  ;;  %v2443_v35 = vsub.f32 %v5801_v17, %v5962_v0 }
0x10d0   :  { %4235 = vpow2.f32 %v2502_v6 }
0x10d1   :  { %v6018_v52 = vpop.eup %4217  ;;  %4237 = vpow2.f32 %v2508_v27  ;;  %v2512_v15 = vmul.f32 1.442695, %v2441_v41  ;;  %v2510_v31 = vmul.f32 1.442695, %v2440_v57  ;;  %v2516_v25 = vmul.f32 1.442695, %v2443_v35 }
0x10d2   :  { %v6022_v58 = vpop.eup %4219  ;;  %2536 = vadd.xlane.f32.xlu1 %v2535_v63  ;;  %v2401_v4 = vpop.xlane.xlu1 %2400  ;;  %4239 = vpow2.f32 %v2506_v18 }
0x10d3   :  { %v6024_v55 = vpop.eup %4221  ;;  %v2566_v24 = vsel %vm153_vm2, %v6022_v58, 0.0  ;;  %4241 = vpow2.f32 %v2512_v15  ;;  %v2445_v17 = vsub.f32 %v5862_v26, %v2401_v4  ;;  %v2444_v37 = vsub.f32 %v5880_v40, %v2401_v4 }
0x10d4   :  { %v6028_v43 = vpop.eup %4223  ;;  %v2567_v42 = vadd.f32 %v6018_v52, %v2566_v24  ;;  %v2570_v22 = vsel %vm153_vm2, %v6024_v55, 0.0  ;;  %4243 = vpow2.f32 %v2510_v31 }
0x10d5   :  { %v6032_v29 = vpop.eup %4225  ;;  %v2578_v19 = vsel %vm153_vm2, %v6028_v43, 0.0  ;;  %4245 = vpow2.f32 %v2516_v25  ;;  %v2520_v0 = vmul.f32 1.442695, %v2445_v17  ;;  %v2518_v6 = vmul.f32 1.442695, %v2444_v37 }
0x10d6   :  { %v6036_v45 = vpop.eup %4227  ;;  %2568 = vadd.xlane.f32.xlu1 %v2567_v42  ;;  %v2571_v13 = vadd.f32 %v6032_v29, %v2570_v22  ;;  %4247 = vpow2.f32 %v2514_v21  ;;  %v2409_v27 = vpop.xlane.xlu1 %2408 }
0x10d7   :  { %v6040_v34 = vpop.eup %4229  ;;  %v2579_v23 = vadd.f32 %v6036_v45, %v2578_v19  ;;  %4249 = vpow2.f32 %v2520_v0  ;;  %v2449_v18 = vsub.f32 %v5875_v47, %v2409_v27  ;;  %v2448_v19 = vsub.f32 %v5888_v56, %v2409_v27 }
0x10d8   :  { %v6048_v46 = vpop.eup %4231  ;;  %v2574_v61 = vsel %vm153_vm2, %v6040_v34, 0.0  ;;  %4251 = vpow2.f32 %v2518_v6 }
0x10d9   :  { %v6053_v54 = vpop.eup %4233  ;;  %v2575_v26 = vadd.f32 %v6048_v46, %v2574_v61  ;;  %v2528_v4 = vmul.f32 1.442695, %v2449_v18  ;;  %v2526_v21 = vmul.f32 1.442695, %v2448_v19 }
0x10da   :  { %2572 = vadd.xlane.f32.xlu1 %v2571_v13  ;;  %v6057_v9 = vpop.eup %4235  ;;  %v2582_v11 = vsel %vm153_vm2, %v6053_v54, 0.0 }
0x10db   :  { %v6061_v53 = vpop.eup %4237  ;;  %v2583_v41 = vadd.f32 %v6057_v9, %v2582_v11  ;;  %4253 = vpow2.f32 %v2528_v4 }
0x10dc   :  { %2580 = vadd.xlane.f32.xlu0 %v2579_v23  ;;  %v6064_v40 = vpop.eup %4239  ;;  %v2586_v63 = vsel %vm153_vm2, %v6061_v53, 0.0 }
0x10dd   :  { %v6068_v24 = vpop.eup %4241  ;;  %v2587_v57 = vadd.f32 %v6064_v40, %v2586_v63 }
0x10de   :  { %2576 = vadd.xlane.f32.xlu1 %v2575_v26  ;;  %v6072_v42 = vpop.eup %4243  ;;  %v2590_v35 = vsel %vm153_vm2, %v6068_v24, 0.0 }
0x10df   :  { %v6076_v15 = vpop.eup %4245  ;;  %v2591_v47 = vadd.f32 %v6072_v42, %v2590_v35 }
0x10e0   :  { %v6082_v25 = vpop.eup %4247  ;;  %v2594_v17 = vsel %vm153_vm2, %v6076_v15, 0.0 }
0x10e1   :  { %v6086_v13 = vpop.eup %4249  ;;  %v2595_v56 = vadd.f32 %v6082_v25, %v2594_v17 }
0x10e2   :  { %2584 = vadd.xlane.f32.xlu1 %v2583_v41 }
0x10e6   :  { %2588 = vadd.xlane.f32.xlu1 %v2587_v57 }
0x10e8   :  { %v2405_v22 = vpop.xlane.xlu0 %2404 }
0x10e9   :  { %v2446_v36 = vsub.f32 %v5901_v16, %v2405_v22  ;;  %v2447_v31 = vsub.f32 %v5894_v59, %v2405_v22  ;;  %v6089_v16 = vpop.eup %4251  ;;  %v2598_v59 = vsel %vm153_vm2, %v6086_v13, 0.0 }
0x10ea   :  { %2592 = vadd.xlane.f32.xlu1 %v2591_v47  ;;  %v2599_v37 = vadd.f32 %v6089_v16, %v2598_v59  ;;  %v6094_v0 = vpop.eup %4253 }
0x10eb   :  { %v2522_v23 = vmul.f32 1.442695, %v2446_v36  ;;  %v2524_v61 = vmul.f32 1.442695, %v2447_v31  ;;  %v2606_v63 = vsel %vm153_vm2, %v6094_v0, 0.0 }
0x10ed   :  { %4255 = vpow2.f32 %v2522_v23 }
0x10ee   :  { %4257 = vpow2.f32 %v2524_v61  ;;  %2596 = vadd.xlane.f32.xlu1 %v2595_v56  ;;  %v3602_v56 = vld [vmem:[%s6353_s6 + $0x4] sm:$0xf] }
0x10ef   :  { %4259 = vpow2.f32 %v2526_v21 }
0x10f2   :  { %2600 = vadd.xlane.f32.xlu1 %v2599_v37 }
0x10f7   :  { %v6096_v26 = vpop.eup %4255 }
0x10f8   :  { %v6098_v11 = vpop.eup %4257 }
0x10f9   :  { %v2602_v6 = vsel %vm153_vm2, %v6098_v11, 0.0  ;;  %v6103_v41 = vpop.eup %4259 }
0x10fa   :  { %v2603_v27 = vadd.f32 %v6096_v26, %v2602_v6  ;;  %v2607_v18 = vadd.f32 %v6103_v41, %v2606_v63 }
0x10fc   :  { %2604 = vadd.xlane.f32.xlu1 %v2603_v27 }
0x1100   :  { %2608 = vadd.xlane.f32.xlu1 %v2607_v18 }
0x111c   :  { %v2541_v57 = vpop.xlane.xlu0 %2540 }
0x111d   :  { %4261 = vrcp.f32 %v2541_v57 }
0x111e   :  { %v2545_v35 = vpop.xlane.xlu1 %2544 }
0x111f   :  { %4263 = vrcp.f32 %v2545_v35 }
0x1122   :  { %v2707_v4 = vpop.permute.xlu1 %2706 }
0x1123   :  { %2767 = vmatpush1.bf16.msra.mxu0 %v2707_v4  ;;  %3916 = vmatpush1.bf16.msra.mxu1 %v2707_v4 }
0x1124   :  { %2768 = vmatprep.subr.bf16.mxu0 %v6464_v50  ;;  %3907 = vmatprep.subr.bf16.mxu1 %v6464_v50  ;;  %v2549_v47 = vpop.xlane.xlu0 %2548 }
0x1125   :  { %4265 = vrcp.f32 %v2549_v47 }
0x1127   :  { %v4262_v22 = vpop.eup %4261 }
0x1128   :  { %v2635_v36 = vmul.f32 %v4262_v22, %v5916_v60  ;;  %v2634_v50 = vmul.f32 %v4262_v22, %v5914_v51 }
0x1129   :  { %v4264_v19 = vpop.eup %4263 }
0x112a   :  { %v2637_v31 = vmul.f32 %v4264_v19, %v5924_v20  ;;  %v2636_v21 = vmul.f32 %v4264_v19, %v5918_v32  ;;  %v2906_v20 = vsel %vm1335_vm15, %v3602_v56, 0 }
0x112c   :  { %v2673_v17 = vpack.c.bf16 %v2637_v31, %v2635_v36  ;;  %v2557_v23 = vpop.xlane.xlu0 %2556  ;;  %v2672_v60 = vpack.c.bf16 %v2636_v21, %v2634_v50 }
0x112e   :  { %3593 = vmatprep.mubr.msk.bf16.mxu1 %vm153_vm2, %v2673_v17 }
0x112f   :  { %v4266_v6 = vpop.eup %4265 }
0x1130   :  { %v2639_v18 = vmul.f32 %v4266_v6, %v5932_v49  ;;  %v2638_v35 = vmul.f32 %v4266_v6, %v5930_v2 }
0x1134   :  { %v2565_v61 = vpop.xlane.xlu0 %2564 }
0x1138   :  { %v2709_v59 = vpop.permute.xlu0 %2708 }
0x1139   :  { %2769 = vmatpush1.bf16.msra.mxu0 %v2709_v59  ;;  %3917 = vmatpush1.bf16.msra.mxu1 %v2709_v59 }
0x113a   :  { %3919 = vmatprep.subr.msk.bf16.mxu1 %vm1335_vm15, %v3602_v56  ;;  %3854 = vmatprep.subr.bf16.mxu0 %v6465_v33 }
0x113c   :  { %2791 = vmatmul.mubr.bf16.vlgmr.msra.gmra.mrb[76].mxu1 %v2672_v60 }
0x113d   :  { %3833 = vmatpush3.bf16.msra.mxu1 %v2906_v20 }
0x113e   :  { %3870 = vmatprep.subr.bf16.mxu1 %v6465_v33 }
0x1153   :  { %v2553_v32 = vpop.xlane.xlu1 %2552 }
0x1154   :  { %4267 = vrcp.f32 %v2553_v32 }
0x1155   :  { %4269 = vrcp.f32 %v2557_v23 }
0x1157   :  { %v2561_v37 = vpop.xlane.xlu1 %2560 }
0x1158   :  { %4271 = vrcp.f32 %v2561_v37 }
0x115b   :  { %v2533_v51 = vpop.xlane.xlu1 %2532 }
0x115c   :  { %4273 = vrcp.f32 %v2533_v51 }
0x115e   :  { %v4268_v27 = vpop.eup %4267 }
0x115f   :  { %v2537_v63 = vpop.xlane.xlu1 %2536  ;;  %v2641_v57 = vmul.f32 %v4268_v27, %v5977_v10  ;;  %v2640_v4 = vmul.f32 %v4268_v27, %v5980_v48  ;;  %v4270_v22 = vpop.eup %4269 }
0x1160   :  { %4275 = vrcp.f32 %v2537_v63  ;;  %v2643_v17 = vmul.f32 %v4270_v22, %v5943_v38  ;;  %v2642_v21 = vmul.f32 %v4270_v22, %v5941_v28 }
0x1161   :  { %v2675_v19 = vpack.c.bf16 %v2641_v57, %v2639_v18  ;;  %v2674_v36 = vpack.c.bf16 %v2640_v4, %v2638_v35  ;;  %4277 = vrcp.f32 %v2565_v61 }
0x1162   :  { %v4272_v31 = vpop.eup %4271 }
0x1163   :  { %3594 = vmatprep.mubr.msk.bf16.mxu1 %vm153_vm2, %v2675_v19  ;;  %v2569_v47 = vpop.xlane.xlu1 %2568  ;;  %v2645_v23 = vmul.f32 %v4272_v31, %v5985_v8  ;;  %v2644_v2 = vmul.f32 %v4272_v31, %v5992_v62 }
0x1164   :  { %4279 = vrcp.f32 %v2569_v47  ;;  %2799 = vmatmul.mubr.bf16.gmra.mrb[80].mxu1 %v2674_v36 }
0x1165   :  { %v2677_v49 = vpack.c.bf16 %v2645_v23, %v2643_v17  ;;  %v2676_v61 = vpack.c.bf16 %v2644_v2, %v2642_v21 }
0x1166   :  { %v4274_v48 = vpop.eup %4273 }
0x1167   :  { %3595 = vmatprep.mubr.msk.bf16.mxu1 %vm153_vm2, %v2677_v49  ;;  %v2573_v10 = vpop.xlane.xlu1 %2572  ;;  %v2630_v50 = vmul.f32 %v4274_v48, %v6001_v39  ;;  %v2631_v60 = vmul.f32 %v4274_v48, %v5996_v44 }
0x1168   :  { %4281 = vrcp.f32 %v2573_v10 }
0x1169   :  { %v2581_v59 = vpop.xlane.xlu0 %2580 }
0x116a   :  { %v4276_v56 = vpop.eup %4275 }
0x116b   :  { %v2632_v38 = vmul.f32 %v4276_v56, %v6012_v5  ;;  %v2577_v8 = vpop.xlane.xlu1 %2576  ;;  %v2633_v20 = vmul.f32 %v4276_v56, %v6005_v3  ;;  %v4278_v62 = vpop.eup %4277 }
0x116c   :  { %4283 = vrcp.f32 %v2577_v8  ;;  %2807 = vmatmul.mubr.bf16.gmra.mrb[84].mxu1 %v2676_v61  ;;  %v2647_v39 = vmul.f32 %v4278_v62, %v5950_v7  ;;  %v2646_v6 = vmul.f32 %v4278_v62, %v5948_v30 }
0x116d   :  { %v2671_v32 = vpack.c.bf16 %v2633_v20, %v2631_v60  ;;  %v2670_v37 = vpack.c.bf16 %v2632_v38, %v2630_v50  ;;  %4285 = vrcp.f32 %v2581_v59 }
0x116e   :  { %v4280_v51 = vpop.eup %4279 }
0x116f   :  { %3592 = vmatprep.mubr.msk.bf16.mxu0 %vm153_vm2, %v2671_v32  ;;  %v2585_v28 = vpop.xlane.xlu1 %2584  ;;  %v2649_v5 = vmul.f32 %v4280_v51, %v6022_v58  ;;  %v2648_v44 = vmul.f32 %v4280_v51, %v6018_v52 }
0x1170   :  { %4287 = vrcp.f32 %v2585_v28  ;;  %2783 = vmatmul.mubr.bf16.vlgmr.msra.gmra.mrb[124].mxu0 %v2670_v37 }
0x1171   :  { %v2679_v3 = vpack.c.bf16 %v2649_v5, %v2647_v39  ;;  %v2678_v27 = vpack.c.bf16 %v2648_v44, %v2646_v6  ;;  %3858 = vmatprep.mubr.msk.bf16.mxu0 %vm4334_vm0, %v6465_v33 }
0x1172   :  { %v4282_v18 = vpop.eup %4281 }
0x1173   :  { %3596 = vmatprep.mubr.msk.bf16.mxu1 %vm153_vm2, %v2679_v3  ;;  %v2589_v63 = vpop.xlane.xlu1 %2588  ;;  %v2651_v58 = vmul.f32 %v4282_v18, %v6024_v55  ;;  %v2650_v52 = vmul.f32 %v4282_v18, %v6032_v29 }
0x1174   :  { %2815 = vmatmul.mubr.bf16.gmra.mrb[88].mxu1 %v2678_v27  ;;  %4289 = vrcp.f32 %v2589_v63 }
0x1176   :  { %v4284_v57 = vpop.eup %4283 }
0x1177   :  { %v2593_v7 = vpop.xlane.xlu1 %2592  ;;  %v2653_v30 = vmul.f32 %v4284_v57, %v6040_v34  ;;  %v2652_v35 = vmul.f32 %v4284_v57, %v6048_v46  ;;  %v4286_v4 = vpop.eup %4285 }
0x1178   :  { %4291 = vrcp.f32 %v2593_v7  ;;  %v2655_v47 = vmul.f32 %v4286_v4, %v6028_v43  ;;  %v2654_v23 = vmul.f32 %v4286_v4, %v6036_v45 }
0x1179   :  { %v2681_v22 = vpack.c.bf16 %v2653_v30, %v2651_v58  ;;  %v2680_v19 = vpack.c.bf16 %v2652_v35, %v2650_v52 }
0x117a   :  { %v4288_v36 = vpop.eup %4287 }
0x117b   :  { %3597 = vmatprep.mubr.msk.bf16.mxu1 %vm153_vm2, %v2681_v22  ;;  %v2597_v31 = vpop.xlane.xlu1 %2596  ;;  %v2657_v17 = vmul.f32 %v4288_v36, %v6053_v54  ;;  %v2656_v34 = vmul.f32 %v4288_v36, %v6057_v9 }
0x117c   :  { %2823 = vmatmul.mubr.bf16.gmra.mrb[92].mxu1 %v2680_v19  ;;  %4293 = vrcp.f32 %v2597_v31 }
0x117d   :  { %v2683_v55 = vpack.c.bf16 %v2657_v17, %v2655_v47  ;;  %v2682_v2 = vpack.c.bf16 %v2656_v34, %v2654_v23 }
0x117e   :  { %v4290_v46 = vpop.eup %4289 }
0x117f   :  { %3598 = vmatprep.mubr.msk.bf16.mxu1 %vm153_vm2, %v2683_v55  ;;  %v2601_v29 = vpop.xlane.xlu1 %2600  ;;  %v2659_v10 = vmul.f32 %v4290_v46, %v6061_v53  ;;  %v2658_v56 = vmul.f32 %v4290_v46, %v6064_v40 }
0x1180   :  { %4295 = vrcp.f32 %v2601_v29 }
0x1182   :  { %v4292_v49 = vpop.eup %4291 }
0x1183   :  { %v2661_v43 = vmul.f32 %v4292_v49, %v6068_v24  ;;  %v2660_v48 = vmul.f32 %v4292_v49, %v6072_v42 }
0x1184   :  { %2831 = vmatmul.mubr.bf16.gmra.mrb[96].mxu1 %v2682_v2 }
0x1185   :  { %v2685_v54 = vpack.c.bf16 %v2661_v43, %v2659_v10  ;;  %v2684_v50 = vpack.c.bf16 %v2660_v48, %v2658_v56 }
0x1186   :  { %v4294_v9 = vpop.eup %4293 }
0x1187   :  { %3599 = vmatprep.mubr.msk.bf16.mxu1 %vm153_vm2, %v2685_v54  ;;  %v2663_v45 = vmul.f32 %v4294_v9, %v6076_v15  ;;  %v2662_v42 = vmul.f32 %v4294_v9, %v6082_v25 }
0x1189   :  { %v2605_v21 = vpop.xlane.xlu1 %2604 }
0x118a   :  { %v4296_v61 = vpop.eup %4295  ;;  %4297 = vrcp.f32 %v2605_v21 }
0x118b   :  { %v2665_v38 = vmul.f32 %v4296_v61, %v6086_v13  ;;  %v2664_v59 = vmul.f32 %v4296_v61, %v6089_v16 }
0x118c   :  { %2839 = vmatmul.mubr.bf16.gmra.mrb[100].mxu1 %v2684_v50 }
0x118d   :  { %v2609_v53 = vpop.xlane.xlu1 %2608  ;;  %v2687_v24 = vpack.c.bf16 %v2665_v38, %v2663_v45  ;;  %v2686_v8 = vpack.c.bf16 %v2664_v59, %v2662_v42 }
0x118e   :  { %4299 = vrcp.f32 %v2609_v53 }
0x118f   :  { %3600 = vmatprep.mubr.msk.bf16.mxu1 %vm153_vm2, %v2687_v24 }
0x1194   :  { %2847 = vmatmul.mubr.bf16.gmra.mrb[104].mxu1 %v2686_v8  ;;  %v4298_v40 = vpop.eup %4297 }
0x1195   :  { %v2667_v20 = vmul.f32 %v4298_v40, %v6098_v11  ;;  %v2666_v13 = vmul.f32 %v4298_v40, %v6096_v26 }
0x1198   :  { %v4300_v60 = vpop.eup %4299 }
0x1199   :  { %v2669_v15 = vmul.f32 %v4300_v60, %v6094_v0  ;;  %v2668_v62 = vmul.f32 %v4300_v60, %v6103_v41 }
0x119b   :  { %v2689_v32 = vpack.c.bf16 %v2669_v15, %v2667_v20  ;;  %v2688_v37 = vpack.c.bf16 %v2668_v62, %v2666_v13 }
0x119d   :  { %3601 = vmatprep.mubr.msk.bf16.mxu1 %vm153_vm2, %v2689_v32 }
0x119e   :  { %2855 = vmatmul.mubr.bf16.gmra.mrb[108].mxu1 %v2688_v37 }
0x120f   :  { %v2792_v16 = vpop.f32.mrb[76].mxu1 }
0x1210   :  { %v2794_v51 = vpop.f32.mrb[77].mxu1 }
0x1211   :  { %v2795_v25 = vpop.f32.mrb[78].mxu1 }
0x1212   :  { %v2864_v28 = vpack.c.bf16 %v2795_v25, %v2792_v16  ;;  %v2797_v39 = vpop.f32.mrb[79].mxu1 }
0x1237   :  { %v2800_v5 = vpop.f32.mrb[80].mxu1 }
0x1238   :  { %v2802_v6 = vpop.f32.mrb[81].mxu1 }
0x1239   :  { %v2803_v44 = vpop.f32.mrb[82].mxu1 }
0x123a   :  { %v2865_v11 = vpack.c.bf16 %v2803_v44, %v2800_v5  ;;  %v2805_v3 = vpop.f32.mrb[83].mxu1 }
0x123f   :  { %v2808_v0 = vpop.f32.mrb[84].mxu1 }
0x1240   :  { %v2810_v27 = vpop.f32.mrb[85].mxu1 }
0x1241   :  { %v2811_v26 = vpop.f32.mrb[86].mxu1 }
0x1242   :  { %v2866_v63 = vpack.c.bf16 %v2811_v26, %v2808_v0  ;;  %v2813_v41 = vpop.f32.mrb[87].mxu1 }
0x1243   :  { %v2784_v18 = vpop.f32.mrb[124].mxu0 }
0x1244   :  { %v2786_v57 = vpop.f32.mrb[125].mxu0 }
0x1245   :  { %v2787_v7 = vpop.f32.mrb[126].mxu0  ;;  %v6201_v57 = vld [vmem:[%s6350_s9 + $0x4] sm:$0xf] }
0x1246   :  { %v2863_v58 = vpack.c.bf16 %v2787_v7, %v2784_v18  ;;  %v2789_v30 = vpop.f32.mrb[127].mxu0  ;;  %v3099_v7 = vrot.slane %v6201_v57, %v4724_v12 }
0x1247   :  { %v2816_v52 = vpop.f32.mrb[88].mxu1 }
0x1248   :  { %v2818_v35 = vpop.f32.mrb[89].mxu1  ;;  %3834 = vmatprep.mubr.msk.bf16.mxu1 %vm398_vm3, %v2863_v58 }
0x1249   :  { %v2819_v4 = vpop.f32.mrb[90].mxu1  ;;  %3835 = vmatmul.mubr.msk.bf16.vlgmr.msra.gmra.mrb[112].mxu1 %vm398_vm3, %v2864_v28 }
0x124a   :  { %v2867_v22 = vpack.c.bf16 %v2819_v4, %v2816_v52  ;;  %v2821_v19 = vpop.f32.mrb[91].mxu1  ;;  %3838 = vmatprep.mubr.msk.bf16.mxu1 %vm398_vm3, %v2865_v11 }
0x124f   :  { %v2824_v36 = vpop.f32.mrb[92].mxu1 }
0x1250   :  { %v2826_v31 = vpop.f32.mrb[93].mxu1 }
0x1251   :  { %v2827_v47 = vpop.f32.mrb[94].mxu1  ;;  %3839 = vmatmul.mubr.msk.bf16.gmra.mrb[116].mxu1 %vm398_vm3, %v2866_v63 }
0x1252   :  { %v2868_v17 = vpack.c.bf16 %v2827_v47, %v2824_v36  ;;  %v2829_v55 = vpop.f32.mrb[95].mxu1  ;;  %3842 = vmatprep.mubr.msk.bf16.mxu1 %vm398_vm3, %v2867_v22 }
0x1257   :  { %v2832_v34 = vpop.f32.mrb[96].mxu1 }
0x1258   :  { %v2834_v29 = vpop.f32.mrb[97].mxu1 }
0x1259   :  { %v2835_v46 = vpop.f32.mrb[98].mxu1  ;;  %3843 = vmatmul.mubr.msk.bf16.gmra.mrb[120].mxu1 %vm398_vm3, %v2868_v17 }
0x125a   :  { %v2869_v23 = vpack.c.bf16 %v2835_v46, %v2832_v34  ;;  %v2837_v49 = vpop.f32.mrb[99].mxu1 }
0x125c   :  { %3846 = vmatprep.mubr.msk.bf16.mxu1 %vm398_vm3, %v2869_v23 }
0x125f   :  { %v2840_v2 = vpop.f32.mrb[100].mxu1 }
0x1260   :  { %v2842_v10 = vpop.f32.mrb[101].mxu1 }
0x1261   :  { %v2843_v43 = vpop.f32.mrb[102].mxu1 }
0x1262   :  { %v2870_v54 = vpack.c.bf16 %v2843_v43, %v2840_v2  ;;  %v2845_v48 = vpop.f32.mrb[103].mxu1 }
0x1264   :  { %3847 = vmatmul.mubr.msk.bf16.gmra.mrb[124].mxu1 %vm398_vm3, %v2870_v54  ;;  %v6519_v54 = vld [vmem:[#allocation25_spill] sm:$0xff] }
0x1267   :  { %v2848_v9 = vpop.f32.mrb[104].mxu1 }
0x1268   :  { %v2850_v21 = vpop.f32.mrb[105].mxu1 }
0x1269   :  { %v2851_v56 = vpop.f32.mrb[106].mxu1 }
0x126a   :  { %v2871_v61 = vpack.c.bf16 %v2851_v56, %v2848_v9  ;;  %v2853_v50 = vpop.f32.mrb[107].mxu1 }
0x126c   :  { %3850 = vmatprep.mubr.msk.bf16.mxu1 %vm398_vm3, %v2871_v61 }
0x1271   :  { %v2856_v45 = vpop.f32.mrb[108].mxu1 }
0x1272   :  { %v2858_v38 = vpop.f32.mrb[109].mxu1 }
0x1273   :  { %v2859_v53 = vpop.f32.mrb[110].mxu1 }
0x1274   :  { %v2872_v24 = vpack.c.bf16 %v2859_v53, %v2856_v45  ;;  %v2861_v59 = vpop.f32.mrb[111].mxu1 }
0x1276   :  { %3851 = vmatmul.mubr.msk.bf16.gmra.mrb[128].mxu1 %vm398_vm3, %v2872_v24  ;;  %v6520_v24 = vld [vmem:[#allocation26_spill] sm:$0xff] }
0x1277   :  { %3886 = vmatprep.mubr.msk.bf16.mxu1 %vm4334_vm0, %v6465_v33 }
0x131c   :  { %v3836_v42 = vpop.f32.mrb[112].mxu1 }
0x131d   :  { %v2942_v8 = vpop.f32.mrb[113].mxu1 }
0x131e   :  { %v3837_v40 = vpop.f32.mrb[114].mxu1 }
0x131f   :  { %v2945_v60 = vpop.f32.mrb[115].mxu1 }
0x1324   :  { %v3840_v20 = vpop.f32.mrb[116].mxu1 }
0x1325   :  { %3028 = vrot.lane.b32.xlu0 %v3840_v20, %s4339_s26  ;;  %v6182_v15 = vpop.f32.mrb[117].mxu1 }
0x1326   :  { %v3841_v13 = vpop.f32.mrb[118].mxu1 }
0x1327   :  { %v2961_v62 = vpop.f32.mrb[119].mxu1 }
0x1328   :  { %3026 = vrot.lane.b32.xlu1 %v2961_v62, %s4339_s26 }
0x1329   :  { %3030 = vrot.lane.b32.xlu0 %v3841_v13, %s4339_s26  ;;  %v6521_v13 = vld [vmem:[#allocation27_spill] sm:$0xff] }
0x132c   :  { %v3844_v32 = vpop.f32.mrb[120].mxu1 }
0x132d   :  { %3051 = vrot.lane.b32.xlu1 %v3844_v32, %s4340_s30  ;;  %v2974_v37 = vpop.f32.mrb[121].mxu1 }
0x132e   :  { %v3845_v16 = vpop.f32.mrb[122].mxu1 }
0x132f   :  { %v2977_v51 = vpop.f32.mrb[123].mxu1 }
0x1331   :  { %3032 = vrot.lane.b32.xlu1 %v2974_v37, %s4339_s26 }
0x1335   :  { %3053 = vrot.lane.b32.xlu1 %v3845_v16, %s4340_s30 }
0x1337   :  { %v3848_v25 = vpop.f32.mrb[124].mxu1 }
0x1338   :  { %v2990_v28 = vpop.f32.mrb[125].mxu1 }
0x1339   :  { %v3849_v39 = vpop.f32.mrb[126].mxu1 }
0x133a   :  { %3076 = vrot.lane.b32.xlu0 %v3849_v39, %s4341_s13  ;;  %v2993_v5 = vpop.f32.mrb[127].mxu1 }
0x133e   :  { %3055 = vrot.lane.b32.xlu0 %v2990_v28, %s4340_s30 }
0x1349   :  { %v3852_v6 = vpop.f32.mrb[128].mxu1 }
0x134a   :  { %v3006_v44 = vpop.f32.mrb[129].mxu1 }
0x134b   :  { %3078 = vrot.lane.b32.xlu1 %v3006_v44, %s4341_s13  ;;  %v3853_v11 = vpop.f32.mrb[130].mxu1 }
0x134c   :  { %v3009_v3 = vpop.f32.mrb[131].mxu1 }
0x134d   :  { %3080 = vrot.lane.b32.xlu0 %v3009_v3, %s4341_s13 }
0x134f   :  { %3057 = vrot.lane.b32.xlu1 %v2993_v5, %s4340_s30 }
0x1351   :  { %3034 = vrot.lane.b32.xlu0 %v2977_v51, %s4339_s26 }
0x1353   :  { %3082 = vrot.lane.b32.xlu1 %v3852_v6, %s4341_s13 }
0x1355   :  { %3084 = vrot.lane.b32.xlu0 %v3853_v11, %s4341_s13 }
0x1357   :  { %3059 = vrot.lane.b32.xlu1 %v3848_v25, %s4340_s30 }
0x1397   :  { %v3029_v0 = vpop.permute.xlu0 %3028 }
0x1398   :  { %v3042_v36 = vadd.f32 %v3029_v0, %v2945_v60 }
0x139a   :  { %v3027_v27 = vpop.permute.xlu1 %3026 }
0x139b   :  { %v3031_v26 = vpop.permute.xlu0 %3030  ;;  %v3041_v41 = vadd.f32 %v3027_v27, %v2942_v8 }
0x139c   :  { %v3043_v47 = vadd.f32 %v3836_v42, %v3031_v26 }
0x139f   :  { %v3052_v63 = vpop.permute.xlu1 %3051 }
0x13a0   :  { %v3066_v18 = vadd.f32 %v3052_v63, %v3041_v41 }
0x13a3   :  { %v3033_v4 = vpop.permute.xlu1 %3032 }
0x13a4   :  { %v3044_v10 = vadd.f32 %v3837_v40, %v3033_v4 }
0x13a7   :  { %v3054_v19 = vpop.permute.xlu1 %3053 }
0x13a8   :  { %v3067_v17 = vadd.f32 %v3054_v19, %v3042_v36  ;;  %v4011_v36 = vld [vmem:[%s6354_s7 + $0x10] sm:$0xff]  }
0x13a9   :  { %3855 = vmatpush3.bf16.msra.mxu0 %v4011_v36 }
0x13aa   :  { %3856 = vmatprep.subr.bf16.mxu0 %v6465_v33 }
0x13ac   :  { %v3077_v58 = vpop.permute.xlu0 %3076 }
0x13ad   :  { %v3091_v30 = vadd.f32 %v3077_v58, %v3066_v18 }
0x13af   :  { %v3100_v52 = vadd.f32 %v3099_v7, %v3091_v30 }
0x13b0   :  { %v3056_v31 = vpop.permute.xlu0 %3055 }
0x13b1   :  { %v6206_v35 = vadd.f32 %v3100_v52, %v5465_v1  ;;  %v3068_v34 = vadd.f32 %v3056_v31, %v3043_v47  ;;  %v4012_v31 = vld [vmem:[%s6354_s7 + $0x18] sm:$0xff]   ;;  %v4013_v47 = vld [vmem:[%s6355_s8 + $0x40] sm:$0xff]  }
0x13b2   :  { %3857 = vmatpush3.bf16.msra.mxu0 %v4012_v31  ;;  %3871 = vmatpush3.bf16.msra.mxu1 %v4013_v47 }
0x13b3   :  { %v3110_v22 = vsel %vm153_vm2, %v6206_v35, 0.0  ;;  %3872 = vmatprep.subr.bf16.mxu1 %v6465_v33 }
0x13b4   :  { %3111 = vadd.xlane.f32.xlu1 %v3110_v22 }
0x13bd   :  { %v3079_v55 = vpop.permute.xlu1 %3078 }
0x13be   :  { %v3092_v29 = vadd.f32 %v3079_v55, %v3067_v17  ;;  %v4014_v17 = vld [vmem:[%s6355_s8 + $0x48] sm:$0xff]   ;;  %v4015_v55 = vld [vmem:[%s6355_s8 + $0x50] sm:$0xff]  }
0x13bf   :  { %v3081_v46 = vpop.permute.xlu0 %3080  ;;  %3873 = vmatpush3.bf16.msra.mxu1 %v4014_v17 }
0x13c0   :  { %v3101_v23 = vadd.f32 %v3099_v7, %v3092_v29  ;;  %v3093_v49 = vadd.f32 %v3081_v46, %v3068_v34  ;;  %3874 = vmatprep.subr.bf16.mxu1 %v6465_v33  ;;  %v4016_v34 = vld [vmem:[%s6355_s8 + $0x58] sm:$0xff]  }
0x13c1   :  { %v3058_v2 = vpop.permute.xlu1 %3057 }
0x13c2   :  { %v6211_v1 = vadd.f32 %v3101_v23, %v5468_v14  ;;  %v3102_v43 = vadd.f32 %v3099_v7, %v3093_v49  ;;  %v3069_v9 = vadd.f32 %v3058_v2, %v3044_v10 }
0x13c3   :  { %v3035_v56 = vpop.permute.xlu0 %3034  ;;  %3875 = vmatpush3.bf16.msra.mxu1 %v4015_v55 }
0x13c4   :  { %v6214_v48 = vadd.f32 %v3102_v43, %v6519_v54  ;;  %v3113_v21 = vsel %vm153_vm2, %v6211_v1, 0.0  ;;  %v3045_v45 = vadd.f32 %v3035_v56, %v6182_v15  ;;  %3876 = vmatprep.subr.bf16.mxu1 %v6465_v33 }
0x13c5   :  { %v3083_v61 = vpop.permute.xlu1 %3082  ;;  %3114 = vadd.xlane.f32.xlu0 %v3113_v21 }
0x13c6   :  { %v3094_v50 = vadd.f32 %v3083_v61, %v3069_v9  ;;  %v3116_v53 = vsel %vm153_vm2, %v6214_v48, 0.0 }
0x13c7   :  { %v3085_v8 = vpop.permute.xlu0 %3084  ;;  %3877 = vmatpush3.bf16.msra.mxu1 %v4016_v34 }
0x13c8   :  { %v3103_v38 = vadd.f32 %v3099_v7, %v3094_v50  ;;  %3878 = vmatprep.subr.bf16.mxu1 %v6465_v33 }
0x13c9   :  { %v3060_v14 = vpop.permute.xlu1 %3059  ;;  %3117 = vadd.xlane.f32.xlu0 %v3116_v53 }
0x13ca   :  { %v6222_v59 = vadd.f32 %v3103_v38, %v6520_v24  ;;  %v3070_v42 = vadd.f32 %v3060_v14, %v3045_v45 }
0x13cc   :  { %v3095_v40 = vadd.f32 %v3085_v8, %v3070_v42  ;;  %v3119_v60 = vsel %vm153_vm2, %v6222_v59, 0.0 }
0x13cd   :  { %3120 = vadd.xlane.f32.xlu1 %v3119_v60 }
0x13ce   :  { %v3104_v20 = vadd.f32 %v3099_v7, %v3095_v40 }
0x13d0   :  { %v6227_v62 = vadd.f32 %v3104_v20, %v6521_v13 }
0x13d2   :  { %v3122_v15 = vsel %vm153_vm2, %v6227_v62, 0.0 }
0x13d3   :  { %3123 = vadd.xlane.f32.xlu0 %v3122_v15 }
0x1441   :  { %v3112_v32 = vpop.xlane.xlu1 %3111 }
0x1442   :  { %v3125_v37 = vmul.f32 0.03125, %v3112_v32 }
0x1444   :  { %v6232_v16 = vsub.f32 %v6206_v35, %v3125_v37 }
0x1446   :  { %v3135_v51 = vmul.f32 %v6232_v16, %v6232_v16 }
0x1448   :  { %v3140_v25 = vsel %vm153_vm2, %v3135_v51, 0.0  ;;  %v4017_v51 = vld [vmem:[%s6355_s8 + $0x60] sm:$0xff]  }
0x1449   :  { %3141 = vadd.xlane.f32.xlu1 %v3140_v25  ;;  %3879 = vmatpush3.bf16.msra.mxu1 %v4017_v51  ;;  %v4018_v25 = vld [vmem:[%s6355_s8 + $0x68] sm:$0xff]  }
0x144a   :  { %3880 = vmatprep.subr.bf16.mxu1 %v6465_v33 }
0x144d   :  { %3881 = vmatpush3.bf16.msra.mxu1 %v4018_v25 }
0x144e   :  { %3882 = vmatprep.subr.bf16.mxu1 %v6465_v33 }
0x1452   :  { %v3115_v28 = vpop.xlane.xlu0 %3114 }
0x1453   :  { %v3126_v39 = vmul.f32 0.03125, %v3115_v28  ;;  %v4019_v28 = vld [vmem:[%s6355_s8 + $0x70] sm:$0xff]  }
0x1454   :  { %3883 = vmatpush3.bf16.msra.mxu1 %v4019_v28 }
0x1455   :  { %v3131_v5 = vsub.f32 %v6211_v1, %v3126_v39  ;;  %3884 = vmatprep.subr.bf16.mxu1 %v6465_v33  ;;  %v4020_v39 = vld [vmem:[%s6355_s8 + $0x78] sm:$0xff]  }
0x1456   :  { %v3118_v6 = vpop.xlane.xlu0 %3117 }
0x1457   :  { %v3127_v44 = vmul.f32 0.03125, %v3118_v6  ;;  %v3136_v11 = vmul.f32 %v3131_v5, %v3131_v5 }
0x1458   :  { %3885 = vmatpush3.bf16.msra.mxu1 %v4020_v39 }
0x1459   :  { %v6239_v3 = vsub.f32 %v6214_v48, %v3127_v44  ;;  %v3143_v0 = vsel %vm153_vm2, %v3136_v11, 0.0 }
0x145a   :  { %v3121_v27 = vpop.xlane.xlu1 %3120  ;;  %3144 = vadd.xlane.f32.xlu0 %v3143_v0 }
0x145b   :  { %v3128_v26 = vmul.f32 0.03125, %v3121_v27  ;;  %v3137_v63 = vmul.f32 %v6239_v3, %v6239_v3 }
0x145d   :  { %v3133_v41 = vsub.f32 %v6222_v59, %v3128_v26  ;;  %v3146_v18 = vsel %vm153_vm2, %v3137_v63, 0.0 }
0x145e   :  { %3147 = vadd.xlane.f32.xlu1 %v3146_v18 }
0x145f   :  { %v3138_v7 = vmul.f32 %v3133_v41, %v3133_v41 }
0x1460   :  { %v3124_v58 = vpop.xlane.xlu0 %3123 }
0x1461   :  { %v3129_v30 = vmul.f32 0.03125, %v3124_v58  ;;  %v3149_v52 = vsel %vm153_vm2, %v3138_v7, 0.0 }
0x1462   :  { %3150 = vadd.xlane.f32.xlu0 %v3149_v52 }
0x1463   :  { %v3134_v4 = vsub.f32 %v6227_v62, %v3129_v30 }
0x1465   :  { %v3139_v22 = vmul.f32 %v3134_v4, %v3134_v4 }
0x1467   :  { %v3152_v19 = vsel %vm153_vm2, %v3139_v22, 0.0 }
0x1468   :  { %3153 = vadd.xlane.f32.xlu1 %v3152_v19 }
0x14d6   :  { %v3142_v29 = vpop.xlane.xlu1 %3141 }
0x14d7   :  { %v3155_v46 = vmul.f32 0.03125, %v3142_v29 }
0x14d9   :  { %v3160_v23 = vadd.f32 1e-06, %v3155_v46 }
0x14db   :  { %4301 = vrsqrt.f32 %v3160_v23 }
0x14e5   :  { %v4302_v50 = vpop.eup %4301 }
0x14e6   :  { %v3170_v14 = vmul.f32 %v4302_v50, %v6232_v16 }
0x14e7   :  { %v3145_v49 = vpop.xlane.xlu0 %3144 }
0x14e8   :  { %v3156_v2 = vmul.f32 0.03125, %v3145_v49 }
0x14ea   :  { %v3161_v10 = vadd.f32 1e-06, %v3156_v2 }
0x14eb   :  { %v3148_v43 = vpop.xlane.xlu1 %3147 }
0x14ec   :  { %4303 = vrsqrt.f32 %v3161_v10  ;;  %v3157_v54 = vmul.f32 0.03125, %v3148_v43 }
0x14ee   :  { %v3162_v9 = vadd.f32 1e-06, %v3157_v54 }
0x14ef   :  { %v3151_v21 = vpop.xlane.xlu0 %3150 }
0x14f0   :  { %v3158_v56 = vmul.f32 0.03125, %v3151_v21  ;;  %4305 = vrsqrt.f32 %v3162_v9 }
0x14f2   :  { %v3163_v61 = vadd.f32 1e-06, %v3158_v56 }
0x14f4   :  { %4307 = vrsqrt.f32 %v3163_v61 }
0x14f5   :  { %v3154_v45 = vpop.xlane.xlu1 %3153 }
0x14f6   :  { %v4304_v38 = vpop.eup %4303  ;;  %v3159_v53 = vmul.f32 0.03125, %v3154_v45 }
0x14f7   :  { %v3171_v24 = vmul.f32 %v4304_v38, %v3131_v5  ;;  %v6522_v5 = vld [vmem:[#allocation2_spill] sm:$0xff] }
0x14f8   :  { %v3164_v42 = vadd.f32 1e-06, %v3159_v53  ;;  %v6523_v6 = vsub.s32 2, %v6522_v5 }
0x14f9   :  { %v3175_v8 = vpack.c.bf16 %v3171_v24, %v3170_v14 }
0x14fa   :  { %4309 = vrsqrt.f32 %v3164_v42  ;;  %v4306_v40 = vpop.eup %4305  ;;  %v3186_v44 = vrot.slane %v6201_v57, %v6523_v6 }
0x14fb   :  { %3859 = vmatmul.mubr.msk.bf16.vlgmr.msra.gmra.mrb[128].mxu0 %vm153_vm2, %v3175_v8  ;;  %v3172_v20 = vmul.f32 %v4306_v40, %v6239_v3 }
0x14fc   :  { %3862 = vmatprep.mubr.msk.bf16.mxu0 %vm4334_vm0, %v6465_v33 }
0x14fe   :  { %v4308_v60 = vpop.eup %4307 }
0x14ff   :  { %v3173_v13 = vmul.f32 %v4308_v60, %v3133_v41 }
0x1501   :  { %v3176_v15 = vpack.c.bf16 %v3173_v13, %v3172_v20 }
0x1503   :  { %3863 = vmatmul.mubr.msk.bf16.gmra.mrb[132].mxu0 %vm153_vm2, %v3176_v15  ;;  %v6524_v15 = vsub.s32 3, %v6522_v5 }
0x1504   :  { %v4310_v32 = vpop.eup %4309  ;;  %3866 = vmatprep.mubr.msk.bf16.mxu0 %vm4334_vm0, %v6465_v33 }
0x1505   :  { %v3174_v37 = vmul.f32 %v4310_v32, %v3134_v4  ;;  %v3312_v32 = vrot.slane %v6201_v57, %v6524_v15  ;;  %v3422_v15 = vld [vmem:[%s6356_s10] sm:$0x3] }
0x1507   :  { %v3177_v16 = vpack.c.bf16 %v3174_v37, %v3174_v37 }
0x150b   :  { %3867 = vmatmul.mubr.msk.bf16.gmra.mrb[136].mxu0 %vm153_vm2, %v3177_v16 }
0x15ce   :  { %v3242_v11 = vpop.f32.mrb[128].mxu0 }
0x15cf   :  { %v3243_v3 = vadd.f32 %v3242_v11, %v3186_v44  ;;  %v3860_v0 = vpop.f32.mrb[129].mxu0 }
0x15d0   :  { %v3245_v27 = vpop.f32.mrb[130].mxu0 }
0x15d1   :  { %v3269_v26 = vmul.f32 0.70710677, %v3243_v3  ;;  %v3246_v63 = vadd.f32 %v3245_v27, %v3186_v44  ;;  %v3861_v41 = vpop.f32.mrb[131].mxu0  ;;  %v3264_v46 = vmul.f32 0.5, %v3243_v3 }
0x15d3   :  { %4311 = verf.f32 %v3269_v26  ;;  %v3270_v18 = vmul.f32 0.70710677, %v3246_v63  ;;  %v3265_v23 = vmul.f32 0.5, %v3246_v63 }
0x15d5   :  { %4313 = verf.f32 %v3270_v18 }
0x15d6   :  { %v3250_v7 = vpop.f32.mrb[132].mxu0 }
0x15d7   :  { %v3251_v58 = vadd.f32 %v3250_v7, %v3186_v44  ;;  %v3864_v30 = vpop.f32.mrb[133].mxu0 }
0x15d8   :  { %v3253_v52 = vpop.f32.mrb[134].mxu0 }
0x15d9   :  { %v3271_v4 = vmul.f32 0.70710677, %v3251_v58  ;;  %v3254_v22 = vadd.f32 %v3253_v52, %v3186_v44  ;;  %v3865_v19 = vpop.f32.mrb[135].mxu0  ;;  %v3266_v45 = vmul.f32 0.5, %v3251_v58 }
0x15db   :  { %4315 = verf.f32 %v3271_v4  ;;  %v3272_v36 = vmul.f32 0.70710677, %v3254_v22  ;;  %v3267_v38 = vmul.f32 0.5, %v3254_v22 }
0x15dd   :  { %v4312_v31 = vpop.eup %4311  ;;  %4317 = verf.f32 %v3272_v36 }
0x15de   :  { %v3279_v47 = vadd.f32 1.0, %v4312_v31  ;;  %v3258_v17 = vpop.f32.mrb[136].mxu0 }
0x15df   :  { %v4314_v55 = vpop.eup %4313  ;;  %v3259_v34 = vadd.f32 %v3258_v17, %v3186_v44  ;;  %v3868_v29 = vpop.f32.mrb[137].mxu0 }
0x15e0   :  { %v3280_v49 = vadd.f32 1.0, %v4314_v55  ;;  %v3261_v2 = vpop.f32.mrb[138].mxu0  ;;  %v3284_v54 = vmul.f32 %v3279_v47, %v3264_v46 }
0x15e1   :  { %v3273_v10 = vmul.f32 0.70710677, %v3259_v34  ;;  %v3869_v43 = vpop.f32.mrb[139].mxu0  ;;  %v3268_v40 = vmul.f32 0.5, %v3259_v34 }
0x15e2   :  { %v3285_v9 = vmul.f32 %v3280_v49, %v3265_v23 }
0x15e3   :  { %4319 = verf.f32 %v3273_v10 }
0x15e4   :  { %v3289_v21 = vpack.c.bf16 %v3285_v9, %v3284_v54 }
0x15e5   :  { %v4316_v56 = vpop.eup %4315 }
0x15e6   :  { %v3281_v61 = vadd.f32 1.0, %v4316_v56  ;;  %3887 = vmatmul.mubr.bf16.vlgmr.msra.gmra.mrb[132].mxu1 %v3289_v21 }
0x15e7   :  { %v4318_v50 = vpop.eup %4317  ;;  %3890 = vmatprep.mubr.msk.bf16.mxu1 %vm4334_vm0, %v6465_v33 }
0x15e8   :  { %v3282_v53 = vadd.f32 1.0, %v4318_v50  ;;  %v3286_v14 = vmul.f32 %v3281_v61, %v3266_v45 }
0x15ea   :  { %v3287_v24 = vmul.f32 %v3282_v53, %v3267_v38 }
0x15ec   :  { %v3290_v42 = vpack.c.bf16 %v3287_v24, %v3286_v14 }
0x15ed   :  { %v4320_v8 = vpop.eup %4319 }
0x15ee   :  { %v3283_v60 = vadd.f32 1.0, %v4320_v8  ;;  %3891 = vmatmul.mubr.bf16.gmra.mrb[136].mxu1 %v3290_v42 }
0x15ef   :  { %3894 = vmatprep.mubr.msk.bf16.mxu1 %vm4334_vm0, %v6465_v33 }
0x15f0   :  { %v3288_v20 = vmul.f32 %v3283_v60, %v3268_v40 }
0x15f2   :  { %v3291_v13 = vpack.c.bf16 %v3288_v20, %v3288_v20 }
0x15f6   :  { %3895 = vmatmul.mubr.bf16.gmra.mrb[140].mxu1 %v3291_v13 }
0x16b9   :  { %v3395_v37 = vpop.f32.mrb[132].mxu1 }
0x16ba   :  { %v3396_v16 = vadd.f32 %v3395_v37, %v3312_v32  ;;  %v3888_v51 = vpop.f32.mrb[133].mxu1 }
0x16bb   :  { %v3398_v25 = vpop.f32.mrb[134].mxu1  ;;  %v6525_v51 = vld [vmem:[#allocation3_spill] sm:$0xff] }
0x16bc   :  { %v3417_v28 = vadd.f32 %v3396_v16, %v6206_v35  ;;  %v3399_v39 = vadd.f32 %v3398_v25, %v3312_v32  ;;  %v3889_v6 = vpop.f32.mrb[135].mxu1  ;;  %v3491_v25 = vrot.slane %v3422_v15, %v6525_v51 }
0x16be   :  { %v3418_v44 = vadd.f32 %v3399_v39, %v6211_v1  ;;  %v3423_v11 = vsel %vm153_vm2, %v3417_v28, 0.0  ;;  %v3500_v39 = vrot.slane %v3422_v15, %v4724_v12 }
0x16bf   :  { %3424 = vadd.xlane.f32.xlu0 %v3423_v11 }
0x16c0   :  { %v3426_v33 = vsel %vm153_vm2, %v3418_v44, 0.0 }
0x16c1   :  { %3427 = vadd.xlane.f32.xlu1 %v3426_v33  ;;  %v3403_v3 = vpop.f32.mrb[136].mxu1 }
0x16c2   :  { %v3404_v5 = vadd.f32 %v3403_v3, %v3312_v32  ;;  %v3892_v0 = vpop.f32.mrb[137].mxu1 }
0x16c3   :  { %v3406_v57 = vpop.f32.mrb[138].mxu1 }
0x16c4   :  { %v3419_v27 = vadd.f32 %v3404_v5, %v6214_v48  ;;  %v3407_v26 = vadd.f32 %v3406_v57, %v3312_v32  ;;  %v3893_v63 = vpop.f32.mrb[139].mxu1 }
0x16c6   :  { %v3420_v35 = vadd.f32 %v3407_v26, %v6222_v59  ;;  %v3429_v41 = vsel %vm153_vm2, %v3419_v27, 0.0 }
0x16c7   :  { %3430 = vadd.xlane.f32.xlu0 %v3429_v41 }
0x16c8   :  { %v3432_v1 = vsel %vm153_vm2, %v3420_v35, 0.0 }
0x16c9   :  { %3433 = vadd.xlane.f32.xlu1 %v3432_v1  ;;  %v3411_v18 = vpop.f32.mrb[140].mxu1 }
0x16ca   :  { %v3412_v7 = vadd.f32 %v3411_v18, %v3312_v32  ;;  %v3896_v58 = vpop.f32.mrb[141].mxu1 }
0x16cb   :  { %v3414_v30 = vpop.f32.mrb[142].mxu1 }
0x16cc   :  { %v3421_v52 = vadd.f32 %v3412_v7, %v6227_v62  ;;  %v3897_v4 = vpop.f32.mrb[143].mxu1 }
0x16ce   :  { %v3435_v22 = vsel %vm153_vm2, %v3421_v52, 0.0 }
0x16cf   :  { %3436 = vadd.xlane.f32.xlu0 %v3435_v22 }
0x174c   :  { %v3425_v48 = vpop.xlane.xlu0 %3424 }
0x174d   :  { %v3438_v19 = vmul.f32 0.03125, %v3425_v48 }
0x174e   :  { %v3428_v36 = vpop.xlane.xlu1 %3427 }
0x174f   :  { %v3443_v59 = vsub.f32 %v3417_v28, %v3438_v19  ;;  %v3439_v31 = vmul.f32 0.03125, %v3428_v36 }
0x1751   :  { %v3444_v47 = vsub.f32 %v3418_v44, %v3439_v31  ;;  %v3448_v17 = vmul.f32 %v3443_v59, %v3443_v59 }
0x1753   :  { %v3453_v55 = vsel %vm153_vm2, %v3448_v17, 0.0  ;;  %v3449_v34 = vmul.f32 %v3444_v47, %v3444_v47 }
0x1754   :  { %3454 = vadd.xlane.f32.xlu1 %v3453_v55  ;;  %v3431_v29 = vpop.xlane.xlu0 %3430 }
0x1755   :  { %v3440_v46 = vmul.f32 0.03125, %v3431_v29  ;;  %v3456_v23 = vsel %vm153_vm2, %v3449_v34, 0.0 }
0x1756   :  { %v3434_v62 = vpop.xlane.xlu1 %3433  ;;  %3457 = vadd.xlane.f32.xlu0 %v3456_v23 }
0x1757   :  { %v3445_v49 = vsub.f32 %v3419_v27, %v3440_v46  ;;  %v3441_v2 = vmul.f32 0.03125, %v3434_v62 }
0x1759   :  { %v3446_v10 = vsub.f32 %v3420_v35, %v3441_v2  ;;  %v3450_v43 = vmul.f32 %v3445_v49, %v3445_v49 }
0x175b   :  { %v3459_v54 = vsel %vm153_vm2, %v3450_v43, 0.0  ;;  %v3451_v9 = vmul.f32 %v3446_v10, %v3446_v10 }
0x175c   :  { %3460 = vadd.xlane.f32.xlu1 %v3459_v54  ;;  %v3437_v21 = vpop.xlane.xlu0 %3436 }
0x175d   :  { %v3442_v56 = vmul.f32 0.03125, %v3437_v21  ;;  %v3462_v61 = vsel %vm153_vm2, %v3451_v9, 0.0 }
0x175e   :  { %3463 = vadd.xlane.f32.xlu0 %v3462_v61 }
0x175f   :  { %v3447_v50 = vsub.f32 %v3421_v52, %v3442_v56 }
0x1761   :  { %v3452_v45 = vmul.f32 %v3447_v50, %v3447_v50 }
0x1763   :  { %v3465_v38 = vsel %vm153_vm2, %v3452_v45, 0.0 }
0x1764   :  { %3466 = vadd.xlane.f32.xlu1 %v3465_v38 }
0x17e1   :  { %v3455_v53 = vpop.xlane.xlu1 %3454 }
0x17e2   :  { %v3468_v14 = vmul.f32 0.03125, %v3455_v53 }
0x17e3   :  { %v3458_v24 = vpop.xlane.xlu0 %3457 }
0x17e4   :  { %v3473_v42 = vadd.f32 1e-06, %v3468_v14  ;;  %v3469_v8 = vmul.f32 0.03125, %v3458_v24 }
0x17e6   :  { %4321 = vrsqrt.f32 %v3473_v42  ;;  %v3474_v40 = vadd.f32 1e-06, %v3469_v8 }
0x17e8   :  { %4323 = vrsqrt.f32 %v3474_v40 }
0x17e9   :  { %v3461_v60 = vpop.xlane.xlu1 %3460 }
0x17ea   :  { %v3470_v20 = vmul.f32 0.03125, %v3461_v60 }
0x17eb   :  { %v3464_v13 = vpop.xlane.xlu0 %3463 }
0x17ec   :  { %v3475_v32 = vadd.f32 1e-06, %v3470_v20  ;;  %v3471_v37 = vmul.f32 0.03125, %v3464_v13 }
0x17ee   :  { %4325 = vrsqrt.f32 %v3475_v32  ;;  %v3476_v16 = vadd.f32 1e-06, %v3471_v37 }
0x17f0   :  { %v4322_v28 = vpop.eup %4321  ;;  %4327 = vrsqrt.f32 %v3476_v16 }
0x17f1   :  { %v3483_v6 = vmul.f32 %v4322_v28, %v3443_v59  ;;  %v3467_v44 = vpop.xlane.xlu1 %3466 }
0x17f2   :  { %v4324_v11 = vpop.eup %4323  ;;  %v3472_v33 = vmul.f32 0.03125, %v3467_v44 }
0x17f3   :  { %v3492_v3 = vmul.f32 %v3491_v25, %v3483_v6  ;;  %v3484_v5 = vmul.f32 %v4324_v11, %v3444_v47 }
0x17f4   :  { %v3477_v0 = vadd.f32 1e-06, %v3472_v33 }
0x17f5   :  { %v3501_v57 = vadd.f32 %v3500_v39, %v3492_v3  ;;  %v3493_v27 = vmul.f32 %v3491_v25, %v3484_v5 }
0x17f6   :  { %4329 = vrsqrt.f32 %v3477_v0 }
0x17f7   :  { %3506 = vst.msk [vmem:[%s6357_s11] sm:$0xff] %vm153_vm2, %v3501_v57  ;;  %v3502_v26 = vadd.f32 %v3500_v39, %v3493_v27 }
0x17f8   :  { %v4326_v63 = vpop.eup %4325 }
0x17f9   :  { %3507 = vst.msk [vmem:[%s6357_s11 + $0x8] sm:$0xff] %vm153_vm2, %v3502_v26  ;;  %v3485_v12 = vmul.f32 %v4326_v63, %v3445_v49 }
0x17fa   :  { %v4328_v35 = vpop.eup %4327 }
0x17fb   :  { %v3494_v41 = vmul.f32 %v3491_v25, %v3485_v12  ;;  %v3486_v1 = vmul.f32 %v4328_v35, %v3446_v10 }
0x17fd   :  { %v3503_v18 = vadd.f32 %v3500_v39, %v3494_v41  ;;  %v3495_v7 = vmul.f32 %v3491_v25, %v3486_v1 }
0x17ff   :  { %3508 = vst.msk [vmem:[%s6357_s11 + $0x10] sm:$0xff] %vm153_vm2, %v3503_v18  ;;  %v3504_v58 = vadd.f32 %v3500_v39, %v3495_v7 }
0x1800   :  { %v4330_v30 = vpop.eup %4329 }
0x1801   :  { %3509 = vst.msk [vmem:[%s6357_s11 + $0x18] sm:$0xff] %vm153_vm2, %v3504_v58  ;;  %v3487_v52 = vmul.f32 %v4330_v30, %v3447_v50 }
0x1803   :  { %v3496_v4 = vmul.f32 %v3491_v25, %v3487_v52 }
0x1805   :  { %v3505_v22 = vadd.f32 %v3500_v39, %v3496_v4 }
0x1807   :  { %3510 = vst.msk [vmem:[%s6357_s11 + $0x20] sm:$0xff] %vm153_vm2, %v3505_v22 }

</bundles_post_ra>
